<compile_context>
chip_gen: v5e
topology: v5e:2x2
jax: 0.10.0
libtpu: 0.0.40
codegen_flags: <defaults>
</compile_context>

<pallas_src>
import jax
import jax.numpy as jnp
from jax import lax
from jax.experimental import pallas as pl
from jax.experimental.pallas import tpu as pltpu

_LANE = 128
_SUBLANE = 8
_T_CHUNK = 32          # time-chunk length for the pipelined input projection


def _round_up(x, m):
    return ((x + m - 1) // m) * m


def _sigmoid(x):
    # sigmoid(x) == 0.5 * tanh(0.5 * x) + 0.5  -> one EUP push per element.
    return 0.5 * jnp.tanh(0.5 * x) + 0.5


def _const_index_map(ndim):
    return lambda b: (0,) * ndim


# ----------------------------------------------------------------------------
# Fused kernel builder (static config closed over)
# ----------------------------------------------------------------------------
def _make_fused_kernel(T, T_pad, Tc, B_blk, F_pad, H_pad, n_gru, relu_flags,
                       mm_dtype, io_dtype, gi_dtype):
    n_fc = len(relu_flags)
    n_chunks = T_pad // Tc
    rem = T - (n_chunks - 1) * Tc          # real timesteps in the last chunk
    f32 = jnp.float32

    def kernel(*args):
        idx = 0
        x_ref = args[idx]; idx += 1
        gru_refs = []
        for _ in range(n_gru):
            gru_refs.append(args[idx:idx + 4]); idx += 4       # wih, whh, bi, bhn
        fc_refs = []
        for _ in range(n_fc):
            fc_refs.append(args[idx:idx + 2]); idx += 2        # w, b
        out_ref = args[idx]; idx += 1
        gi_ref = args[idx]; idx += 1                           # (2*Tc, B_blk, 3*H_pad)
        seq_ref = args[idx] if n_gru > 1 else None             # (T_pad, B_blk, H_pad)

        # Padded time rows of the inter-layer sequence are read by the last
        # chunk's (prefetched) Gi matmul but never by the recurrence; make them
        # finite/zero once so no uninitialized VMEM flows into a matmul.
        if (seq_ref is not None) and (T_pad > T):
            seq_ref[pl.ds(T, T_pad - T)] = jnp.zeros(
                (T_pad - T, B_blk, H_pad), io_dtype)

        def run_layer(layer, in_ref, in_w):
            wih_ref, whh_ref, bi_ref, bhn_ref = gru_refs[layer]
            is_last = (layer == n_gru - 1)

            # Hoisted, chunked input projection: Gi = X_chunk @ Wih + b
            # (b_ih + b_hh folded for r/z; only b_ih for n).
            def compute_gi(c, slot):
                xs = in_ref[pl.ds(c * Tc, Tc)].reshape(Tc * B_blk, in_w)
                gi = jnp.dot(xs.astype(mm_dtype), wih_ref[...],
                             preferred_element_type=f32) + bi_ref[...]
                gi_ref[pl.ds(slot * Tc, Tc)] = (
                    gi.reshape(Tc, B_blk, 3 * H_pad).astype(gi_dtype))

            # b_hh_n broadcast hoisted off the serial per-step path.
            bhn_b = jnp.broadcast_to(bhn_ref[...], (B_blk, H_pad)).astype(f32)

            def recurrence(c, slot, nsteps, h):
                base = slot * Tc
                t0 = c * Tc

                def step(t, h):
                    gh = jnp.dot(h.astype(mm_dtype), whh_ref[...],
                                 preferred_element_type=f32)
                    gi = gi_ref[base + t].astype(f32)
                    r = _sigmoid(gi[:, 0:H_pad] + gh[:, 0:H_pad])
                    z = _sigmoid(gi[:, H_pad:2 * H_pad] + gh[:, H_pad:2 * H_pad])
                    n = jnp.tanh(gi[:, 2 * H_pad:] + r * (gh[:, 2 * H_pad:] + bhn_b))
                    h_new = h + (1.0 - z) * (n - h)            # == (1-z)*n + z*h
                    if not is_last:
                        seq_ref[t0 + t] = h_new.astype(io_dtype)
                    return h_new

                unroll = True if nsteps <= 16 else 4
                return lax.fori_loop(0, nsteps, step, h, unroll=unroll)

            # Software pipeline: issue the next chunk's MXU-bound Gi matmul
            # before the current chunk's latency-bound recurrence.
            compute_gi(0, 0)

            def chunk_body(c, h):
                compute_gi(c + 1, (c + 1) % 2)     # prefetch next chunk's Gi
                return recurrence(c, c % 2, Tc, h)

            h0 = jnp.zeros((B_blk, H_pad), f32)
            h = lax.fori_loop(0, n_chunks - 1, chunk_body, h0)
            # Last chunk: only `rem` real timesteps (the rest is zero padding).
            h = recurrence(n_chunks - 1, (n_chunks - 1) % 2, rem, h)
            return h

        h = run_layer(0, x_ref, F_pad)
        for layer in range(1, n_gru):
            h = run_layer(layer, seq_ref, H_pad)

        # Fused FC epilogue (dropout p=0 / eval -> identity); lane-dense output.
        y = h
        for i, (w_ref, b_ref) in enumerate(fc_refs):
            y = jnp.dot(y.astype(mm_dtype), w_ref[...],
                        preferred_element_type=f32) + b_ref[...]
            if relu_flags[i]:
                y = jnp.maximum(y, 0.0)
        out_ref[...] = y.astype(out_ref.dtype)

    return kernel


# ----------------------------------------------------------------------------
# One-time parameter preparation: transpose, pad, fold biases, dtype cast
# ----------------------------------------------------------------------------
def prepare_params(params, input_size, output_size, *, use_bf16=True):
    H = params["gru"][0]["w_hh"].shape[1]
    H_pad = _round_up(H, _LANE)
    F_pad = _round_up(input_size, _LANE)
    mm_dtype = jnp.bfloat16 if use_bf16 else jnp.float32   # matmul operands
    io_dtype = mm_dtype                                    # x / inter-layer seq
    gi_dtype = mm_dtype                                    # Gi scratch storage

    gru_arrays = []
    for layer, lp in enumerate(params["gru"]):
        in_f = lp["w_ih"].shape[1]
        in_pad = F_pad if layer == 0 else H_pad
        w_ih = jnp.asarray(lp["w_ih"], jnp.float32)     # (3H, in_f), gates r,z,n
        w_hh = jnp.asarray(lp["w_hh"], jnp.float32)     # (3H, H)
        b_ih = jnp.asarray(lp["b_ih"], jnp.float32)
        b_hh = jnp.asarray(lp["b_hh"], jnp.float32)

        wih_p = jnp.zeros((in_pad, 3 * H_pad), jnp.float32)
        whh_p = jnp.zeros((H_pad, 3 * H_pad), jnp.float32)
        bi_p = jnp.zeros((1, 3 * H_pad), jnp.float32)
        bhn_p = jnp.zeros((1, H_pad), jnp.float32)
        for g in range(3):
            wih_p = wih_p.at[:in_f, g * H_pad:g * H_pad + H].set(
                w_ih[g * H:(g + 1) * H, :].T)
            whh_p = whh_p.at[:H, g * H_pad:g * H_pad + H].set(
                w_hh[g * H:(g + 1) * H, :].T)
        # r, z: fold b_ih + b_hh into the precomputed input projection.
        bi_p = bi_p.at[0, 0:H].set(b_ih[0:H] + b_hh[0:H])
        bi_p = bi_p.at[0, H_pad:H_pad + H].set(b_ih[H:2 * H] + b_hh[H:2 * H])
        # n: only b_ih in Gi; b_hh_n added inside r*(.) per torch semantics.
        bi_p = bi_p.at[0, 2 * H_pad:2 * H_pad + H].set(b_ih[2 * H:3 * H])
        bhn_p = bhn_p.at[0, 0:H].set(b_hh[2 * H:3 * H])
        # Weights go to the MXU dtype; biases stay f32 (post-matmul adds).
        gru_arrays.extend([wih_p.astype(mm_dtype), whh_p.astype(mm_dtype),
                           bi_p, bhn_p])

    fc_arrays = []
    relu_flags = []
    n_fc = len(params["fc"])
    fin_pad = H_pad
    out_pad = _round_up(output_size, _LANE)
    for i, lp in enumerate(params["fc"]):
        w = jnp.asarray(lp["w"], jnp.float32)           # (Fout, Fin)
        b = jnp.asarray(lp["b"], jnp.float32)
        fout, fin = w.shape
        fout_pad = _round_up(fout, _LANE)
        w_p = jnp.zeros((fin_pad, fout_pad), jnp.float32).at[:fin, :fout].set(w.T)
        b_p = jnp.zeros((1, fout_pad), jnp.float32).at[0, :fout].set(b)
        fc_arrays.extend([w_p.astype(mm_dtype), b_p])
        relu_flags.append(i < n_fc - 1)
        fin_pad = fout_pad

    return dict(
        gru_arrays=gru_arrays, fc_arrays=fc_arrays,
        relu_flags=tuple(relu_flags), n_gru=len(params["gru"]),
        F=input_size, F_pad=F_pad, H=H, H_pad=H_pad,
        output_size=output_size, out_pad=out_pad,
        mm_dtype=mm_dtype, io_dtype=io_dtype, gi_dtype=gi_dtype,
    )


# ----------------------------------------------------------------------------
# Forward pass (matches Baseline.forward)
# ----------------------------------------------------------------------------
def baseline_forward(prepared, x):
    """x: (B, T, input_size) or (T, input_size) -> (B, out) / (out,)."""
    two_dimensional = x.ndim == 2
    if two_dimensional:
        x = x[None]                                    # unsqueeze(0)
    x = x.astype(jnp.float32)
    B, T, F = x.shape
    F_pad, H_pad = prepared["F_pad"], prepared["H_pad"]
    n_gru = prepared["n_gru"]
    mm_dtype = prepared["mm_dtype"]
    io_dtype = prepared["io_dtype"]
    gi_dtype = prepared["gi_dtype"]
    out_pad = prepared["out_pad"]

    # Batch blocking: >= 16 rows -> split into sublane-aligned blocks so the
    # "parallel" grid axis can be sharded across v7x's two TensorCores.
    # NOTE: per-step MXU utilization scales ~free with B up to the MXU row
    # count, so batch as many independent sequences as possible at the caller.
    B8 = _round_up(B, _SUBLANE)
    if B8 <= _SUBLANE:
        B_blk = _SUBLANE
    else:
        B_blk = min(64, _round_up((B8 + 1) // 2, _SUBLANE))
    B_pad = _round_up(B8, B_blk)
    n_b_blocks = B_pad // B_blk

    Tc = min(_T_CHUNK, T)
    T_pad = _round_up(T, Tc)

    # Single fused transpose+pad pass: (B,T,F) -> time-major (T_pad,B_pad,F_pad).
    x_p = jnp.zeros((T_pad, B_pad, F_pad), io_dtype)
    x_p = x_p.at[:T, :B, :F].set(jnp.transpose(x, (1, 0, 2)).astype(io_dtype))

    kernel = _make_fused_kernel(T, T_pad, Tc, B_blk, F_pad, H_pad, n_gru,
                                prepared["relu_flags"], mm_dtype, io_dtype,
                                gi_dtype)

    weight_arrays = list(prepared["gru_arrays"]) + list(prepared["fc_arrays"])
    in_specs = [pl.BlockSpec((T_pad, B_blk, F_pad), lambda b: (0, b, 0))]
    for a in weight_arrays:
        in_specs.append(pl.BlockSpec(tuple(a.shape), _const_index_map(a.ndim)))
    out_spec = pl.BlockSpec((B_blk, out_pad), lambda b: (b, 0))

    scratch = [pltpu.VMEM((2 * Tc, B_blk, 3 * H_pad), gi_dtype)]   # Gi (dbl buf)
    if n_gru > 1:
        scratch.append(pltpu.VMEM((T_pad, B_blk, H_pad), io_dtype))  # seq

    # Explicit scoped-VMEM budget (defaults are only 16/32 MiB); never lowered
    # below 32 MiB, ~30% headroom, capped well under physical VMEM.
    isz = lambda dt: jnp.dtype(dt).itemsize
    w_bytes = sum(int(a.size) * a.dtype.itemsize for a in weight_arrays)
    resident = (
        2 * w_bytes
        + 2 * T_pad * B_blk * F_pad * isz(io_dtype)          # x block (dbl buf)
        + 2 * B_blk * out_pad * 4                            # out block
        + 2 * Tc * B_blk * 3 * H_pad * isz(gi_dtype)         # Gi scratch
        + (T_pad * B_blk * H_pad * isz(io_dtype) if n_gru > 1 else 0))
    vmem_limit = int(min(max(32 << 20, int(resident * 1.3) + (4 << 20)),
                         100 << 20))

    out_padded = pl.pallas_call(
        kernel,
        grid=(n_b_blocks,),
        out_shape=jax.ShapeDtypeStruct((B_pad, out_pad), jnp.float32),
        in_specs=in_specs,
        out_specs=out_spec,
        scratch_shapes=scratch,
        compiler_params=pltpu.CompilerParams(
            dimension_semantics=("parallel",),
            vmem_limit_bytes=vmem_limit),
    )(x_p, *weight_arrays)

    out = out_padded[:B, :prepared["output_size"]]
    # dropout(p=0) / eval -> identity
    if two_dimensional:
        return out[0]                                  # squeeze(0)
    return out


# ----------------------------------------------------------------------------
# Parameter construction (PyTorch layout, uniform(-1/sqrt(fan), 1/sqrt(fan)))
# ----------------------------------------------------------------------------
def init_params(key, input_size, output_size, rnn_num_layers, rnn_num_nodes,
                linear_num_layers, linear_num_nodes):
    H = rnn_num_nodes
    bound_rnn = 1.0 / (H ** 0.5)
    params = {"gru": [], "fc": []}
    for layer in range(rnn_num_layers):
        in_f = input_size if layer == 0 else H
        key, k1, k2, k3, k4 = jax.random.split(key, 5)
        params["gru"].append(dict(
            w_ih=jax.random.uniform(k1, (3 * H, in_f), jnp.float32,
                                    -bound_rnn, bound_rnn),
            w_hh=jax.random.uniform(k2, (3 * H, H), jnp.float32,
                                    -bound_rnn, bound_rnn),
            b_ih=jax.random.uniform(k3, (3 * H,), jnp.float32,
                                    -bound_rnn, bound_rnn),
            b_hh=jax.random.uniform(k4, (3 * H,), jnp.float32,
                                    -bound_rnn, bound_rnn),
        ))
    if linear_num_layers > 1:
        dims = [H, linear_num_nodes]
        for _ in range(linear_num_layers - 2):
            dims.append(linear_num_nodes)
        dims.append(output_size)
    else:
        dims = [H, output_size]
    for i in range(len(dims) - 1):
        fin, fout = dims[i], dims[i + 1]
        bound = 1.0 / (fin ** 0.5)
        key, k1, k2 = jax.random.split(key, 3)
        params["fc"].append(dict(
            w=jax.random.uniform(k1, (fout, fin), jnp.float32, -bound, bound),
            b=jax.random.uniform(k2, (fout,), jnp.float32, -bound, bound),
        ))
    return params


# Pure-JAX f32 reference (same math as torch.nn.GRU + Linear stack).
def reference_forward(params, x):
    def gru_ref(seq, lp):
        H = lp["w_hh"].shape[1]
        wih, whh = lp["w_ih"].T, lp["w_hh"].T
        bih, bhh = lp["b_ih"], lp["b_hh"]

        def step(h, x_t):
            gi = x_t @ wih + bih
            gh = h @ whh + bhh
            r = jax.nn.sigmoid(gi[:, :H] + gh[:, :H])
            z = jax.nn.sigmoid(gi[:, H:2 * H] + gh[:, H:2 * H])
            n = jnp.tanh(gi[:, 2 * H:] + r * gh[:, 2 * H:])
            h_new = (1.0 - z) * n + z * h
            return h_new, h_new

        h0 = jnp.zeros((seq.shape[1], H), jnp.float32)
        _, outs = lax.scan(step, h0, seq)
        return outs

    seq = jnp.transpose(x, (1, 0, 2))
    for lp in params["gru"]:
        seq = gru_ref(seq, lp)
    out = seq[-1]
    n_fc = len(params["fc"])
    for i, lp in enumerate(params["fc"]):
        out = out @ lp["w"].T + lp["b"]
        if i < n_fc - 1:
            out = jnp.maximum(out, 0.0)
    return out


if __name__ == "__main__":
    # Small, forward-consistent shapes.
    B, T = 2, 8
    input_size = 8
    output_size = 4
    rnn_num_layers = 2
    rnn_num_nodes = 32
    linear_num_layers = 2
    linear_num_nodes = 16

    key = jax.random.PRNGKey(0)
    key, kx, kp = jax.random.split(key, 3)
    x = jax.random.normal(kx, (B, T, input_size), jnp.float32)
    params = init_params(kp, input_size, output_size, rnn_num_layers,
                         rnn_num_nodes, linear_num_layers, linear_num_nodes)

    ref = reference_forward(params, x)

    # 1) exact f32 mode: tight check against the pure-JAX reference.
    prep_f32 = prepare_params(params, input_size, output_size, use_bf16=False)
    out_f32 = jax.block_until_ready(baseline_forward(prep_f32, x))
    assert out_f32.shape == (B, output_size)
    assert jnp.allclose(out_f32, ref, atol=1e-4, rtol=1e-4), "f32 mismatch"

    # 2) fast mode (bf16 matmul operands / bf16 Gi+seq scratch, f32 gate math):
    #    tolerance sized for bf16 matmul rounding.
    prep_bf16 = prepare_params(params, input_size, output_size, use_bf16=True)
    out_bf16 = jax.block_until_ready(baseline_forward(prep_bf16, x))
    assert out_bf16.shape == (B, output_size)
    assert jnp.allclose(out_bf16, ref, atol=3e-2, rtol=3e-2), "bf16 mismatch"

    # 3) 2-D input path (single sequence, torch's unsqueeze/squeeze branch).
    x2d = x[0]
    out_2d = jax.block_until_ready(baseline_forward(prep_bf16, x2d))
    assert out_2d.shape == (output_size,)
    assert jnp.allclose(out_2d, ref[0], atol=3e-2, rtol=3e-2), "2-D mismatch"

    print("KERNEL_OK")
</pallas_src>

<mosaic_0001>
module attributes {stable_mosaic.version = 11 : i64} {
  func.func @kernel(%arg0: i32, %arg1: memref<8x8x128xf32, #tpu.memory_space<vmem>>, %arg2: memref<128x384xf32, #tpu.memory_space<vmem>>, %arg3: memref<128x384xf32, #tpu.memory_space<vmem>>, %arg4: memref<1x384xf32, #tpu.memory_space<vmem>>, %arg5: memref<1x128xf32, #tpu.memory_space<vmem>>, %arg6: memref<128x384xf32, #tpu.memory_space<vmem>>, %arg7: memref<128x384xf32, #tpu.memory_space<vmem>>, %arg8: memref<1x384xf32, #tpu.memory_space<vmem>>, %arg9: memref<1x128xf32, #tpu.memory_space<vmem>>, %arg10: memref<128x128xf32, #tpu.memory_space<vmem>>, %arg11: memref<1x128xf32, #tpu.memory_space<vmem>>, %arg12: memref<128x128xf32, #tpu.memory_space<vmem>>, %arg13: memref<1x128xf32, #tpu.memory_space<vmem>>, %arg14: memref<8x128xf32, #tpu.memory_space<vmem>>, %arg15: memref<16x8x384xf32, #tpu.memory_space<vmem>>, %arg16: memref<8x8x128xf32, #tpu.memory_space<vmem>>) attributes {dimension_semantics = [#tpu.dimension_semantics<parallel>], iteration_bounds = array<i64: 1>, scalar_prefetch = 0 : i64, scratch_operands = 2 : i64, tpu.core_type = #tpu.core_type<tc>, window_params = [{transform_indices = @transform_0, window_bounds = array<i64: 8, 8, 128>}, {pipeline_mode = #tpu.pipeline_mode<synchronous>, transform_indices = @transform_1, window_bounds = array<i64: 128, 384>}, {pipeline_mode = #tpu.pipeline_mode<synchronous>, transform_indices = @transform_2, window_bounds = array<i64: 128, 384>}, {pipeline_mode = #tpu.pipeline_mode<synchronous>, transform_indices = @transform_3, window_bounds = array<i64: 1, 384>}, {pipeline_mode = #tpu.pipeline_mode<synchronous>, transform_indices = @transform_4, window_bounds = array<i64: 1, 128>}, {pipeline_mode = #tpu.pipeline_mode<synchronous>, transform_indices = @transform_5, window_bounds = array<i64: 128, 384>}, {pipeline_mode = #tpu.pipeline_mode<synchronous>, transform_indices = @transform_6, window_bounds = array<i64: 128, 384>}, {pipeline_mode = #tpu.pipeline_mode<synchronous>, transform_indices = @transform_7, window_bounds = array<i64: 1, 384>}, {pipeline_mode = #tpu.pipeline_mode<synchronous>, transform_indices = @transform_8, window_bounds = array<i64: 1, 128>}, {pipeline_mode = #tpu.pipeline_mode<synchronous>, transform_indices = @transform_9, window_bounds = array<i64: 128, 128>}, {pipeline_mode = #tpu.pipeline_mode<synchronous>, transform_indices = @transform_10, window_bounds = array<i64: 1, 128>}, {pipeline_mode = #tpu.pipeline_mode<synchronous>, transform_indices = @transform_11, window_bounds = array<i64: 128, 128>}, {pipeline_mode = #tpu.pipeline_mode<synchronous>, transform_indices = @transform_12, window_bounds = array<i64: 1, 128>}, {transform_indices = @transform_13, window_bounds = array<i64: 8, 128>}]} {
    %c0 = arith.constant 0 : index
    %c0_0 = arith.constant 0 : index
    %0 = vector.load %arg5[%c0, %c0_0] : memref<1x128xf32, #tpu.memory_space<vmem>>, vector<1x128xf32>
    %1 = vector.shape_cast %0 : vector<1x128xf32> to vector<1x128xf32>
    %2 = vector.broadcast %1 : vector<1x128xf32> to vector<8x128xf32>
    %c0_1 = arith.constant 0 : index
    %c0_2 = arith.constant 0 : index
    %c0_3 = arith.constant 0 : index
    %3 = vector.load %arg1[%c0_1, %c0_2, %c0_3] : memref<8x8x128xf32, #tpu.memory_space<vmem>>, vector<8x8x128xf32>
    %4 = vector.shape_cast %3 : vector<8x8x128xf32> to vector<64x128xf32>
    %c0_4 = arith.constant 0 : index
    %c0_5 = arith.constant 0 : index
    %5 = vector.load %arg2[%c0_4, %c0_5] : memref<128x384xf32, #tpu.memory_space<vmem>>, vector<128x384xf32>
    %cst = arith.constant dense<0.000000e+00> : vector<64x384xf32>
    %6 = tpu.matmul %4, %5, %cst {dimension_numbers = #tpu.dot_dimension_numbers<[1], [0], [0], [1], [0, 0, 1, 1], [], []>} : vector<64x128xf32>, vector<128x384xf32>, vector<64x384xf32> -> vector<64x384xf32>
    %c0_6 = arith.constant 0 : index
    %c0_7 = arith.constant 0 : index
    %7 = vector.load %arg4[%c0_6, %c0_7] : memref<1x384xf32, #tpu.memory_space<vmem>>, vector<1x384xf32>
    %8 = vector.broadcast %7 : vector<1x384xf32> to vector<64x384xf32>
    %9 = arith.addf %6, %8 : vector<64x384xf32>
    %10 = vector.shape_cast %9 : vector<64x384xf32> to vector<8x8x384xf32>
    %c0_8 = arith.constant 0 : index
    %c0_9 = arith.constant 0 : index
    %c0_10 = arith.constant 0 : index
    %11 = vector.load %arg15[%c0_8, %c0_9, %c0_10] : memref<16x8x384xf32, #tpu.memory_space<vmem>>, vector<8x8x384xf32>
    tpu.vector_store %arg15[%c0_8, %c0_9, %c0_10], %10 {strides = array<i32>} : memref<16x8x384xf32, #tpu.memory_space<vmem>>, vector<8x8x384xf32>,
    %cst_11 = arith.constant 0.000000e+00 : f32
    %12 = vector.broadcast %cst_11 : f32 to vector<8x128xf32>
    %c0_i32 = arith.constant 0 : i32
    %c0_i32_12 = arith.constant 0 : i32
    %13 = arith.addi %c0_i32, %c0_i32_12 : i32
    %c1_i32 = arith.constant 1 : i32
    %14 = scf.for %arg17 = %c0_i32 to %13 step %c1_i32 iter_args(%arg18 = %12) -> (vector<8x128xf32>)  : i32 {
      %c1_i32_288 = arith.constant 1 : i32
      %675 = arith.addi %arg17, %c1_i32_288 : i32
      %c1_i32_289 = arith.constant 1 : i32
      %676 = arith.addi %arg17, %c1_i32_289 : i32
      %c2_i32_290 = arith.constant 2 : i32
      %c0_i32_291 = arith.constant 0 : i32
      %677 = arith.cmpi eq, %c2_i32_290, %c0_i32_291 : i32
      %c1_i32_292 = arith.constant 1 : i32
      %678 = arith.select %677, %c1_i32_292, %c2_i32_290 : i32
      %679 = arith.remsi %676, %678 : i32
      %c0_i32_293 = arith.constant 0 : i32
      %680 = arith.cmpi ne, %679, %c0_i32_293 : i32
      %c0_i32_294 = arith.constant 0 : i32
      %681 = arith.cmpi slt, %679, %c0_i32_294 : i32
      %c0_i32_295 = arith.constant 0 : i32
      %682 = arith.cmpi slt, %678, %c0_i32_295 : i32
      %683 = arith.xori %681, %682 : i1
      %684 = arith.andi %683, %680 : i1
      %685 = arith.addi %679, %678 : i32
      %686 = arith.select %684, %685, %679 : i32
      %c8_i32_296 = arith.constant 8 : i32
      %687 = arith.muli %675, %c8_i32_296 : i32
      %688 = arith.index_cast %687 : i32 to index
      %c0_297 = arith.constant 0 : index
      %c0_298 = arith.constant 0 : index
      %689 = vector.load %arg1[%688, %c0_297, %c0_298] : memref<8x8x128xf32, #tpu.memory_space<vmem>>, vector<8x8x128xf32>
      %690 = vector.shape_cast %689 : vector<8x8x128xf32> to vector<64x128xf32>
      %c0_299 = arith.constant 0 : index
      %c0_300 = arith.constant 0 : index
      %691 = vector.load %arg2[%c0_299, %c0_300] : memref<128x384xf32, #tpu.memory_space<vmem>>, vector<128x384xf32>
      %cst_301 = arith.constant dense<0.000000e+00> : vector<64x384xf32>
      %692 = tpu.matmul %690, %691, %cst_301 {dimension_numbers = #tpu.dot_dimension_numbers<[1], [0], [0], [1], [0, 0, 1, 1], [], []>} : vector<64x128xf32>, vector<128x384xf32>, vector<64x384xf32> -> vector<64x384xf32>
      %c0_302 = arith.constant 0 : index
      %c0_303 = arith.constant 0 : index
      %693 = vector.load %arg4[%c0_302, %c0_303] : memref<1x384xf32, #tpu.memory_space<vmem>>, vector<1x384xf32>
      %694 = vector.broadcast %693 : vector<1x384xf32> to vector<64x384xf32>
      %695 = arith.addf %692, %694 : vector<64x384xf32>
      %696 = vector.shape_cast %695 : vector<64x384xf32> to vector<8x8x384xf32>
      %c8_i32_304 = arith.constant 8 : i32
      %697 = arith.muli %686, %c8_i32_304 : i32
      %698 = arith.index_cast %697 : i32 to index
      %c0_305 = arith.constant 0 : index
      %c0_306 = arith.constant 0 : index
      %699 = vector.load %arg15[%698, %c0_305, %c0_306] : memref<16x8x384xf32, #tpu.memory_space<vmem>>, vector<8x8x384xf32>
      tpu.vector_store %arg15[%698, %c0_305, %c0_306], %696 {strides = array<i32>} : memref<16x8x384xf32, #tpu.memory_space<vmem>>, vector<8x8x384xf32>,
      %c2_i32_307 = arith.constant 2 : i32
      %c0_i32_308 = arith.constant 0 : i32
      %700 = arith.cmpi eq, %c2_i32_307, %c0_i32_308 : i32
      %c1_i32_309 = arith.constant 1 : i32
      %701 = arith.select %700, %c1_i32_309, %c2_i32_307 : i32
      %702 = arith.remsi %arg17, %701 : i32
      %c0_i32_310 = arith.constant 0 : i32
      %703 = arith.cmpi ne, %702, %c0_i32_310 : i32
      %c0_i32_311 = arith.constant 0 : i32
      %704 = arith.cmpi slt, %702, %c0_i32_311 : i32
      %c0_i32_312 = arith.constant 0 : i32
      %705 = arith.cmpi slt, %701, %c0_i32_312 : i32
      %706 = arith.xori %704, %705 : i1
      %707 = arith.andi %706, %703 : i1
      %708 = arith.addi %702, %701 : i32
      %709 = arith.select %707, %708, %702 : i32
      %c8_i32_313 = arith.constant 8 : i32
      %710 = arith.muli %709, %c8_i32_313 : i32
      %c8_i32_314 = arith.constant 8 : i32
      %711 = arith.muli %arg17, %c8_i32_314 : i32
      %c0_i32_315 = arith.constant 0 : i32
      %c0_316 = arith.constant 0 : index
      %c0_317 = arith.constant 0 : index
      %712 = vector.load %arg3[%c0_316, %c0_317] : memref<128x384xf32, #tpu.memory_space<vmem>>, vector<128x384xf32>
      %cst_318 = arith.constant dense<0.000000e+00> : vector<8x384xf32>
      %713 = tpu.matmul %arg18, %712, %cst_318 {dimension_numbers = #tpu.dot_dimension_numbers<[1], [0], [0], [1], [0, 0, 1, 1], [], []>} : vector<8x128xf32>, vector<128x384xf32>, vector<8x384xf32> -> vector<8x384xf32>
      %714 = arith.addi %710, %c0_i32_315 : i32
      %715 = arith.index_cast %714 : i32 to index
      %c0_319 = arith.constant 0 : index
      %c0_320 = arith.constant 0 : index
      %716 = vector.load %arg15[%715, %c0_319, %c0_320] : memref<16x8x384xf32, #tpu.memory_space<vmem>>, vector<1x8x384xf32>
      %717 = vector.shape_cast %716 : vector<1x8x384xf32> to vector<8x384xf32>
      %718 = vector.extract_strided_slice %717 {offsets = [0, 0], sizes = [8, 128], strides = [1, 1]} : vector<8x384xf32> to vector<8x128xf32>
      %719 = vector.extract_strided_slice %713 {offsets = [0, 0], sizes = [8, 128], strides = [1, 1]} : vector<8x384xf32> to vector<8x128xf32>
      %720 = arith.addf %718, %719 : vector<8x128xf32>
      %cst_321 = arith.constant 5.000000e-01 : f32
      %721 = vector.broadcast %cst_321 : f32 to vector<8x128xf32>
      %722 = arith.mulf %721, %720 : vector<8x128xf32>
      %723 = math.tanh %722 : vector<8x128xf32>
      %cst_322 = arith.constant 5.000000e-01 : f32
      %724 = vector.broadcast %cst_322 : f32 to vector<8x128xf32>
      %725 = arith.mulf %724, %723 : vector<8x128xf32>
      %cst_323 = arith.constant 5.000000e-01 : f32
      %726 = vector.broadcast %cst_323 : f32 to vector<8x128xf32>
      %727 = arith.addf %725, %726 : vector<8x128xf32>
      %728 = vector.extract_strided_slice %717 {offsets = [0, 128], sizes = [8, 128], strides = [1, 1]} : vector<8x384xf32> to vector<8x128xf32>
      %729 = vector.extract_strided_slice %713 {offsets = [0, 128], sizes = [8, 128], strides = [1, 1]} : vector<8x384xf32> to vector<8x128xf32>
      %730 = arith.addf %728, %729 : vector<8x128xf32>
      %cst_324 = arith.constant 5.000000e-01 : f32
      %731 = vector.broadcast %cst_324 : f32 to vector<8x128xf32>
      %732 = arith.mulf %731, %730 : vector<8x128xf32>
      %733 = math.tanh %732 : vector<8x128xf32>
      %cst_325 = arith.constant 5.000000e-01 : f32
      %734 = vector.broadcast %cst_325 : f32 to vector<8x128xf32>
      %735 = arith.mulf %734, %733 : vector<8x128xf32>
      %cst_326 = arith.constant 5.000000e-01 : f32
      %736 = vector.broadcast %cst_326 : f32 to vector<8x128xf32>
      %737 = arith.addf %735, %736 : vector<8x128xf32>
      %738 = vector.extract_strided_slice %717 {offsets = [0, 256], sizes = [8, 128], strides = [1, 1]} : vector<8x384xf32> to vector<8x128xf32>
      %739 = vector.extract_strided_slice %713 {offsets = [0, 256], sizes = [8, 128], strides = [1, 1]} : vector<8x384xf32> to vector<8x128xf32>
      %740 = arith.addf %739, %2 : vector<8x128xf32>
      %741 = arith.mulf %727, %740 : vector<8x128xf32>
      %742 = arith.addf %738, %741 : vector<8x128xf32>
      %743 = math.tanh %742 : vector<8x128xf32>
      %cst_327 = arith.constant 1.000000e+00 : f32
      %744 = vector.broadcast %cst_327 : f32 to vector<8x128xf32>
      %745 = arith.subf %744, %737 : vector<8x128xf32>
      %746 = arith.subf %743, %arg18 : vector<8x128xf32>
      %747 = arith.mulf %745, %746 : vector<8x128xf32>
      %748 = arith.addf %arg18, %747 : vector<8x128xf32>
      %749 = arith.addi %711, %c0_i32_315 : i32
      %750 = arith.index_cast %749 : i32 to index
      %c0_328 = arith.constant 0 : index
      %c0_329 = arith.constant 0 : index
      %751 = vector.load %arg16[%750, %c0_328, %c0_329] : memref<8x8x128xf32, #tpu.memory_space<vmem>>, vector<1x8x128xf32>
      %752 = vector.shape_cast %751 : vector<1x8x128xf32> to vector<8x128xf32>
      %753 = vector.shape_cast %748 : vector<8x128xf32> to vector<1x8x128xf32>
      tpu.vector_store %arg16[%750, %c0_328, %c0_329], %753 {strides = array<i32>} : memref<8x8x128xf32, #tpu.memory_space<vmem>>, vector<1x8x128xf32>,
      %c1_i32_330 = arith.constant 1 : i32
      %c0_331 = arith.constant 0 : index
      %c0_332 = arith.constant 0 : index
      %754 = vector.load %arg3[%c0_331, %c0_332] : memref<128x384xf32, #tpu.memory_space<vmem>>, vector<128x384xf32>
      %cst_333 = arith.constant dense<0.000000e+00> : vector<8x384xf32>
      %755 = tpu.matmul %748, %754, %cst_333 {dimension_numbers = #tpu.dot_dimension_numbers<[1], [0], [0], [1], [0, 0, 1, 1], [], []>} : vector<8x128xf32>, vector<128x384xf32>, vector<8x384xf32> -> vector<8x384xf32>
      %756 = arith.addi %710, %c1_i32_330 : i32
      %757 = arith.index_cast %756 : i32 to index
      %c0_334 = arith.constant 0 : index
      %c0_335 = arith.constant 0 : index
      %758 = vector.load %arg15[%757, %c0_334, %c0_335] : memref<16x8x384xf32, #tpu.memory_space<vmem>>, vector<1x8x384xf32>
      %759 = vector.shape_cast %758 : vector<1x8x384xf32> to vector<8x384xf32>
      %760 = vector.extract_strided_slice %759 {offsets = [0, 0], sizes = [8, 128], strides = [1, 1]} : vector<8x384xf32> to vector<8x128xf32>
      %761 = vector.extract_strided_slice %755 {offsets = [0, 0], sizes = [8, 128], strides = [1, 1]} : vector<8x384xf32> to vector<8x128xf32>
      %762 = arith.addf %760, %761 : vector<8x128xf32>
      %cst_336 = arith.constant 5.000000e-01 : f32
      %763 = vector.broadcast %cst_336 : f32 to vector<8x128xf32>
      %764 = arith.mulf %763, %762 : vector<8x128xf32>
      %765 = math.tanh %764 : vector<8x128xf32>
      %cst_337 = arith.constant 5.000000e-01 : f32
      %766 = vector.broadcast %cst_337 : f32 to vector<8x128xf32>
      %767 = arith.mulf %766, %765 : vector<8x128xf32>
      %cst_338 = arith.constant 5.000000e-01 : f32
      %768 = vector.broadcast %cst_338 : f32 to vector<8x128xf32>
      %769 = arith.addf %767, %768 : vector<8x128xf32>
      %770 = vector.extract_strided_slice %759 {offsets = [0, 128], sizes = [8, 128], strides = [1, 1]} : vector<8x384xf32> to vector<8x128xf32>
      %771 = vector.extract_strided_slice %755 {offsets = [0, 128], sizes = [8, 128], strides = [1, 1]} : vector<8x384xf32> to vector<8x128xf32>
      %772 = arith.addf %770, %771 : vector<8x128xf32>
      %cst_339 = arith.constant 5.000000e-01 : f32
      %773 = vector.broadcast %cst_339 : f32 to vector<8x128xf32>
      %774 = arith.mulf %773, %772 : vector<8x128xf32>
      %775 = math.tanh %774 : vector<8x128xf32>
      %cst_340 = arith.constant 5.000000e-01 : f32
      %776 = vector.broadcast %cst_340 : f32 to vector<8x128xf32>
      %777 = arith.mulf %776, %775 : vector<8x128xf32>
      %cst_341 = arith.constant 5.000000e-01 : f32
      %778 = vector.broadcast %cst_341 : f32 to vector<8x128xf32>
      %779 = arith.addf %777, %778 : vector<8x128xf32>
      %780 = vector.extract_strided_slice %759 {offsets = [0, 256], sizes = [8, 128], strides = [1, 1]} : vector<8x384xf32> to vector<8x128xf32>
      %781 = vector.extract_strided_slice %755 {offsets = [0, 256], sizes = [8, 128], strides = [1, 1]} : vector<8x384xf32> to vector<8x128xf32>
      %782 = arith.addf %781, %2 : vector<8x128xf32>
      %783 = arith.mulf %769, %782 : vector<8x128xf32>
      %784 = arith.addf %780, %783 : vector<8x128xf32>
      %785 = math.tanh %784 : vector<8x128xf32>
      %cst_342 = arith.constant 1.000000e+00 : f32
      %786 = vector.broadcast %cst_342 : f32 to vector<8x128xf32>
      %787 = arith.subf %786, %779 : vector<8x128xf32>
      %788 = arith.subf %785, %748 : vector<8x128xf32>
      %789 = arith.mulf %787, %788 : vector<8x128xf32>
      %790 = arith.addf %748, %789 : vector<8x128xf32>
      %791 = arith.addi %711, %c1_i32_330 : i32
      %792 = arith.index_cast %791 : i32 to index
      %c0_343 = arith.constant 0 : index
      %c0_344 = arith.constant 0 : index
      %793 = vector.load %arg16[%792, %c0_343, %c0_344] : memref<8x8x128xf32, #tpu.memory_space<vmem>>, vector<1x8x128xf32>
      %794 = vector.shape_cast %793 : vector<1x8x128xf32> to vector<8x128xf32>
      %795 = vector.shape_cast %790 : vector<8x128xf32> to vector<1x8x128xf32>
      tpu.vector_store %arg16[%792, %c0_343, %c0_344], %795 {strides = array<i32>} : memref<8x8x128xf32, #tpu.memory_space<vmem>>, vector<1x8x128xf32>,
      %c2_i32_345 = arith.constant 2 : i32
      %c0_346 = arith.constant 0 : index
      %c0_347 = arith.constant 0 : index
      %796 = vector.load %arg3[%c0_346, %c0_347] : memref<128x384xf32, #tpu.memory_space<vmem>>, vector<128x384xf32>
      %cst_348 = arith.constant dense<0.000000e+00> : vector<8x384xf32>
      %797 = tpu.matmul %790, %796, %cst_348 {dimension_numbers = #tpu.dot_dimension_numbers<[1], [0], [0], [1], [0, 0, 1, 1], [], []>} : vector<8x128xf32>, vector<128x384xf32>, vector<8x384xf32> -> vector<8x384xf32>
      %798 = arith.addi %710, %c2_i32_345 : i32
      %799 = arith.index_cast %798 : i32 to index
      %c0_349 = arith.constant 0 : index
      %c0_350 = arith.constant 0 : index
      %800 = vector.load %arg15[%799, %c0_349, %c0_350] : memref<16x8x384xf32, #tpu.memory_space<vmem>>, vector<1x8x384xf32>
      %801 = vector.shape_cast %800 : vector<1x8x384xf32> to vector<8x384xf32>
      %802 = vector.extract_strided_slice %801 {offsets = [0, 0], sizes = [8, 128], strides = [1, 1]} : vector<8x384xf32> to vector<8x128xf32>
      %803 = vector.extract_strided_slice %797 {offsets = [0, 0], sizes = [8, 128], strides = [1, 1]} : vector<8x384xf32> to vector<8x128xf32>
      %804 = arith.addf %802, %803 : vector<8x128xf32>
      %cst_351 = arith.constant 5.000000e-01 : f32
      %805 = vector.broadcast %cst_351 : f32 to vector<8x128xf32>
      %806 = arith.mulf %805, %804 : vector<8x128xf32>
      %807 = math.tanh %806 : vector<8x128xf32>
      %cst_352 = arith.constant 5.000000e-01 : f32
      %808 = vector.broadcast %cst_352 : f32 to vector<8x128xf32>
      %809 = arith.mulf %808, %807 : vector<8x128xf32>
      %cst_353 = arith.constant 5.000000e-01 : f32
      %810 = vector.broadcast %cst_353 : f32 to vector<8x128xf32>
      %811 = arith.addf %809, %810 : vector<8x128xf32>
      %812 = vector.extract_strided_slice %801 {offsets = [0, 128], sizes = [8, 128], strides = [1, 1]} : vector<8x384xf32> to vector<8x128xf32>
      %813 = vector.extract_strided_slice %797 {offsets = [0, 128], sizes = [8, 128], strides = [1, 1]} : vector<8x384xf32> to vector<8x128xf32>
      %814 = arith.addf %812, %813 : vector<8x128xf32>
      %cst_354 = arith.constant 5.000000e-01 : f32
      %815 = vector.broadcast %cst_354 : f32 to vector<8x128xf32>
      %816 = arith.mulf %815, %814 : vector<8x128xf32>
      %817 = math.tanh %816 : vector<8x128xf32>
      %cst_355 = arith.constant 5.000000e-01 : f32
      %818 = vector.broadcast %cst_355 : f32 to vector<8x128xf32>
      %819 = arith.mulf %818, %817 : vector<8x128xf32>
      %cst_356 = arith.constant 5.000000e-01 : f32
      %820 = vector.broadcast %cst_356 : f32 to vector<8x128xf32>
      %821 = arith.addf %819, %820 : vector<8x128xf32>
      %822 = vector.extract_strided_slice %801 {offsets = [0, 256], sizes = [8, 128], strides = [1, 1]} : vector<8x384xf32> to vector<8x128xf32>
      %823 = vector.extract_strided_slice %797 {offsets = [0, 256], sizes = [8, 128], strides = [1, 1]} : vector<8x384xf32> to vector<8x128xf32>
      %824 = arith.addf %823, %2 : vector<8x128xf32>
      %825 = arith.mulf %811, %824 : vector<8x128xf32>
      %826 = arith.addf %822, %825 : vector<8x128xf32>
      %827 = math.tanh %826 : vector<8x128xf32>
      %cst_357 = arith.constant 1.000000e+00 : f32
      %828 = vector.broadcast %cst_357 : f32 to vector<8x128xf32>
      %829 = arith.subf %828, %821 : vector<8x128xf32>
      %830 = arith.subf %827, %790 : vector<8x128xf32>
      %831 = arith.mulf %829, %830 : vector<8x128xf32>
      %832 = arith.addf %790, %831 : vector<8x128xf32>
      %833 = arith.addi %711, %c2_i32_345 : i32
      %834 = arith.index_cast %833 : i32 to index
      %c0_358 = arith.constant 0 : index
      %c0_359 = arith.constant 0 : index
      %835 = vector.load %arg16[%834, %c0_358, %c0_359] : memref<8x8x128xf32, #tpu.memory_space<vmem>>, vector<1x8x128xf32>
      %836 = vector.shape_cast %835 : vector<1x8x128xf32> to vector<8x128xf32>
      %837 = vector.shape_cast %832 : vector<8x128xf32> to vector<1x8x128xf32>
      tpu.vector_store %arg16[%834, %c0_358, %c0_359], %837 {strides = array<i32>} : memref<8x8x128xf32, #tpu.memory_space<vmem>>, vector<1x8x128xf32>,
      %c3_i32_360 = arith.constant 3 : i32
      %c0_361 = arith.constant 0 : index
      %c0_362 = arith.constant 0 : index
      %838 = vector.load %arg3[%c0_361, %c0_362] : memref<128x384xf32, #tpu.memory_space<vmem>>, vector<128x384xf32>
      %cst_363 = arith.constant dense<0.000000e+00> : vector<8x384xf32>
      %839 = tpu.matmul %832, %838, %cst_363 {dimension_numbers = #tpu.dot_dimension_numbers<[1], [0], [0], [1], [0, 0, 1, 1], [], []>} : vector<8x128xf32>, vector<128x384xf32>, vector<8x384xf32> -> vector<8x384xf32>
      %840 = arith.addi %710, %c3_i32_360 : i32
      %841 = arith.index_cast %840 : i32 to index
      %c0_364 = arith.constant 0 : index
      %c0_365 = arith.constant 0 : index
      %842 = vector.load %arg15[%841, %c0_364, %c0_365] : memref<16x8x384xf32, #tpu.memory_space<vmem>>, vector<1x8x384xf32>
      %843 = vector.shape_cast %842 : vector<1x8x384xf32> to vector<8x384xf32>
      %844 = vector.extract_strided_slice %843 {offsets = [0, 0], sizes = [8, 128], strides = [1, 1]} : vector<8x384xf32> to vector<8x128xf32>
      %845 = vector.extract_strided_slice %839 {offsets = [0, 0], sizes = [8, 128], strides = [1, 1]} : vector<8x384xf32> to vector<8x128xf32>
      %846 = arith.addf %844, %845 : vector<8x128xf32>
      %cst_366 = arith.constant 5.000000e-01 : f32
      %847 = vector.broadcast %cst_366 : f32 to vector<8x128xf32>
      %848 = arith.mulf %847, %846 : vector<8x128xf32>
      %849 = math.tanh %848 : vector<8x128xf32>
      %cst_367 = arith.constant 5.000000e-01 : f32
      %850 = vector.broadcast %cst_367 : f32 to vector<8x128xf32>
      %851 = arith.mulf %850, %849 : vector<8x128xf32>
      %cst_368 = arith.constant 5.000000e-01 : f32
      %852 = vector.broadcast %cst_368 : f32 to vector<8x128xf32>
      %853 = arith.addf %851, %852 : vector<8x128xf32>
      %854 = vector.extract_strided_slice %843 {offsets = [0, 128], sizes = [8, 128], strides = [1, 1]} : vector<8x384xf32> to vector<8x128xf32>
      %855 = vector.extract_strided_slice %839 {offsets = [0, 128], sizes = [8, 128], strides = [1, 1]} : vector<8x384xf32> to vector<8x128xf32>
      %856 = arith.addf %854, %855 : vector<8x128xf32>
      %cst_369 = arith.constant 5.000000e-01 : f32
      %857 = vector.broadcast %cst_369 : f32 to vector<8x128xf32>
      %858 = arith.mulf %857, %856 : vector<8x128xf32>
      %859 = math.tanh %858 : vector<8x128xf32>
      %cst_370 = arith.constant 5.000000e-01 : f32
      %860 = vector.broadcast %cst_370 : f32 to vector<8x128xf32>
      %861 = arith.mulf %860, %859 : vector<8x128xf32>
      %cst_371 = arith.constant 5.000000e-01 : f32
      %862 = vector.broadcast %cst_371 : f32 to vector<8x128xf32>
      %863 = arith.addf %861, %862 : vector<8x128xf32>
      %864 = vector.extract_strided_slice %843 {offsets = [0, 256], sizes = [8, 128], strides = [1, 1]} : vector<8x384xf32> to vector<8x128xf32>
      %865 = vector.extract_strided_slice %839 {offsets = [0, 256], sizes = [8, 128], strides = [1, 1]} : vector<8x384xf32> to vector<8x128xf32>
      %866 = arith.addf %865, %2 : vector<8x128xf32>
      %867 = arith.mulf %853, %866 : vector<8x128xf32>
      %868 = arith.addf %864, %867 : vector<8x128xf32>
      %869 = math.tanh %868 : vector<8x128xf32>
      %cst_372 = arith.constant 1.000000e+00 : f32
      %870 = vector.broadcast %cst_372 : f32 to vector<8x128xf32>
      %871 = arith.subf %870, %863 : vector<8x128xf32>
      %872 = arith.subf %869, %832 : vector<8x128xf32>
      %873 = arith.mulf %871, %872 : vector<8x128xf32>
      %874 = arith.addf %832, %873 : vector<8x128xf32>
      %875 = arith.addi %711, %c3_i32_360 : i32
      %876 = arith.index_cast %875 : i32 to index
      %c0_373 = arith.constant 0 : index
      %c0_374 = arith.constant 0 : index
      %877 = vector.load %arg16[%876, %c0_373, %c0_374] : memref<8x8x128xf32, #tpu.memory_space<vmem>>, vector<1x8x128xf32>
      %878 = vector.shape_cast %877 : vector<1x8x128xf32> to vector<8x128xf32>
      %879 = vector.shape_cast %874 : vector<8x128xf32> to vector<1x8x128xf32>
      tpu.vector_store %arg16[%876, %c0_373, %c0_374], %879 {strides = array<i32>} : memref<8x8x128xf32, #tpu.memory_space<vmem>>, vector<1x8x128xf32>,
      %c4_i32_375 = arith.constant 4 : i32
      %c0_376 = arith.constant 0 : index
      %c0_377 = arith.constant 0 : index
      %880 = vector.load %arg3[%c0_376, %c0_377] : memref<128x384xf32, #tpu.memory_space<vmem>>, vector<128x384xf32>
      %cst_378 = arith.constant dense<0.000000e+00> : vector<8x384xf32>
      %881 = tpu.matmul %874, %880, %cst_378 {dimension_numbers = #tpu.dot_dimension_numbers<[1], [0], [0], [1], [0, 0, 1, 1], [], []>} : vector<8x128xf32>, vector<128x384xf32>, vector<8x384xf32> -> vector<8x384xf32>
      %882 = arith.addi %710, %c4_i32_375 : i32
      %883 = arith.index_cast %882 : i32 to index
      %c0_379 = arith.constant 0 : index
      %c0_380 = arith.constant 0 : index
      %884 = vector.load %arg15[%883, %c0_379, %c0_380] : memref<16x8x384xf32, #tpu.memory_space<vmem>>, vector<1x8x384xf32>
      %885 = vector.shape_cast %884 : vector<1x8x384xf32> to vector<8x384xf32>
      %886 = vector.extract_strided_slice %885 {offsets = [0, 0], sizes = [8, 128], strides = [1, 1]} : vector<8x384xf32> to vector<8x128xf32>
      %887 = vector.extract_strided_slice %881 {offsets = [0, 0], sizes = [8, 128], strides = [1, 1]} : vector<8x384xf32> to vector<8x128xf32>
      %888 = arith.addf %886, %887 : vector<8x128xf32>
      %cst_381 = arith.constant 5.000000e-01 : f32
      %889 = vector.broadcast %cst_381 : f32 to vector<8x128xf32>
      %890 = arith.mulf %889, %888 : vector<8x128xf32>
      %891 = math.tanh %890 : vector<8x128xf32>
      %cst_382 = arith.constant 5.000000e-01 : f32
      %892 = vector.broadcast %cst_382 : f32 to vector<8x128xf32>
      %893 = arith.mulf %892, %891 : vector<8x128xf32>
      %cst_383 = arith.constant 5.000000e-01 : f32
      %894 = vector.broadcast %cst_383 : f32 to vector<8x128xf32>
      %895 = arith.addf %893, %894 : vector<8x128xf32>
      %896 = vector.extract_strided_slice %885 {offsets = [0, 128], sizes = [8, 128], strides = [1, 1]} : vector<8x384xf32> to vector<8x128xf32>
      %897 = vector.extract_strided_slice %881 {offsets = [0, 128], sizes = [8, 128], strides = [1, 1]} : vector<8x384xf32> to vector<8x128xf32>
      %898 = arith.addf %896, %897 : vector<8x128xf32>
      %cst_384 = arith.constant 5.000000e-01 : f32
      %899 = vector.broadcast %cst_384 : f32 to vector<8x128xf32>
      %900 = arith.mulf %899, %898 : vector<8x128xf32>
      %901 = math.tanh %900 : vector<8x128xf32>
      %cst_385 = arith.constant 5.000000e-01 : f32
      %902 = vector.broadcast %cst_385 : f32 to vector<8x128xf32>
      %903 = arith.mulf %902, %901 : vector<8x128xf32>
      %cst_386 = arith.constant 5.000000e-01 : f32
      %904 = vector.broadcast %cst_386 : f32 to vector<8x128xf32>
      %905 = arith.addf %903, %904 : vector<8x128xf32>
      %906 = vector.extract_strided_slice %885 {offsets = [0, 256], sizes = [8, 128], strides = [1, 1]} : vector<8x384xf32> to vector<8x128xf32>
      %907 = vector.extract_strided_slice %881 {offsets = [0, 256], sizes = [8, 128], strides = [1, 1]} : vector<8x384xf32> to vector<8x128xf32>
      %908 = arith.addf %907, %2 : vector<8x128xf32>
      %909 = arith.mulf %895, %908 : vector<8x128xf32>
      %910 = arith.addf %906, %909 : vector<8x128xf32>
      %911 = math.tanh %910 : vector<8x128xf32>
      %cst_387 = arith.constant 1.000000e+00 : f32
      %912 = vector.broadcast %cst_387 : f32 to vector<8x128xf32>
      %913 = arith.subf %912, %905 : vector<8x128xf32>
      %914 = arith.subf %911, %874 : vector<8x128xf32>
      %915 = arith.mulf %913, %914 : vector<8x128xf32>
      %916 = arith.addf %874, %915 : vector<8x128xf32>
      %917 = arith.addi %711, %c4_i32_375 : i32
      %918 = arith.index_cast %917 : i32 to index
      %c0_388 = arith.constant 0 : index
      %c0_389 = arith.constant 0 : index
      %919 = vector.load %arg16[%918, %c0_388, %c0_389] : memref<8x8x128xf32, #tpu.memory_space<vmem>>, vector<1x8x128xf32>
      %920 = vector.shape_cast %919 : vector<1x8x128xf32> to vector<8x128xf32>
      %921 = vector.shape_cast %916 : vector<8x128xf32> to vector<1x8x128xf32>
      tpu.vector_store %arg16[%918, %c0_388, %c0_389], %921 {strides = array<i32>} : memref<8x8x128xf32, #tpu.memory_space<vmem>>, vector<1x8x128xf32>,
      %c5_i32_390 = arith.constant 5 : i32
      %c0_391 = arith.constant 0 : index
      %c0_392 = arith.constant 0 : index
      %922 = vector.load %arg3[%c0_391, %c0_392] : memref<128x384xf32, #tpu.memory_space<vmem>>, vector<128x384xf32>
      %cst_393 = arith.constant dense<0.000000e+00> : vector<8x384xf32>
      %923 = tpu.matmul %916, %922, %cst_393 {dimension_numbers = #tpu.dot_dimension_numbers<[1], [0], [0], [1], [0, 0, 1, 1], [], []>} : vector<8x128xf32>, vector<128x384xf32>, vector<8x384xf32> -> vector<8x384xf32>
      %924 = arith.addi %710, %c5_i32_390 : i32
      %925 = arith.index_cast %924 : i32 to index
      %c0_394 = arith.constant 0 : index
      %c0_395 = arith.constant 0 : index
      %926 = vector.load %arg15[%925, %c0_394, %c0_395] : memref<16x8x384xf32, #tpu.memory_space<vmem>>, vector<1x8x384xf32>
      %927 = vector.shape_cast %926 : vector<1x8x384xf32> to vector<8x384xf32>
      %928 = vector.extract_strided_slice %927 {offsets = [0, 0], sizes = [8, 128], strides = [1, 1]} : vector<8x384xf32> to vector<8x128xf32>
      %929 = vector.extract_strided_slice %923 {offsets = [0, 0], sizes = [8, 128], strides = [1, 1]} : vector<8x384xf32> to vector<8x128xf32>
      %930 = arith.addf %928, %929 : vector<8x128xf32>
      %cst_396 = arith.constant 5.000000e-01 : f32
      %931 = vector.broadcast %cst_396 : f32 to vector<8x128xf32>
      %932 = arith.mulf %931, %930 : vector<8x128xf32>
      %933 = math.tanh %932 : vector<8x128xf32>
      %cst_397 = arith.constant 5.000000e-01 : f32
      %934 = vector.broadcast %cst_397 : f32 to vector<8x128xf32>
      %935 = arith.mulf %934, %933 : vector<8x128xf32>
      %cst_398 = arith.constant 5.000000e-01 : f32
      %936 = vector.broadcast %cst_398 : f32 to vector<8x128xf32>
      %937 = arith.addf %935, %936 : vector<8x128xf32>
      %938 = vector.extract_strided_slice %927 {offsets = [0, 128], sizes = [8, 128], strides = [1, 1]} : vector<8x384xf32> to vector<8x128xf32>
      %939 = vector.extract_strided_slice %923 {offsets = [0, 128], sizes = [8, 128], strides = [1, 1]} : vector<8x384xf32> to vector<8x128xf32>
      %940 = arith.addf %938, %939 : vector<8x128xf32>
      %cst_399 = arith.constant 5.000000e-01 : f32
      %941 = vector.broadcast %cst_399 : f32 to vector<8x128xf32>
      %942 = arith.mulf %941, %940 : vector<8x128xf32>
      %943 = math.tanh %942 : vector<8x128xf32>
      %cst_400 = arith.constant 5.000000e-01 : f32
      %944 = vector.broadcast %cst_400 : f32 to vector<8x128xf32>
      %945 = arith.mulf %944, %943 : vector<8x128xf32>
      %cst_401 = arith.constant 5.000000e-01 : f32
      %946 = vector.broadcast %cst_401 : f32 to vector<8x128xf32>
      %947 = arith.addf %945, %946 : vector<8x128xf32>
      %948 = vector.extract_strided_slice %927 {offsets = [0, 256], sizes = [8, 128], strides = [1, 1]} : vector<8x384xf32> to vector<8x128xf32>
      %949 = vector.extract_strided_slice %923 {offsets = [0, 256], sizes = [8, 128], strides = [1, 1]} : vector<8x384xf32> to vector<8x128xf32>
      %950 = arith.addf %949, %2 : vector<8x128xf32>
      %951 = arith.mulf %937, %950 : vector<8x128xf32>
      %952 = arith.addf %948, %951 : vector<8x128xf32>
      %953 = math.tanh %952 : vector<8x128xf32>
      %cst_402 = arith.constant 1.000000e+00 : f32
      %954 = vector.broadcast %cst_402 : f32 to vector<8x128xf32>
      %955 = arith.subf %954, %947 : vector<8x128xf32>
      %956 = arith.subf %953, %916 : vector<8x128xf32>
      %957 = arith.mulf %955, %956 : vector<8x128xf32>
      %958 = arith.addf %916, %957 : vector<8x128xf32>
      %959 = arith.addi %711, %c5_i32_390 : i32
      %960 = arith.index_cast %959 : i32 to index
      %c0_403 = arith.constant 0 : index
      %c0_404 = arith.constant 0 : index
      %961 = vector.load %arg16[%960, %c0_403, %c0_404] : memref<8x8x128xf32, #tpu.memory_space<vmem>>, vector<1x8x128xf32>
      %962 = vector.shape_cast %961 : vector<1x8x128xf32> to vector<8x128xf32>
      %963 = vector.shape_cast %958 : vector<8x128xf32> to vector<1x8x128xf32>
      tpu.vector_store %arg16[%960, %c0_403, %c0_404], %963 {strides = array<i32>} : memref<8x8x128xf32, #tpu.memory_space<vmem>>, vector<1x8x128xf32>,
      %c6_i32_405 = arith.constant 6 : i32
      %c0_406 = arith.constant 0 : index
      %c0_407 = arith.constant 0 : index
      %964 = vector.load %arg3[%c0_406, %c0_407] : memref<128x384xf32, #tpu.memory_space<vmem>>, vector<128x384xf32>
      %cst_408 = arith.constant dense<0.000000e+00> : vector<8x384xf32>
      %965 = tpu.matmul %958, %964, %cst_408 {dimension_numbers = #tpu.dot_dimension_numbers<[1], [0], [0], [1], [0, 0, 1, 1], [], []>} : vector<8x128xf32>, vector<128x384xf32>, vector<8x384xf32> -> vector<8x384xf32>
      %966 = arith.addi %710, %c6_i32_405 : i32
      %967 = arith.index_cast %966 : i32 to index
      %c0_409 = arith.constant 0 : index
      %c0_410 = arith.constant 0 : index
      %968 = vector.load %arg15[%967, %c0_409, %c0_410] : memref<16x8x384xf32, #tpu.memory_space<vmem>>, vector<1x8x384xf32>
      %969 = vector.shape_cast %968 : vector<1x8x384xf32> to vector<8x384xf32>
      %970 = vector.extract_strided_slice %969 {offsets = [0, 0], sizes = [8, 128], strides = [1, 1]} : vector<8x384xf32> to vector<8x128xf32>
      %971 = vector.extract_strided_slice %965 {offsets = [0, 0], sizes = [8, 128], strides = [1, 1]} : vector<8x384xf32> to vector<8x128xf32>
      %972 = arith.addf %970, %971 : vector<8x128xf32>
      %cst_411 = arith.constant 5.000000e-01 : f32
      %973 = vector.broadcast %cst_411 : f32 to vector<8x128xf32>
      %974 = arith.mulf %973, %972 : vector<8x128xf32>
      %975 = math.tanh %974 : vector<8x128xf32>
      %cst_412 = arith.constant 5.000000e-01 : f32
      %976 = vector.broadcast %cst_412 : f32 to vector<8x128xf32>
      %977 = arith.mulf %976, %975 : vector<8x128xf32>
      %cst_413 = arith.constant 5.000000e-01 : f32
      %978 = vector.broadcast %cst_413 : f32 to vector<8x128xf32>
      %979 = arith.addf %977, %978 : vector<8x128xf32>
      %980 = vector.extract_strided_slice %969 {offsets = [0, 128], sizes = [8, 128], strides = [1, 1]} : vector<8x384xf32> to vector<8x128xf32>
      %981 = vector.extract_strided_slice %965 {offsets = [0, 128], sizes = [8, 128], strides = [1, 1]} : vector<8x384xf32> to vector<8x128xf32>
      %982 = arith.addf %980, %981 : vector<8x128xf32>
      %cst_414 = arith.constant 5.000000e-01 : f32
      %983 = vector.broadcast %cst_414 : f32 to vector<8x128xf32>
      %984 = arith.mulf %983, %982 : vector<8x128xf32>
      %985 = math.tanh %984 : vector<8x128xf32>
      %cst_415 = arith.constant 5.000000e-01 : f32
      %986 = vector.broadcast %cst_415 : f32 to vector<8x128xf32>
      %987 = arith.mulf %986, %985 : vector<8x128xf32>
      %cst_416 = arith.constant 5.000000e-01 : f32
      %988 = vector.broadcast %cst_416 : f32 to vector<8x128xf32>
      %989 = arith.addf %987, %988 : vector<8x128xf32>
      %990 = vector.extract_strided_slice %969 {offsets = [0, 256], sizes = [8, 128], strides = [1, 1]} : vector<8x384xf32> to vector<8x128xf32>
      %991 = vector.extract_strided_slice %965 {offsets = [0, 256], sizes = [8, 128], strides = [1, 1]} : vector<8x384xf32> to vector<8x128xf32>
      %992 = arith.addf %991, %2 : vector<8x128xf32>
      %993 = arith.mulf %979, %992 : vector<8x128xf32>
      %994 = arith.addf %990, %993 : vector<8x128xf32>
      %995 = math.tanh %994 : vector<8x128xf32>
      %cst_417 = arith.constant 1.000000e+00 : f32
      %996 = vector.broadcast %cst_417 : f32 to vector<8x128xf32>
      %997 = arith.subf %996, %989 : vector<8x128xf32>
      %998 = arith.subf %995, %958 : vector<8x128xf32>
      %999 = arith.mulf %997, %998 : vector<8x128xf32>
      %1000 = arith.addf %958, %999 : vector<8x128xf32>
      %1001 = arith.addi %711, %c6_i32_405 : i32
      %1002 = arith.index_cast %1001 : i32 to index
      %c0_418 = arith.constant 0 : index
      %c0_419 = arith.constant 0 : index
      %1003 = vector.load %arg16[%1002, %c0_418, %c0_419] : memref<8x8x128xf32, #tpu.memory_space<vmem>>, vector<1x8x128xf32>
      %1004 = vector.shape_cast %1003 : vector<1x8x128xf32> to vector<8x128xf32>
      %1005 = vector.shape_cast %1000 : vector<8x128xf32> to vector<1x8x128xf32>
      tpu.vector_store %arg16[%1002, %c0_418, %c0_419], %1005 {strides = array<i32>} : memref<8x8x128xf32, #tpu.memory_space<vmem>>, vector<1x8x128xf32>,
      %c7_i32_420 = arith.constant 7 : i32
      %c0_421 = arith.constant 0 : index
      %c0_422 = arith.constant 0 : index
      %1006 = vector.load %arg3[%c0_421, %c0_422] : memref<128x384xf32, #tpu.memory_space<vmem>>, vector<128x384xf32>
      %cst_423 = arith.constant dense<0.000000e+00> : vector<8x384xf32>
      %1007 = tpu.matmul %1000, %1006, %cst_423 {dimension_numbers = #tpu.dot_dimension_numbers<[1], [0], [0], [1], [0, 0, 1, 1], [], []>} : vector<8x128xf32>, vector<128x384xf32>, vector<8x384xf32> -> vector<8x384xf32>
      %1008 = arith.addi %710, %c7_i32_420 : i32
      %1009 = arith.index_cast %1008 : i32 to index
      %c0_424 = arith.constant 0 : index
      %c0_425 = arith.constant 0 : index
      %1010 = vector.load %arg15[%1009, %c0_424, %c0_425] : memref<16x8x384xf32, #tpu.memory_space<vmem>>, vector<1x8x384xf32>
      %1011 = vector.shape_cast %1010 : vector<1x8x384xf32> to vector<8x384xf32>
      %1012 = vector.extract_strided_slice %1011 {offsets = [0, 0], sizes = [8, 128], strides = [1, 1]} : vector<8x384xf32> to vector<8x128xf32>
      %1013 = vector.extract_strided_slice %1007 {offsets = [0, 0], sizes = [8, 128], strides = [1, 1]} : vector<8x384xf32> to vector<8x128xf32>
      %1014 = arith.addf %1012, %1013 : vector<8x128xf32>
      %cst_426 = arith.constant 5.000000e-01 : f32
      %1015 = vector.broadcast %cst_426 : f32 to vector<8x128xf32>
      %1016 = arith.mulf %1015, %1014 : vector<8x128xf32>
      %1017 = math.tanh %1016 : vector<8x128xf32>
      %cst_427 = arith.constant 5.000000e-01 : f32
      %1018 = vector.broadcast %cst_427 : f32 to vector<8x128xf32>
      %1019 = arith.mulf %1018, %1017 : vector<8x128xf32>
      %cst_428 = arith.constant 5.000000e-01 : f32
      %1020 = vector.broadcast %cst_428 : f32 to vector<8x128xf32>
      %1021 = arith.addf %1019, %1020 : vector<8x128xf32>
      %1022 = vector.extract_strided_slice %1011 {offsets = [0, 128], sizes = [8, 128], strides = [1, 1]} : vector<8x384xf32> to vector<8x128xf32>
      %1023 = vector.extract_strided_slice %1007 {offsets = [0, 128], sizes = [8, 128], strides = [1, 1]} : vector<8x384xf32> to vector<8x128xf32>
      %1024 = arith.addf %1022, %1023 : vector<8x128xf32>
      %cst_429 = arith.constant 5.000000e-01 : f32
      %1025 = vector.broadcast %cst_429 : f32 to vector<8x128xf32>
      %1026 = arith.mulf %1025, %1024 : vector<8x128xf32>
      %1027 = math.tanh %1026 : vector<8x128xf32>
      %cst_430 = arith.constant 5.000000e-01 : f32
      %1028 = vector.broadcast %cst_430 : f32 to vector<8x128xf32>
      %1029 = arith.mulf %1028, %1027 : vector<8x128xf32>
      %cst_431 = arith.constant 5.000000e-01 : f32
      %1030 = vector.broadcast %cst_431 : f32 to vector<8x128xf32>
      %1031 = arith.addf %1029, %1030 : vector<8x128xf32>
      %1032 = vector.extract_strided_slice %1011 {offsets = [0, 256], sizes = [8, 128], strides = [1, 1]} : vector<8x384xf32> to vector<8x128xf32>
      %1033 = vector.extract_strided_slice %1007 {offsets = [0, 256], sizes = [8, 128], strides = [1, 1]} : vector<8x384xf32> to vector<8x128xf32>
      %1034 = arith.addf %1033, %2 : vector<8x128xf32>
      %1035 = arith.mulf %1021, %1034 : vector<8x128xf32>
      %1036 = arith.addf %1032, %1035 : vector<8x128xf32>
      %1037 = math.tanh %1036 : vector<8x128xf32>
      %cst_432 = arith.constant 1.000000e+00 : f32
      %1038 = vector.broadcast %cst_432 : f32 to vector<8x128xf32>
      %1039 = arith.subf %1038, %1031 : vector<8x128xf32>
      %1040 = arith.subf %1037, %1000 : vector<8x128xf32>
      %1041 = arith.mulf %1039, %1040 : vector<8x128xf32>
      %1042 = arith.addf %1000, %1041 : vector<8x128xf32>
      %1043 = arith.addi %711, %c7_i32_420 : i32
      %1044 = arith.index_cast %1043 : i32 to index
      %c0_433 = arith.constant 0 : index
      %c0_434 = arith.constant 0 : index
      %1045 = vector.load %arg16[%1044, %c0_433, %c0_434] : memref<8x8x128xf32, #tpu.memory_space<vmem>>, vector<1x8x128xf32>
      %1046 = vector.shape_cast %1045 : vector<1x8x128xf32> to vector<8x128xf32>
      %1047 = vector.shape_cast %1042 : vector<8x128xf32> to vector<1x8x128xf32>
      tpu.vector_store %arg16[%1044, %c0_433, %c0_434], %1047 {strides = array<i32>} : memref<8x8x128xf32, #tpu.memory_space<vmem>>, vector<1x8x128xf32>,
      %c8_i32_435 = arith.constant 8 : i32
      scf.yield %1042 : vector<8x128xf32>
    }
    %c0_i32_13 = arith.constant 0 : i32
    %c0_i32_14 = arith.constant 0 : i32
    %c0_15 = arith.constant 0 : index
    %c0_16 = arith.constant 0 : index
    %15 = vector.load %arg3[%c0_15, %c0_16] : memref<128x384xf32, #tpu.memory_space<vmem>>, vector<128x384xf32>
    %cst_17 = arith.constant dense<0.000000e+00> : vector<8x384xf32>
    %16 = tpu.matmul %14, %15, %cst_17 {dimension_numbers = #tpu.dot_dimension_numbers<[1], [0], [0], [1], [0, 0, 1, 1], [], []>} : vector<8x128xf32>, vector<128x384xf32>, vector<8x384xf32> -> vector<8x384xf32>
    %c0_i32_18 = arith.constant 0 : i32
    %17 = arith.addi %c0_i32_18, %c0_i32_14 : i32
    %18 = arith.index_cast %17 : i32 to index
    %c0_19 = arith.constant 0 : index
    %c0_20 = arith.constant 0 : index
    %19 = vector.load %arg15[%18, %c0_19, %c0_20] : memref<16x8x384xf32, #tpu.memory_space<vmem>>, vector<1x8x384xf32>
    %20 = vector.shape_cast %19 : vector<1x8x384xf32> to vector<8x384xf32>
    %21 = vector.extract_strided_slice %20 {offsets = [0, 0], sizes = [8, 128], strides = [1, 1]} : vector<8x384xf32> to vector<8x128xf32>
    %22 = vector.extract_strided_slice %16 {offsets = [0, 0], sizes = [8, 128], strides = [1, 1]} : vector<8x384xf32> to vector<8x128xf32>
    %23 = arith.addf %21, %22 : vector<8x128xf32>
    %cst_21 = arith.constant 5.000000e-01 : f32
    %24 = vector.broadcast %cst_21 : f32 to vector<8x128xf32>
    %25 = arith.mulf %24, %23 : vector<8x128xf32>
    %26 = math.tanh %25 : vector<8x128xf32>
    %cst_22 = arith.constant 5.000000e-01 : f32
    %27 = vector.broadcast %cst_22 : f32 to vector<8x128xf32>
    %28 = arith.mulf %27, %26 : vector<8x128xf32>
    %cst_23 = arith.constant 5.000000e-01 : f32
    %29 = vector.broadcast %cst_23 : f32 to vector<8x128xf32>
    %30 = arith.addf %28, %29 : vector<8x128xf32>
    %31 = vector.extract_strided_slice %20 {offsets = [0, 128], sizes = [8, 128], strides = [1, 1]} : vector<8x384xf32> to vector<8x128xf32>
    %32 = vector.extract_strided_slice %16 {offsets = [0, 128], sizes = [8, 128], strides = [1, 1]} : vector<8x384xf32> to vector<8x128xf32>
    %33 = arith.addf %31, %32 : vector<8x128xf32>
    %cst_24 = arith.constant 5.000000e-01 : f32
    %34 = vector.broadcast %cst_24 : f32 to vector<8x128xf32>
    %35 = arith.mulf %34, %33 : vector<8x128xf32>
    %36 = math.tanh %35 : vector<8x128xf32>
    %cst_25 = arith.constant 5.000000e-01 : f32
    %37 = vector.broadcast %cst_25 : f32 to vector<8x128xf32>
    %38 = arith.mulf %37, %36 : vector<8x128xf32>
    %cst_26 = arith.constant 5.000000e-01 : f32
    %39 = vector.broadcast %cst_26 : f32 to vector<8x128xf32>
    %40 = arith.addf %38, %39 : vector<8x128xf32>
    %41 = vector.extract_strided_slice %20 {offsets = [0, 256], sizes = [8, 128], strides = [1, 1]} : vector<8x384xf32> to vector<8x128xf32>
    %42 = vector.extract_strided_slice %16 {offsets = [0, 256], sizes = [8, 128], strides = [1, 1]} : vector<8x384xf32> to vector<8x128xf32>
    %43 = arith.addf %42, %2 : vector<8x128xf32>
    %44 = arith.mulf %30, %43 : vector<8x128xf32>
    %45 = arith.addf %41, %44 : vector<8x128xf32>
    %46 = math.tanh %45 : vector<8x128xf32>
    %cst_27 = arith.constant 1.000000e+00 : f32
    %47 = vector.broadcast %cst_27 : f32 to vector<8x128xf32>
    %48 = arith.subf %47, %40 : vector<8x128xf32>
    %49 = arith.subf %46, %14 : vector<8x128xf32>
    %50 = arith.mulf %48, %49 : vector<8x128xf32>
    %51 = arith.addf %14, %50 : vector<8x128xf32>
    %c0_i32_28 = arith.constant 0 : i32
    %52 = arith.addi %c0_i32_28, %c0_i32_14 : i32
    %53 = arith.index_cast %52 : i32 to index
    %c0_29 = arith.constant 0 : index
    %c0_30 = arith.constant 0 : index
    %54 = vector.load %arg16[%53, %c0_29, %c0_30] : memref<8x8x128xf32, #tpu.memory_space<vmem>>, vector<1x8x128xf32>
    %55 = vector.shape_cast %54 : vector<1x8x128xf32> to vector<8x128xf32>
    %56 = vector.shape_cast %51 : vector<8x128xf32> to vector<1x8x128xf32>
    tpu.vector_store %arg16[%53, %c0_29, %c0_30], %56 {strides = array<i32>} : memref<8x8x128xf32, #tpu.memory_space<vmem>>, vector<1x8x128xf32>,
    %c1_i32_31 = arith.constant 1 : i32
    %c0_32 = arith.constant 0 : index
    %c0_33 = arith.constant 0 : index
    %57 = vector.load %arg3[%c0_32, %c0_33] : memref<128x384xf32, #tpu.memory_space<vmem>>, vector<128x384xf32>
    %cst_34 = arith.constant dense<0.000000e+00> : vector<8x384xf32>
    %58 = tpu.matmul %51, %57, %cst_34 {dimension_numbers = #tpu.dot_dimension_numbers<[1], [0], [0], [1], [0, 0, 1, 1], [], []>} : vector<8x128xf32>, vector<128x384xf32>, vector<8x384xf32> -> vector<8x384xf32>
    %c0_i32_35 = arith.constant 0 : i32
    %59 = arith.addi %c0_i32_35, %c1_i32_31 : i32
    %60 = arith.index_cast %59 : i32 to index
    %c0_36 = arith.constant 0 : index
    %c0_37 = arith.constant 0 : index
    %61 = vector.load %arg15[%60, %c0_36, %c0_37] : memref<16x8x384xf32, #tpu.memory_space<vmem>>, vector<1x8x384xf32>
    %62 = vector.shape_cast %61 : vector<1x8x384xf32> to vector<8x384xf32>
    %63 = vector.extract_strided_slice %62 {offsets = [0, 0], sizes = [8, 128], strides = [1, 1]} : vector<8x384xf32> to vector<8x128xf32>
    %64 = vector.extract_strided_slice %58 {offsets = [0, 0], sizes = [8, 128], strides = [1, 1]} : vector<8x384xf32> to vector<8x128xf32>
    %65 = arith.addf %63, %64 : vector<8x128xf32>
    %cst_38 = arith.constant 5.000000e-01 : f32
    %66 = vector.broadcast %cst_38 : f32 to vector<8x128xf32>
    %67 = arith.mulf %66, %65 : vector<8x128xf32>
    %68 = math.tanh %67 : vector<8x128xf32>
    %cst_39 = arith.constant 5.000000e-01 : f32
    %69 = vector.broadcast %cst_39 : f32 to vector<8x128xf32>
    %70 = arith.mulf %69, %68 : vector<8x128xf32>
    %cst_40 = arith.constant 5.000000e-01 : f32
    %71 = vector.broadcast %cst_40 : f32 to vector<8x128xf32>
    %72 = arith.addf %70, %71 : vector<8x128xf32>
    %73 = vector.extract_strided_slice %62 {offsets = [0, 128], sizes = [8, 128], strides = [1, 1]} : vector<8x384xf32> to vector<8x128xf32>
    %74 = vector.extract_strided_slice %58 {offsets = [0, 128], sizes = [8, 128], strides = [1, 1]} : vector<8x384xf32> to vector<8x128xf32>
    %75 = arith.addf %73, %74 : vector<8x128xf32>
    %cst_41 = arith.constant 5.000000e-01 : f32
    %76 = vector.broadcast %cst_41 : f32 to vector<8x128xf32>
    %77 = arith.mulf %76, %75 : vector<8x128xf32>
    %78 = math.tanh %77 : vector<8x128xf32>
    %cst_42 = arith.constant 5.000000e-01 : f32
    %79 = vector.broadcast %cst_42 : f32 to vector<8x128xf32>
    %80 = arith.mulf %79, %78 : vector<8x128xf32>
    %cst_43 = arith.constant 5.000000e-01 : f32
    %81 = vector.broadcast %cst_43 : f32 to vector<8x128xf32>
    %82 = arith.addf %80, %81 : vector<8x128xf32>
    %83 = vector.extract_strided_slice %62 {offsets = [0, 256], sizes = [8, 128], strides = [1, 1]} : vector<8x384xf32> to vector<8x128xf32>
    %84 = vector.extract_strided_slice %58 {offsets = [0, 256], sizes = [8, 128], strides = [1, 1]} : vector<8x384xf32> to vector<8x128xf32>
    %85 = arith.addf %84, %2 : vector<8x128xf32>
    %86 = arith.mulf %72, %85 : vector<8x128xf32>
    %87 = arith.addf %83, %86 : vector<8x128xf32>
    %88 = math.tanh %87 : vector<8x128xf32>
    %cst_44 = arith.constant 1.000000e+00 : f32
    %89 = vector.broadcast %cst_44 : f32 to vector<8x128xf32>
    %90 = arith.subf %89, %82 : vector<8x128xf32>
    %91 = arith.subf %88, %51 : vector<8x128xf32>
    %92 = arith.mulf %90, %91 : vector<8x128xf32>
    %93 = arith.addf %51, %92 : vector<8x128xf32>
    %c0_i32_45 = arith.constant 0 : i32
    %94 = arith.addi %c0_i32_45, %c1_i32_31 : i32
    %95 = arith.index_cast %94 : i32 to index
    %c0_46 = arith.constant 0 : index
    %c0_47 = arith.constant 0 : index
    %96 = vector.load %arg16[%95, %c0_46, %c0_47] : memref<8x8x128xf32, #tpu.memory_space<vmem>>, vector<1x8x128xf32>
    %97 = vector.shape_cast %96 : vector<1x8x128xf32> to vector<8x128xf32>
    %98 = vector.shape_cast %93 : vector<8x128xf32> to vector<1x8x128xf32>
    tpu.vector_store %arg16[%95, %c0_46, %c0_47], %98 {strides = array<i32>} : memref<8x8x128xf32, #tpu.memory_space<vmem>>, vector<1x8x128xf32>,
    %c2_i32 = arith.constant 2 : i32
    %c0_48 = arith.constant 0 : index
    %c0_49 = arith.constant 0 : index
    %99 = vector.load %arg3[%c0_48, %c0_49] : memref<128x384xf32, #tpu.memory_space<vmem>>, vector<128x384xf32>
    %cst_50 = arith.constant dense<0.000000e+00> : vector<8x384xf32>
    %100 = tpu.matmul %93, %99, %cst_50 {dimension_numbers = #tpu.dot_dimension_numbers<[1], [0], [0], [1], [0, 0, 1, 1], [], []>} : vector<8x128xf32>, vector<128x384xf32>, vector<8x384xf32> -> vector<8x384xf32>
    %c0_i32_51 = arith.constant 0 : i32
    %101 = arith.addi %c0_i32_51, %c2_i32 : i32
    %102 = arith.index_cast %101 : i32 to index
    %c0_52 = arith.constant 0 : index
    %c0_53 = arith.constant 0 : index
    %103 = vector.load %arg15[%102, %c0_52, %c0_53] : memref<16x8x384xf32, #tpu.memory_space<vmem>>, vector<1x8x384xf32>
    %104 = vector.shape_cast %103 : vector<1x8x384xf32> to vector<8x384xf32>
    %105 = vector.extract_strided_slice %104 {offsets = [0, 0], sizes = [8, 128], strides = [1, 1]} : vector<8x384xf32> to vector<8x128xf32>
    %106 = vector.extract_strided_slice %100 {offsets = [0, 0], sizes = [8, 128], strides = [1, 1]} : vector<8x384xf32> to vector<8x128xf32>
    %107 = arith.addf %105, %106 : vector<8x128xf32>
    %cst_54 = arith.constant 5.000000e-01 : f32
    %108 = vector.broadcast %cst_54 : f32 to vector<8x128xf32>
    %109 = arith.mulf %108, %107 : vector<8x128xf32>
    %110 = math.tanh %109 : vector<8x128xf32>
    %cst_55 = arith.constant 5.000000e-01 : f32
    %111 = vector.broadcast %cst_55 : f32 to vector<8x128xf32>
    %112 = arith.mulf %111, %110 : vector<8x128xf32>
    %cst_56 = arith.constant 5.000000e-01 : f32
    %113 = vector.broadcast %cst_56 : f32 to vector<8x128xf32>
    %114 = arith.addf %112, %113 : vector<8x128xf32>
    %115 = vector.extract_strided_slice %104 {offsets = [0, 128], sizes = [8, 128], strides = [1, 1]} : vector<8x384xf32> to vector<8x128xf32>
    %116 = vector.extract_strided_slice %100 {offsets = [0, 128], sizes = [8, 128], strides = [1, 1]} : vector<8x384xf32> to vector<8x128xf32>
    %117 = arith.addf %115, %116 : vector<8x128xf32>
    %cst_57 = arith.constant 5.000000e-01 : f32
    %118 = vector.broadcast %cst_57 : f32 to vector<8x128xf32>
    %119 = arith.mulf %118, %117 : vector<8x128xf32>
    %120 = math.tanh %119 : vector<8x128xf32>
    %cst_58 = arith.constant 5.000000e-01 : f32
    %121 = vector.broadcast %cst_58 : f32 to vector<8x128xf32>
    %122 = arith.mulf %121, %120 : vector<8x128xf32>
    %cst_59 = arith.constant 5.000000e-01 : f32
    %123 = vector.broadcast %cst_59 : f32 to vector<8x128xf32>
    %124 = arith.addf %122, %123 : vector<8x128xf32>
    %125 = vector.extract_strided_slice %104 {offsets = [0, 256], sizes = [8, 128], strides = [1, 1]} : vector<8x384xf32> to vector<8x128xf32>
    %126 = vector.extract_strided_slice %100 {offsets = [0, 256], sizes = [8, 128], strides = [1, 1]} : vector<8x384xf32> to vector<8x128xf32>
    %127 = arith.addf %126, %2 : vector<8x128xf32>
    %128 = arith.mulf %114, %127 : vector<8x128xf32>
    %129 = arith.addf %125, %128 : vector<8x128xf32>
    %130 = math.tanh %129 : vector<8x128xf32>
    %cst_60 = arith.constant 1.000000e+00 : f32
    %131 = vector.broadcast %cst_60 : f32 to vector<8x128xf32>
    %132 = arith.subf %131, %124 : vector<8x128xf32>
    %133 = arith.subf %130, %93 : vector<8x128xf32>
    %134 = arith.mulf %132, %133 : vector<8x128xf32>
    %135 = arith.addf %93, %134 : vector<8x128xf32>
    %c0_i32_61 = arith.constant 0 : i32
    %136 = arith.addi %c0_i32_61, %c2_i32 : i32
    %137 = arith.index_cast %136 : i32 to index
    %c0_62 = arith.constant 0 : index
    %c0_63 = arith.constant 0 : index
    %138 = vector.load %arg16[%137, %c0_62, %c0_63] : memref<8x8x128xf32, #tpu.memory_space<vmem>>, vector<1x8x128xf32>
    %139 = vector.shape_cast %138 : vector<1x8x128xf32> to vector<8x128xf32>
    %140 = vector.shape_cast %135 : vector<8x128xf32> to vector<1x8x128xf32>
    tpu.vector_store %arg16[%137, %c0_62, %c0_63], %140 {strides = array<i32>} : memref<8x8x128xf32, #tpu.memory_space<vmem>>, vector<1x8x128xf32>,
    %c3_i32 = arith.constant 3 : i32
    %c0_64 = arith.constant 0 : index
    %c0_65 = arith.constant 0 : index
    %141 = vector.load %arg3[%c0_64, %c0_65] : memref<128x384xf32, #tpu.memory_space<vmem>>, vector<128x384xf32>
    %cst_66 = arith.constant dense<0.000000e+00> : vector<8x384xf32>
    %142 = tpu.matmul %135, %141, %cst_66 {dimension_numbers = #tpu.dot_dimension_numbers<[1], [0], [0], [1], [0, 0, 1, 1], [], []>} : vector<8x128xf32>, vector<128x384xf32>, vector<8x384xf32> -> vector<8x384xf32>
    %c0_i32_67 = arith.constant 0 : i32
    %143 = arith.addi %c0_i32_67, %c3_i32 : i32
    %144 = arith.index_cast %143 : i32 to index
    %c0_68 = arith.constant 0 : index
    %c0_69 = arith.constant 0 : index
    %145 = vector.load %arg15[%144, %c0_68, %c0_69] : memref<16x8x384xf32, #tpu.memory_space<vmem>>, vector<1x8x384xf32>
    %146 = vector.shape_cast %145 : vector<1x8x384xf32> to vector<8x384xf32>
    %147 = vector.extract_strided_slice %146 {offsets = [0, 0], sizes = [8, 128], strides = [1, 1]} : vector<8x384xf32> to vector<8x128xf32>
    %148 = vector.extract_strided_slice %142 {offsets = [0, 0], sizes = [8, 128], strides = [1, 1]} : vector<8x384xf32> to vector<8x128xf32>
    %149 = arith.addf %147, %148 : vector<8x128xf32>
    %cst_70 = arith.constant 5.000000e-01 : f32
    %150 = vector.broadcast %cst_70 : f32 to vector<8x128xf32>
    %151 = arith.mulf %150, %149 : vector<8x128xf32>
    %152 = math.tanh %151 : vector<8x128xf32>
    %cst_71 = arith.constant 5.000000e-01 : f32
    %153 = vector.broadcast %cst_71 : f32 to vector<8x128xf32>
    %154 = arith.mulf %153, %152 : vector<8x128xf32>
    %cst_72 = arith.constant 5.000000e-01 : f32
    %155 = vector.broadcast %cst_72 : f32 to vector<8x128xf32>
    %156 = arith.addf %154, %155 : vector<8x128xf32>
    %157 = vector.extract_strided_slice %146 {offsets = [0, 128], sizes = [8, 128], strides = [1, 1]} : vector<8x384xf32> to vector<8x128xf32>
    %158 = vector.extract_strided_slice %142 {offsets = [0, 128], sizes = [8, 128], strides = [1, 1]} : vector<8x384xf32> to vector<8x128xf32>
    %159 = arith.addf %157, %158 : vector<8x128xf32>
    %cst_73 = arith.constant 5.000000e-01 : f32
    %160 = vector.broadcast %cst_73 : f32 to vector<8x128xf32>
    %161 = arith.mulf %160, %159 : vector<8x128xf32>
    %162 = math.tanh %161 : vector<8x128xf32>
    %cst_74 = arith.constant 5.000000e-01 : f32
    %163 = vector.broadcast %cst_74 : f32 to vector<8x128xf32>
    %164 = arith.mulf %163, %162 : vector<8x128xf32>
    %cst_75 = arith.constant 5.000000e-01 : f32
    %165 = vector.broadcast %cst_75 : f32 to vector<8x128xf32>
    %166 = arith.addf %164, %165 : vector<8x128xf32>
    %167 = vector.extract_strided_slice %146 {offsets = [0, 256], sizes = [8, 128], strides = [1, 1]} : vector<8x384xf32> to vector<8x128xf32>
    %168 = vector.extract_strided_slice %142 {offsets = [0, 256], sizes = [8, 128], strides = [1, 1]} : vector<8x384xf32> to vector<8x128xf32>
    %169 = arith.addf %168, %2 : vector<8x128xf32>
    %170 = arith.mulf %156, %169 : vector<8x128xf32>
    %171 = arith.addf %167, %170 : vector<8x128xf32>
    %172 = math.tanh %171 : vector<8x128xf32>
    %cst_76 = arith.constant 1.000000e+00 : f32
    %173 = vector.broadcast %cst_76 : f32 to vector<8x128xf32>
    %174 = arith.subf %173, %166 : vector<8x128xf32>
    %175 = arith.subf %172, %135 : vector<8x128xf32>
    %176 = arith.mulf %174, %175 : vector<8x128xf32>
    %177 = arith.addf %135, %176 : vector<8x128xf32>
    %c0_i32_77 = arith.constant 0 : i32
    %178 = arith.addi %c0_i32_77, %c3_i32 : i32
    %179 = arith.index_cast %178 : i32 to index
    %c0_78 = arith.constant 0 : index
    %c0_79 = arith.constant 0 : index
    %180 = vector.load %arg16[%179, %c0_78, %c0_79] : memref<8x8x128xf32, #tpu.memory_space<vmem>>, vector<1x8x128xf32>
    %181 = vector.shape_cast %180 : vector<1x8x128xf32> to vector<8x128xf32>
    %182 = vector.shape_cast %177 : vector<8x128xf32> to vector<1x8x128xf32>
    tpu.vector_store %arg16[%179, %c0_78, %c0_79], %182 {strides = array<i32>} : memref<8x8x128xf32, #tpu.memory_space<vmem>>, vector<1x8x128xf32>,
    %c4_i32 = arith.constant 4 : i32
    %c0_80 = arith.constant 0 : index
    %c0_81 = arith.constant 0 : index
    %183 = vector.load %arg3[%c0_80, %c0_81] : memref<128x384xf32, #tpu.memory_space<vmem>>, vector<128x384xf32>
    %cst_82 = arith.constant dense<0.000000e+00> : vector<8x384xf32>
    %184 = tpu.matmul %177, %183, %cst_82 {dimension_numbers = #tpu.dot_dimension_numbers<[1], [0], [0], [1], [0, 0, 1, 1], [], []>} : vector<8x128xf32>, vector<128x384xf32>, vector<8x384xf32> -> vector<8x384xf32>
    %c0_i32_83 = arith.constant 0 : i32
    %185 = arith.addi %c0_i32_83, %c4_i32 : i32
    %186 = arith.index_cast %185 : i32 to index
    %c0_84 = arith.constant 0 : index
    %c0_85 = arith.constant 0 : index
    %187 = vector.load %arg15[%186, %c0_84, %c0_85] : memref<16x8x384xf32, #tpu.memory_space<vmem>>, vector<1x8x384xf32>
    %188 = vector.shape_cast %187 : vector<1x8x384xf32> to vector<8x384xf32>
    %189 = vector.extract_strided_slice %188 {offsets = [0, 0], sizes = [8, 128], strides = [1, 1]} : vector<8x384xf32> to vector<8x128xf32>
    %190 = vector.extract_strided_slice %184 {offsets = [0, 0], sizes = [8, 128], strides = [1, 1]} : vector<8x384xf32> to vector<8x128xf32>
    %191 = arith.addf %189, %190 : vector<8x128xf32>
    %cst_86 = arith.constant 5.000000e-01 : f32
    %192 = vector.broadcast %cst_86 : f32 to vector<8x128xf32>
    %193 = arith.mulf %192, %191 : vector<8x128xf32>
    %194 = math.tanh %193 : vector<8x128xf32>
    %cst_87 = arith.constant 5.000000e-01 : f32
    %195 = vector.broadcast %cst_87 : f32 to vector<8x128xf32>
    %196 = arith.mulf %195, %194 : vector<8x128xf32>
    %cst_88 = arith.constant 5.000000e-01 : f32
    %197 = vector.broadcast %cst_88 : f32 to vector<8x128xf32>
    %198 = arith.addf %196, %197 : vector<8x128xf32>
    %199 = vector.extract_strided_slice %188 {offsets = [0, 128], sizes = [8, 128], strides = [1, 1]} : vector<8x384xf32> to vector<8x128xf32>
    %200 = vector.extract_strided_slice %184 {offsets = [0, 128], sizes = [8, 128], strides = [1, 1]} : vector<8x384xf32> to vector<8x128xf32>
    %201 = arith.addf %199, %200 : vector<8x128xf32>
    %cst_89 = arith.constant 5.000000e-01 : f32
    %202 = vector.broadcast %cst_89 : f32 to vector<8x128xf32>
    %203 = arith.mulf %202, %201 : vector<8x128xf32>
    %204 = math.tanh %203 : vector<8x128xf32>
    %cst_90 = arith.constant 5.000000e-01 : f32
    %205 = vector.broadcast %cst_90 : f32 to vector<8x128xf32>
    %206 = arith.mulf %205, %204 : vector<8x128xf32>
    %cst_91 = arith.constant 5.000000e-01 : f32
    %207 = vector.broadcast %cst_91 : f32 to vector<8x128xf32>
    %208 = arith.addf %206, %207 : vector<8x128xf32>
    %209 = vector.extract_strided_slice %188 {offsets = [0, 256], sizes = [8, 128], strides = [1, 1]} : vector<8x384xf32> to vector<8x128xf32>
    %210 = vector.extract_strided_slice %184 {offsets = [0, 256], sizes = [8, 128], strides = [1, 1]} : vector<8x384xf32> to vector<8x128xf32>
    %211 = arith.addf %210, %2 : vector<8x128xf32>
    %212 = arith.mulf %198, %211 : vector<8x128xf32>
    %213 = arith.addf %209, %212 : vector<8x128xf32>
    %214 = math.tanh %213 : vector<8x128xf32>
    %cst_92 = arith.constant 1.000000e+00 : f32
    %215 = vector.broadcast %cst_92 : f32 to vector<8x128xf32>
    %216 = arith.subf %215, %208 : vector<8x128xf32>
    %217 = arith.subf %214, %177 : vector<8x128xf32>
    %218 = arith.mulf %216, %217 : vector<8x128xf32>
    %219 = arith.addf %177, %218 : vector<8x128xf32>
    %c0_i32_93 = arith.constant 0 : i32
    %220 = arith.addi %c0_i32_93, %c4_i32 : i32
    %221 = arith.index_cast %220 : i32 to index
    %c0_94 = arith.constant 0 : index
    %c0_95 = arith.constant 0 : index
    %222 = vector.load %arg16[%221, %c0_94, %c0_95] : memref<8x8x128xf32, #tpu.memory_space<vmem>>, vector<1x8x128xf32>
    %223 = vector.shape_cast %222 : vector<1x8x128xf32> to vector<8x128xf32>
    %224 = vector.shape_cast %219 : vector<8x128xf32> to vector<1x8x128xf32>
    tpu.vector_store %arg16[%221, %c0_94, %c0_95], %224 {strides = array<i32>} : memref<8x8x128xf32, #tpu.memory_space<vmem>>, vector<1x8x128xf32>,
    %c5_i32 = arith.constant 5 : i32
    %c0_96 = arith.constant 0 : index
    %c0_97 = arith.constant 0 : index
    %225 = vector.load %arg3[%c0_96, %c0_97] : memref<128x384xf32, #tpu.memory_space<vmem>>, vector<128x384xf32>
    %cst_98 = arith.constant dense<0.000000e+00> : vector<8x384xf32>
    %226 = tpu.matmul %219, %225, %cst_98 {dimension_numbers = #tpu.dot_dimension_numbers<[1], [0], [0], [1], [0, 0, 1, 1], [], []>} : vector<8x128xf32>, vector<128x384xf32>, vector<8x384xf32> -> vector<8x384xf32>
    %c0_i32_99 = arith.constant 0 : i32
    %227 = arith.addi %c0_i32_99, %c5_i32 : i32
    %228 = arith.index_cast %227 : i32 to index
    %c0_100 = arith.constant 0 : index
    %c0_101 = arith.constant 0 : index
    %229 = vector.load %arg15[%228, %c0_100, %c0_101] : memref<16x8x384xf32, #tpu.memory_space<vmem>>, vector<1x8x384xf32>
    %230 = vector.shape_cast %229 : vector<1x8x384xf32> to vector<8x384xf32>
    %231 = vector.extract_strided_slice %230 {offsets = [0, 0], sizes = [8, 128], strides = [1, 1]} : vector<8x384xf32> to vector<8x128xf32>
    %232 = vector.extract_strided_slice %226 {offsets = [0, 0], sizes = [8, 128], strides = [1, 1]} : vector<8x384xf32> to vector<8x128xf32>
    %233 = arith.addf %231, %232 : vector<8x128xf32>
    %cst_102 = arith.constant 5.000000e-01 : f32
    %234 = vector.broadcast %cst_102 : f32 to vector<8x128xf32>
    %235 = arith.mulf %234, %233 : vector<8x128xf32>
    %236 = math.tanh %235 : vector<8x128xf32>
    %cst_103 = arith.constant 5.000000e-01 : f32
    %237 = vector.broadcast %cst_103 : f32 to vector<8x128xf32>
    %238 = arith.mulf %237, %236 : vector<8x128xf32>
    %cst_104 = arith.constant 5.000000e-01 : f32
    %239 = vector.broadcast %cst_104 : f32 to vector<8x128xf32>
    %240 = arith.addf %238, %239 : vector<8x128xf32>
    %241 = vector.extract_strided_slice %230 {offsets = [0, 128], sizes = [8, 128], strides = [1, 1]} : vector<8x384xf32> to vector<8x128xf32>
    %242 = vector.extract_strided_slice %226 {offsets = [0, 128], sizes = [8, 128], strides = [1, 1]} : vector<8x384xf32> to vector<8x128xf32>
    %243 = arith.addf %241, %242 : vector<8x128xf32>
    %cst_105 = arith.constant 5.000000e-01 : f32
    %244 = vector.broadcast %cst_105 : f32 to vector<8x128xf32>
    %245 = arith.mulf %244, %243 : vector<8x128xf32>
    %246 = math.tanh %245 : vector<8x128xf32>
    %cst_106 = arith.constant 5.000000e-01 : f32
    %247 = vector.broadcast %cst_106 : f32 to vector<8x128xf32>
    %248 = arith.mulf %247, %246 : vector<8x128xf32>
    %cst_107 = arith.constant 5.000000e-01 : f32
    %249 = vector.broadcast %cst_107 : f32 to vector<8x128xf32>
    %250 = arith.addf %248, %249 : vector<8x128xf32>
    %251 = vector.extract_strided_slice %230 {offsets = [0, 256], sizes = [8, 128], strides = [1, 1]} : vector<8x384xf32> to vector<8x128xf32>
    %252 = vector.extract_strided_slice %226 {offsets = [0, 256], sizes = [8, 128], strides = [1, 1]} : vector<8x384xf32> to vector<8x128xf32>
    %253 = arith.addf %252, %2 : vector<8x128xf32>
    %254 = arith.mulf %240, %253 : vector<8x128xf32>
    %255 = arith.addf %251, %254 : vector<8x128xf32>
    %256 = math.tanh %255 : vector<8x128xf32>
    %cst_108 = arith.constant 1.000000e+00 : f32
    %257 = vector.broadcast %cst_108 : f32 to vector<8x128xf32>
    %258 = arith.subf %257, %250 : vector<8x128xf32>
    %259 = arith.subf %256, %219 : vector<8x128xf32>
    %260 = arith.mulf %258, %259 : vector<8x128xf32>
    %261 = arith.addf %219, %260 : vector<8x128xf32>
    %c0_i32_109 = arith.constant 0 : i32
    %262 = arith.addi %c0_i32_109, %c5_i32 : i32
    %263 = arith.index_cast %262 : i32 to index
    %c0_110 = arith.constant 0 : index
    %c0_111 = arith.constant 0 : index
    %264 = vector.load %arg16[%263, %c0_110, %c0_111] : memref<8x8x128xf32, #tpu.memory_space<vmem>>, vector<1x8x128xf32>
    %265 = vector.shape_cast %264 : vector<1x8x128xf32> to vector<8x128xf32>
    %266 = vector.shape_cast %261 : vector<8x128xf32> to vector<1x8x128xf32>
    tpu.vector_store %arg16[%263, %c0_110, %c0_111], %266 {strides = array<i32>} : memref<8x8x128xf32, #tpu.memory_space<vmem>>, vector<1x8x128xf32>,
    %c6_i32 = arith.constant 6 : i32
    %c0_112 = arith.constant 0 : index
    %c0_113 = arith.constant 0 : index
    %267 = vector.load %arg3[%c0_112, %c0_113] : memref<128x384xf32, #tpu.memory_space<vmem>>, vector<128x384xf32>
    %cst_114 = arith.constant dense<0.000000e+00> : vector<8x384xf32>
    %268 = tpu.matmul %261, %267, %cst_114 {dimension_numbers = #tpu.dot_dimension_numbers<[1], [0], [0], [1], [0, 0, 1, 1], [], []>} : vector<8x128xf32>, vector<128x384xf32>, vector<8x384xf32> -> vector<8x384xf32>
    %c0_i32_115 = arith.constant 0 : i32
    %269 = arith.addi %c0_i32_115, %c6_i32 : i32
    %270 = arith.index_cast %269 : i32 to index
    %c0_116 = arith.constant 0 : index
    %c0_117 = arith.constant 0 : index
    %271 = vector.load %arg15[%270, %c0_116, %c0_117] : memref<16x8x384xf32, #tpu.memory_space<vmem>>, vector<1x8x384xf32>
    %272 = vector.shape_cast %271 : vector<1x8x384xf32> to vector<8x384xf32>
    %273 = vector.extract_strided_slice %272 {offsets = [0, 0], sizes = [8, 128], strides = [1, 1]} : vector<8x384xf32> to vector<8x128xf32>
    %274 = vector.extract_strided_slice %268 {offsets = [0, 0], sizes = [8, 128], strides = [1, 1]} : vector<8x384xf32> to vector<8x128xf32>
    %275 = arith.addf %273, %274 : vector<8x128xf32>
    %cst_118 = arith.constant 5.000000e-01 : f32
    %276 = vector.broadcast %cst_118 : f32 to vector<8x128xf32>
    %277 = arith.mulf %276, %275 : vector<8x128xf32>
    %278 = math.tanh %277 : vector<8x128xf32>
    %cst_119 = arith.constant 5.000000e-01 : f32
    %279 = vector.broadcast %cst_119 : f32 to vector<8x128xf32>
    %280 = arith.mulf %279, %278 : vector<8x128xf32>
    %cst_120 = arith.constant 5.000000e-01 : f32
    %281 = vector.broadcast %cst_120 : f32 to vector<8x128xf32>
    %282 = arith.addf %280, %281 : vector<8x128xf32>
    %283 = vector.extract_strided_slice %272 {offsets = [0, 128], sizes = [8, 128], strides = [1, 1]} : vector<8x384xf32> to vector<8x128xf32>
    %284 = vector.extract_strided_slice %268 {offsets = [0, 128], sizes = [8, 128], strides = [1, 1]} : vector<8x384xf32> to vector<8x128xf32>
    %285 = arith.addf %283, %284 : vector<8x128xf32>
    %cst_121 = arith.constant 5.000000e-01 : f32
    %286 = vector.broadcast %cst_121 : f32 to vector<8x128xf32>
    %287 = arith.mulf %286, %285 : vector<8x128xf32>
    %288 = math.tanh %287 : vector<8x128xf32>
    %cst_122 = arith.constant 5.000000e-01 : f32
    %289 = vector.broadcast %cst_122 : f32 to vector<8x128xf32>
    %290 = arith.mulf %289, %288 : vector<8x128xf32>
    %cst_123 = arith.constant 5.000000e-01 : f32
    %291 = vector.broadcast %cst_123 : f32 to vector<8x128xf32>
    %292 = arith.addf %290, %291 : vector<8x128xf32>
    %293 = vector.extract_strided_slice %272 {offsets = [0, 256], sizes = [8, 128], strides = [1, 1]} : vector<8x384xf32> to vector<8x128xf32>
    %294 = vector.extract_strided_slice %268 {offsets = [0, 256], sizes = [8, 128], strides = [1, 1]} : vector<8x384xf32> to vector<8x128xf32>
    %295 = arith.addf %294, %2 : vector<8x128xf32>
    %296 = arith.mulf %282, %295 : vector<8x128xf32>
    %297 = arith.addf %293, %296 : vector<8x128xf32>
    %298 = math.tanh %297 : vector<8x128xf32>
    %cst_124 = arith.constant 1.000000e+00 : f32
    %299 = vector.broadcast %cst_124 : f32 to vector<8x128xf32>
    %300 = arith.subf %299, %292 : vector<8x128xf32>
    %301 = arith.subf %298, %261 : vector<8x128xf32>
    %302 = arith.mulf %300, %301 : vector<8x128xf32>
    %303 = arith.addf %261, %302 : vector<8x128xf32>
    %c0_i32_125 = arith.constant 0 : i32
    %304 = arith.addi %c0_i32_125, %c6_i32 : i32
    %305 = arith.index_cast %304 : i32 to index
    %c0_126 = arith.constant 0 : index
    %c0_127 = arith.constant 0 : index
    %306 = vector.load %arg16[%305, %c0_126, %c0_127] : memref<8x8x128xf32, #tpu.memory_space<vmem>>, vector<1x8x128xf32>
    %307 = vector.shape_cast %306 : vector<1x8x128xf32> to vector<8x128xf32>
    %308 = vector.shape_cast %303 : vector<8x128xf32> to vector<1x8x128xf32>
    tpu.vector_store %arg16[%305, %c0_126, %c0_127], %308 {strides = array<i32>} : memref<8x8x128xf32, #tpu.memory_space<vmem>>, vector<1x8x128xf32>,
    %c7_i32 = arith.constant 7 : i32
    %c0_128 = arith.constant 0 : index
    %c0_129 = arith.constant 0 : index
    %309 = vector.load %arg3[%c0_128, %c0_129] : memref<128x384xf32, #tpu.memory_space<vmem>>, vector<128x384xf32>
    %cst_130 = arith.constant dense<0.000000e+00> : vector<8x384xf32>
    %310 = tpu.matmul %303, %309, %cst_130 {dimension_numbers = #tpu.dot_dimension_numbers<[1], [0], [0], [1], [0, 0, 1, 1], [], []>} : vector<8x128xf32>, vector<128x384xf32>, vector<8x384xf32> -> vector<8x384xf32>
    %c0_i32_131 = arith.constant 0 : i32
    %311 = arith.addi %c0_i32_131, %c7_i32 : i32
    %312 = arith.index_cast %311 : i32 to index
    %c0_132 = arith.constant 0 : index
    %c0_133 = arith.constant 0 : index
    %313 = vector.load %arg15[%312, %c0_132, %c0_133] : memref<16x8x384xf32, #tpu.memory_space<vmem>>, vector<1x8x384xf32>
    %314 = vector.shape_cast %313 : vector<1x8x384xf32> to vector<8x384xf32>
    %315 = vector.extract_strided_slice %314 {offsets = [0, 0], sizes = [8, 128], strides = [1, 1]} : vector<8x384xf32> to vector<8x128xf32>
    %316 = vector.extract_strided_slice %310 {offsets = [0, 0], sizes = [8, 128], strides = [1, 1]} : vector<8x384xf32> to vector<8x128xf32>
    %317 = arith.addf %315, %316 : vector<8x128xf32>
    %cst_134 = arith.constant 5.000000e-01 : f32
    %318 = vector.broadcast %cst_134 : f32 to vector<8x128xf32>
    %319 = arith.mulf %318, %317 : vector<8x128xf32>
    %320 = math.tanh %319 : vector<8x128xf32>
    %cst_135 = arith.constant 5.000000e-01 : f32
    %321 = vector.broadcast %cst_135 : f32 to vector<8x128xf32>
    %322 = arith.mulf %321, %320 : vector<8x128xf32>
    %cst_136 = arith.constant 5.000000e-01 : f32
    %323 = vector.broadcast %cst_136 : f32 to vector<8x128xf32>
    %324 = arith.addf %322, %323 : vector<8x128xf32>
    %325 = vector.extract_strided_slice %314 {offsets = [0, 128], sizes = [8, 128], strides = [1, 1]} : vector<8x384xf32> to vector<8x128xf32>
    %326 = vector.extract_strided_slice %310 {offsets = [0, 128], sizes = [8, 128], strides = [1, 1]} : vector<8x384xf32> to vector<8x128xf32>
    %327 = arith.addf %325, %326 : vector<8x128xf32>
    %cst_137 = arith.constant 5.000000e-01 : f32
    %328 = vector.broadcast %cst_137 : f32 to vector<8x128xf32>
    %329 = arith.mulf %328, %327 : vector<8x128xf32>
    %330 = math.tanh %329 : vector<8x128xf32>
    %cst_138 = arith.constant 5.000000e-01 : f32
    %331 = vector.broadcast %cst_138 : f32 to vector<8x128xf32>
    %332 = arith.mulf %331, %330 : vector<8x128xf32>
    %cst_139 = arith.constant 5.000000e-01 : f32
    %333 = vector.broadcast %cst_139 : f32 to vector<8x128xf32>
    %334 = arith.addf %332, %333 : vector<8x128xf32>
    %335 = vector.extract_strided_slice %314 {offsets = [0, 256], sizes = [8, 128], strides = [1, 1]} : vector<8x384xf32> to vector<8x128xf32>
    %336 = vector.extract_strided_slice %310 {offsets = [0, 256], sizes = [8, 128], strides = [1, 1]} : vector<8x384xf32> to vector<8x128xf32>
    %337 = arith.addf %336, %2 : vector<8x128xf32>
    %338 = arith.mulf %324, %337 : vector<8x128xf32>
    %339 = arith.addf %335, %338 : vector<8x128xf32>
    %340 = math.tanh %339 : vector<8x128xf32>
    %cst_140 = arith.constant 1.000000e+00 : f32
    %341 = vector.broadcast %cst_140 : f32 to vector<8x128xf32>
    %342 = arith.subf %341, %334 : vector<8x128xf32>
    %343 = arith.subf %340, %303 : vector<8x128xf32>
    %344 = arith.mulf %342, %343 : vector<8x128xf32>
    %345 = arith.addf %303, %344 : vector<8x128xf32>
    %c0_i32_141 = arith.constant 0 : i32
    %346 = arith.addi %c0_i32_141, %c7_i32 : i32
    %347 = arith.index_cast %346 : i32 to index
    %c0_142 = arith.constant 0 : index
    %c0_143 = arith.constant 0 : index
    %348 = vector.load %arg16[%347, %c0_142, %c0_143] : memref<8x8x128xf32, #tpu.memory_space<vmem>>, vector<1x8x128xf32>
    %349 = vector.shape_cast %348 : vector<1x8x128xf32> to vector<8x128xf32>
    %350 = vector.shape_cast %345 : vector<8x128xf32> to vector<1x8x128xf32>
    tpu.vector_store %arg16[%347, %c0_142, %c0_143], %350 {strides = array<i32>} : memref<8x8x128xf32, #tpu.memory_space<vmem>>, vector<1x8x128xf32>,
    %c8_i32 = arith.constant 8 : i32
    %c0_144 = arith.constant 0 : index
    %c0_145 = arith.constant 0 : index
    %351 = vector.load %arg9[%c0_144, %c0_145] : memref<1x128xf32, #tpu.memory_space<vmem>>, vector<1x128xf32>
    %352 = vector.shape_cast %351 : vector<1x128xf32> to vector<1x128xf32>
    %353 = vector.broadcast %352 : vector<1x128xf32> to vector<8x128xf32>
    %c0_146 = arith.constant 0 : index
    %c0_147 = arith.constant 0 : index
    %c0_148 = arith.constant 0 : index
    %354 = vector.load %arg16[%c0_146, %c0_147, %c0_148] : memref<8x8x128xf32, #tpu.memory_space<vmem>>, vector<8x8x128xf32>
    %355 = vector.shape_cast %354 : vector<8x8x128xf32> to vector<64x128xf32>
    %c0_149 = arith.constant 0 : index
    %c0_150 = arith.constant 0 : index
    %356 = vector.load %arg6[%c0_149, %c0_150] : memref<128x384xf32, #tpu.memory_space<vmem>>, vector<128x384xf32>
    %cst_151 = arith.constant dense<0.000000e+00> : vector<64x384xf32>
    %357 = tpu.matmul %355, %356, %cst_151 {dimension_numbers = #tpu.dot_dimension_numbers<[1], [0], [0], [1], [0, 0, 1, 1], [], []>} : vector<64x128xf32>, vector<128x384xf32>, vector<64x384xf32> -> vector<64x384xf32>
    %c0_152 = arith.constant 0 : index
    %c0_153 = arith.constant 0 : index
    %358 = vector.load %arg8[%c0_152, %c0_153] : memref<1x384xf32, #tpu.memory_space<vmem>>, vector<1x384xf32>
    %359 = vector.broadcast %358 : vector<1x384xf32> to vector<64x384xf32>
    %360 = arith.addf %357, %359 : vector<64x384xf32>
    %361 = vector.shape_cast %360 : vector<64x384xf32> to vector<8x8x384xf32>
    %c0_154 = arith.constant 0 : index
    %c0_155 = arith.constant 0 : index
    %c0_156 = arith.constant 0 : index
    %362 = vector.load %arg15[%c0_154, %c0_155, %c0_156] : memref<16x8x384xf32, #tpu.memory_space<vmem>>, vector<8x8x384xf32>
    tpu.vector_store %arg15[%c0_154, %c0_155, %c0_156], %361 {strides = array<i32>} : memref<16x8x384xf32, #tpu.memory_space<vmem>>, vector<8x8x384xf32>,
    %cst_157 = arith.constant 0.000000e+00 : f32
    %363 = vector.broadcast %cst_157 : f32 to vector<8x128xf32>
    %c0_i32_158 = arith.constant 0 : i32
    %c0_i32_159 = arith.constant 0 : i32
    %364 = arith.addi %c0_i32_158, %c0_i32_159 : i32
    %c1_i32_160 = arith.constant 1 : i32
    %365 = scf.for %arg17 = %c0_i32_158 to %364 step %c1_i32_160 iter_args(%arg18 = %363) -> (vector<8x128xf32>)  : i32 {
      %c1_i32_288 = arith.constant 1 : i32
      %675 = arith.addi %arg17, %c1_i32_288 : i32
      %c1_i32_289 = arith.constant 1 : i32
      %676 = arith.addi %arg17, %c1_i32_289 : i32
      %c2_i32_290 = arith.constant 2 : i32
      %c0_i32_291 = arith.constant 0 : i32
      %677 = arith.cmpi eq, %c2_i32_290, %c0_i32_291 : i32
      %c1_i32_292 = arith.constant 1 : i32
      %678 = arith.select %677, %c1_i32_292, %c2_i32_290 : i32
      %679 = arith.remsi %676, %678 : i32
      %c0_i32_293 = arith.constant 0 : i32
      %680 = arith.cmpi ne, %679, %c0_i32_293 : i32
      %c0_i32_294 = arith.constant 0 : i32
      %681 = arith.cmpi slt, %679, %c0_i32_294 : i32
      %c0_i32_295 = arith.constant 0 : i32
      %682 = arith.cmpi slt, %678, %c0_i32_295 : i32
      %683 = arith.xori %681, %682 : i1
      %684 = arith.andi %683, %680 : i1
      %685 = arith.addi %679, %678 : i32
      %686 = arith.select %684, %685, %679 : i32
      %c8_i32_296 = arith.constant 8 : i32
      %687 = arith.muli %675, %c8_i32_296 : i32
      %688 = arith.index_cast %687 : i32 to index
      %c0_297 = arith.constant 0 : index
      %c0_298 = arith.constant 0 : index
      %689 = vector.load %arg16[%688, %c0_297, %c0_298] : memref<8x8x128xf32, #tpu.memory_space<vmem>>, vector<8x8x128xf32>
      %690 = vector.shape_cast %689 : vector<8x8x128xf32> to vector<64x128xf32>
      %c0_299 = arith.constant 0 : index
      %c0_300 = arith.constant 0 : index
      %691 = vector.load %arg6[%c0_299, %c0_300] : memref<128x384xf32, #tpu.memory_space<vmem>>, vector<128x384xf32>
      %cst_301 = arith.constant dense<0.000000e+00> : vector<64x384xf32>
      %692 = tpu.matmul %690, %691, %cst_301 {dimension_numbers = #tpu.dot_dimension_numbers<[1], [0], [0], [1], [0, 0, 1, 1], [], []>} : vector<64x128xf32>, vector<128x384xf32>, vector<64x384xf32> -> vector<64x384xf32>
      %c0_302 = arith.constant 0 : index
      %c0_303 = arith.constant 0 : index
      %693 = vector.load %arg8[%c0_302, %c0_303] : memref<1x384xf32, #tpu.memory_space<vmem>>, vector<1x384xf32>
      %694 = vector.broadcast %693 : vector<1x384xf32> to vector<64x384xf32>
      %695 = arith.addf %692, %694 : vector<64x384xf32>
      %696 = vector.shape_cast %695 : vector<64x384xf32> to vector<8x8x384xf32>
      %c8_i32_304 = arith.constant 8 : i32
      %697 = arith.muli %686, %c8_i32_304 : i32
      %698 = arith.index_cast %697 : i32 to index
      %c0_305 = arith.constant 0 : index
      %c0_306 = arith.constant 0 : index
      %699 = vector.load %arg15[%698, %c0_305, %c0_306] : memref<16x8x384xf32, #tpu.memory_space<vmem>>, vector<8x8x384xf32>
      tpu.vector_store %arg15[%698, %c0_305, %c0_306], %696 {strides = array<i32>} : memref<16x8x384xf32, #tpu.memory_space<vmem>>, vector<8x8x384xf32>,
      %c2_i32_307 = arith.constant 2 : i32
      %c0_i32_308 = arith.constant 0 : i32
      %700 = arith.cmpi eq, %c2_i32_307, %c0_i32_308 : i32
      %c1_i32_309 = arith.constant 1 : i32
      %701 = arith.select %700, %c1_i32_309, %c2_i32_307 : i32
      %702 = arith.remsi %arg17, %701 : i32
      %c0_i32_310 = arith.constant 0 : i32
      %703 = arith.cmpi ne, %702, %c0_i32_310 : i32
      %c0_i32_311 = arith.constant 0 : i32
      %704 = arith.cmpi slt, %702, %c0_i32_311 : i32
      %c0_i32_312 = arith.constant 0 : i32
      %705 = arith.cmpi slt, %701, %c0_i32_312 : i32
      %706 = arith.xori %704, %705 : i1
      %707 = arith.andi %706, %703 : i1
      %708 = arith.addi %702, %701 : i32
      %709 = arith.select %707, %708, %702 : i32
      %c8_i32_313 = arith.constant 8 : i32
      %710 = arith.muli %709, %c8_i32_313 : i32
      %c0_i32_314 = arith.constant 0 : i32
      %c0_315 = arith.constant 0 : index
      %c0_316 = arith.constant 0 : index
      %711 = vector.load %arg7[%c0_315, %c0_316] : memref<128x384xf32, #tpu.memory_space<vmem>>, vector<128x384xf32>
      %cst_317 = arith.constant dense<0.000000e+00> : vector<8x384xf32>
      %712 = tpu.matmul %arg18, %711, %cst_317 {dimension_numbers = #tpu.dot_dimension_numbers<[1], [0], [0], [1], [0, 0, 1, 1], [], []>} : vector<8x128xf32>, vector<128x384xf32>, vector<8x384xf32> -> vector<8x384xf32>
      %713 = arith.addi %710, %c0_i32_314 : i32
      %714 = arith.index_cast %713 : i32 to index
      %c0_318 = arith.constant 0 : index
      %c0_319 = arith.constant 0 : index
      %715 = vector.load %arg15[%714, %c0_318, %c0_319] : memref<16x8x384xf32, #tpu.memory_space<vmem>>, vector<1x8x384xf32>
      %716 = vector.shape_cast %715 : vector<1x8x384xf32> to vector<8x384xf32>
      %717 = vector.extract_strided_slice %716 {offsets = [0, 0], sizes = [8, 128], strides = [1, 1]} : vector<8x384xf32> to vector<8x128xf32>
      %718 = vector.extract_strided_slice %712 {offsets = [0, 0], sizes = [8, 128], strides = [1, 1]} : vector<8x384xf32> to vector<8x128xf32>
      %719 = arith.addf %717, %718 : vector<8x128xf32>
      %cst_320 = arith.constant 5.000000e-01 : f32
      %720 = vector.broadcast %cst_320 : f32 to vector<8x128xf32>
      %721 = arith.mulf %720, %719 : vector<8x128xf32>
      %722 = math.tanh %721 : vector<8x128xf32>
      %cst_321 = arith.constant 5.000000e-01 : f32
      %723 = vector.broadcast %cst_321 : f32 to vector<8x128xf32>
      %724 = arith.mulf %723, %722 : vector<8x128xf32>
      %cst_322 = arith.constant 5.000000e-01 : f32
      %725 = vector.broadcast %cst_322 : f32 to vector<8x128xf32>
      %726 = arith.addf %724, %725 : vector<8x128xf32>
      %727 = vector.extract_strided_slice %716 {offsets = [0, 128], sizes = [8, 128], strides = [1, 1]} : vector<8x384xf32> to vector<8x128xf32>
      %728 = vector.extract_strided_slice %712 {offsets = [0, 128], sizes = [8, 128], strides = [1, 1]} : vector<8x384xf32> to vector<8x128xf32>
      %729 = arith.addf %727, %728 : vector<8x128xf32>
      %cst_323 = arith.constant 5.000000e-01 : f32
      %730 = vector.broadcast %cst_323 : f32 to vector<8x128xf32>
      %731 = arith.mulf %730, %729 : vector<8x128xf32>
      %732 = math.tanh %731 : vector<8x128xf32>
      %cst_324 = arith.constant 5.000000e-01 : f32
      %733 = vector.broadcast %cst_324 : f32 to vector<8x128xf32>
      %734 = arith.mulf %733, %732 : vector<8x128xf32>
      %cst_325 = arith.constant 5.000000e-01 : f32
      %735 = vector.broadcast %cst_325 : f32 to vector<8x128xf32>
      %736 = arith.addf %734, %735 : vector<8x128xf32>
      %737 = vector.extract_strided_slice %716 {offsets = [0, 256], sizes = [8, 128], strides = [1, 1]} : vector<8x384xf32> to vector<8x128xf32>
      %738 = vector.extract_strided_slice %712 {offsets = [0, 256], sizes = [8, 128], strides = [1, 1]} : vector<8x384xf32> to vector<8x128xf32>
      %739 = arith.addf %738, %353 : vector<8x128xf32>
      %740 = arith.mulf %726, %739 : vector<8x128xf32>
      %741 = arith.addf %737, %740 : vector<8x128xf32>
      %742 = math.tanh %741 : vector<8x128xf32>
      %cst_326 = arith.constant 1.000000e+00 : f32
      %743 = vector.broadcast %cst_326 : f32 to vector<8x128xf32>
      %744 = arith.subf %743, %736 : vector<8x128xf32>
      %745 = arith.subf %742, %arg18 : vector<8x128xf32>
      %746 = arith.mulf %744, %745 : vector<8x128xf32>
      %747 = arith.addf %arg18, %746 : vector<8x128xf32>
      %c1_i32_327 = arith.constant 1 : i32
      %c0_328 = arith.constant 0 : index
      %c0_329 = arith.constant 0 : index
      %748 = vector.load %arg7[%c0_328, %c0_329] : memref<128x384xf32, #tpu.memory_space<vmem>>, vector<128x384xf32>
      %cst_330 = arith.constant dense<0.000000e+00> : vector<8x384xf32>
      %749 = tpu.matmul %747, %748, %cst_330 {dimension_numbers = #tpu.dot_dimension_numbers<[1], [0], [0], [1], [0, 0, 1, 1], [], []>} : vector<8x128xf32>, vector<128x384xf32>, vector<8x384xf32> -> vector<8x384xf32>
      %750 = arith.addi %710, %c1_i32_327 : i32
      %751 = arith.index_cast %750 : i32 to index
      %c0_331 = arith.constant 0 : index
      %c0_332 = arith.constant 0 : index
      %752 = vector.load %arg15[%751, %c0_331, %c0_332] : memref<16x8x384xf32, #tpu.memory_space<vmem>>, vector<1x8x384xf32>
      %753 = vector.shape_cast %752 : vector<1x8x384xf32> to vector<8x384xf32>
      %754 = vector.extract_strided_slice %753 {offsets = [0, 0], sizes = [8, 128], strides = [1, 1]} : vector<8x384xf32> to vector<8x128xf32>
      %755 = vector.extract_strided_slice %749 {offsets = [0, 0], sizes = [8, 128], strides = [1, 1]} : vector<8x384xf32> to vector<8x128xf32>
      %756 = arith.addf %754, %755 : vector<8x128xf32>
      %cst_333 = arith.constant 5.000000e-01 : f32
      %757 = vector.broadcast %cst_333 : f32 to vector<8x128xf32>
      %758 = arith.mulf %757, %756 : vector<8x128xf32>
      %759 = math.tanh %758 : vector<8x128xf32>
      %cst_334 = arith.constant 5.000000e-01 : f32
      %760 = vector.broadcast %cst_334 : f32 to vector<8x128xf32>
      %761 = arith.mulf %760, %759 : vector<8x128xf32>
      %cst_335 = arith.constant 5.000000e-01 : f32
      %762 = vector.broadcast %cst_335 : f32 to vector<8x128xf32>
      %763 = arith.addf %761, %762 : vector<8x128xf32>
      %764 = vector.extract_strided_slice %753 {offsets = [0, 128], sizes = [8, 128], strides = [1, 1]} : vector<8x384xf32> to vector<8x128xf32>
      %765 = vector.extract_strided_slice %749 {offsets = [0, 128], sizes = [8, 128], strides = [1, 1]} : vector<8x384xf32> to vector<8x128xf32>
      %766 = arith.addf %764, %765 : vector<8x128xf32>
      %cst_336 = arith.constant 5.000000e-01 : f32
      %767 = vector.broadcast %cst_336 : f32 to vector<8x128xf32>
      %768 = arith.mulf %767, %766 : vector<8x128xf32>
      %769 = math.tanh %768 : vector<8x128xf32>
      %cst_337 = arith.constant 5.000000e-01 : f32
      %770 = vector.broadcast %cst_337 : f32 to vector<8x128xf32>
      %771 = arith.mulf %770, %769 : vector<8x128xf32>
      %cst_338 = arith.constant 5.000000e-01 : f32
      %772 = vector.broadcast %cst_338 : f32 to vector<8x128xf32>
      %773 = arith.addf %771, %772 : vector<8x128xf32>
      %774 = vector.extract_strided_slice %753 {offsets = [0, 256], sizes = [8, 128], strides = [1, 1]} : vector<8x384xf32> to vector<8x128xf32>
      %775 = vector.extract_strided_slice %749 {offsets = [0, 256], sizes = [8, 128], strides = [1, 1]} : vector<8x384xf32> to vector<8x128xf32>
      %776 = arith.addf %775, %353 : vector<8x128xf32>
      %777 = arith.mulf %763, %776 : vector<8x128xf32>
      %778 = arith.addf %774, %777 : vector<8x128xf32>
      %779 = math.tanh %778 : vector<8x128xf32>
      %cst_339 = arith.constant 1.000000e+00 : f32
      %780 = vector.broadcast %cst_339 : f32 to vector<8x128xf32>
      %781 = arith.subf %780, %773 : vector<8x128xf32>
      %782 = arith.subf %779, %747 : vector<8x128xf32>
      %783 = arith.mulf %781, %782 : vector<8x128xf32>
      %784 = arith.addf %747, %783 : vector<8x128xf32>
      %c2_i32_340 = arith.constant 2 : i32
      %c0_341 = arith.constant 0 : index
      %c0_342 = arith.constant 0 : index
      %785 = vector.load %arg7[%c0_341, %c0_342] : memref<128x384xf32, #tpu.memory_space<vmem>>, vector<128x384xf32>
      %cst_343 = arith.constant dense<0.000000e+00> : vector<8x384xf32>
      %786 = tpu.matmul %784, %785, %cst_343 {dimension_numbers = #tpu.dot_dimension_numbers<[1], [0], [0], [1], [0, 0, 1, 1], [], []>} : vector<8x128xf32>, vector<128x384xf32>, vector<8x384xf32> -> vector<8x384xf32>
      %787 = arith.addi %710, %c2_i32_340 : i32
      %788 = arith.index_cast %787 : i32 to index
      %c0_344 = arith.constant 0 : index
      %c0_345 = arith.constant 0 : index
      %789 = vector.load %arg15[%788, %c0_344, %c0_345] : memref<16x8x384xf32, #tpu.memory_space<vmem>>, vector<1x8x384xf32>
      %790 = vector.shape_cast %789 : vector<1x8x384xf32> to vector<8x384xf32>
      %791 = vector.extract_strided_slice %790 {offsets = [0, 0], sizes = [8, 128], strides = [1, 1]} : vector<8x384xf32> to vector<8x128xf32>
      %792 = vector.extract_strided_slice %786 {offsets = [0, 0], sizes = [8, 128], strides = [1, 1]} : vector<8x384xf32> to vector<8x128xf32>
      %793 = arith.addf %791, %792 : vector<8x128xf32>
      %cst_346 = arith.constant 5.000000e-01 : f32
      %794 = vector.broadcast %cst_346 : f32 to vector<8x128xf32>
      %795 = arith.mulf %794, %793 : vector<8x128xf32>
      %796 = math.tanh %795 : vector<8x128xf32>
      %cst_347 = arith.constant 5.000000e-01 : f32
      %797 = vector.broadcast %cst_347 : f32 to vector<8x128xf32>
      %798 = arith.mulf %797, %796 : vector<8x128xf32>
      %cst_348 = arith.constant 5.000000e-01 : f32
      %799 = vector.broadcast %cst_348 : f32 to vector<8x128xf32>
      %800 = arith.addf %798, %799 : vector<8x128xf32>
      %801 = vector.extract_strided_slice %790 {offsets = [0, 128], sizes = [8, 128], strides = [1, 1]} : vector<8x384xf32> to vector<8x128xf32>
      %802 = vector.extract_strided_slice %786 {offsets = [0, 128], sizes = [8, 128], strides = [1, 1]} : vector<8x384xf32> to vector<8x128xf32>
      %803 = arith.addf %801, %802 : vector<8x128xf32>
      %cst_349 = arith.constant 5.000000e-01 : f32
      %804 = vector.broadcast %cst_349 : f32 to vector<8x128xf32>
      %805 = arith.mulf %804, %803 : vector<8x128xf32>
      %806 = math.tanh %805 : vector<8x128xf32>
      %cst_350 = arith.constant 5.000000e-01 : f32
      %807 = vector.broadcast %cst_350 : f32 to vector<8x128xf32>
      %808 = arith.mulf %807, %806 : vector<8x128xf32>
      %cst_351 = arith.constant 5.000000e-01 : f32
      %809 = vector.broadcast %cst_351 : f32 to vector<8x128xf32>
      %810 = arith.addf %808, %809 : vector<8x128xf32>
      %811 = vector.extract_strided_slice %790 {offsets = [0, 256], sizes = [8, 128], strides = [1, 1]} : vector<8x384xf32> to vector<8x128xf32>
      %812 = vector.extract_strided_slice %786 {offsets = [0, 256], sizes = [8, 128], strides = [1, 1]} : vector<8x384xf32> to vector<8x128xf32>
      %813 = arith.addf %812, %353 : vector<8x128xf32>
      %814 = arith.mulf %800, %813 : vector<8x128xf32>
      %815 = arith.addf %811, %814 : vector<8x128xf32>
      %816 = math.tanh %815 : vector<8x128xf32>
      %cst_352 = arith.constant 1.000000e+00 : f32
      %817 = vector.broadcast %cst_352 : f32 to vector<8x128xf32>
      %818 = arith.subf %817, %810 : vector<8x128xf32>
      %819 = arith.subf %816, %784 : vector<8x128xf32>
      %820 = arith.mulf %818, %819 : vector<8x128xf32>
      %821 = arith.addf %784, %820 : vector<8x128xf32>
      %c3_i32_353 = arith.constant 3 : i32
      %c0_354 = arith.constant 0 : index
      %c0_355 = arith.constant 0 : index
      %822 = vector.load %arg7[%c0_354, %c0_355] : memref<128x384xf32, #tpu.memory_space<vmem>>, vector<128x384xf32>
      %cst_356 = arith.constant dense<0.000000e+00> : vector<8x384xf32>
      %823 = tpu.matmul %821, %822, %cst_356 {dimension_numbers = #tpu.dot_dimension_numbers<[1], [0], [0], [1], [0, 0, 1, 1], [], []>} : vector<8x128xf32>, vector<128x384xf32>, vector<8x384xf32> -> vector<8x384xf32>
      %824 = arith.addi %710, %c3_i32_353 : i32
      %825 = arith.index_cast %824 : i32 to index
      %c0_357 = arith.constant 0 : index
      %c0_358 = arith.constant 0 : index
      %826 = vector.load %arg15[%825, %c0_357, %c0_358] : memref<16x8x384xf32, #tpu.memory_space<vmem>>, vector<1x8x384xf32>
      %827 = vector.shape_cast %826 : vector<1x8x384xf32> to vector<8x384xf32>
      %828 = vector.extract_strided_slice %827 {offsets = [0, 0], sizes = [8, 128], strides = [1, 1]} : vector<8x384xf32> to vector<8x128xf32>
      %829 = vector.extract_strided_slice %823 {offsets = [0, 0], sizes = [8, 128], strides = [1, 1]} : vector<8x384xf32> to vector<8x128xf32>
      %830 = arith.addf %828, %829 : vector<8x128xf32>
      %cst_359 = arith.constant 5.000000e-01 : f32
      %831 = vector.broadcast %cst_359 : f32 to vector<8x128xf32>
      %832 = arith.mulf %831, %830 : vector<8x128xf32>
      %833 = math.tanh %832 : vector<8x128xf32>
      %cst_360 = arith.constant 5.000000e-01 : f32
      %834 = vector.broadcast %cst_360 : f32 to vector<8x128xf32>
      %835 = arith.mulf %834, %833 : vector<8x128xf32>
      %cst_361 = arith.constant 5.000000e-01 : f32
      %836 = vector.broadcast %cst_361 : f32 to vector<8x128xf32>
      %837 = arith.addf %835, %836 : vector<8x128xf32>
      %838 = vector.extract_strided_slice %827 {offsets = [0, 128], sizes = [8, 128], strides = [1, 1]} : vector<8x384xf32> to vector<8x128xf32>
      %839 = vector.extract_strided_slice %823 {offsets = [0, 128], sizes = [8, 128], strides = [1, 1]} : vector<8x384xf32> to vector<8x128xf32>
      %840 = arith.addf %838, %839 : vector<8x128xf32>
      %cst_362 = arith.constant 5.000000e-01 : f32
      %841 = vector.broadcast %cst_362 : f32 to vector<8x128xf32>
      %842 = arith.mulf %841, %840 : vector<8x128xf32>
      %843 = math.tanh %842 : vector<8x128xf32>
      %cst_363 = arith.constant 5.000000e-01 : f32
      %844 = vector.broadcast %cst_363 : f32 to vector<8x128xf32>
      %845 = arith.mulf %844, %843 : vector<8x128xf32>
      %cst_364 = arith.constant 5.000000e-01 : f32
      %846 = vector.broadcast %cst_364 : f32 to vector<8x128xf32>
      %847 = arith.addf %845, %846 : vector<8x128xf32>
      %848 = vector.extract_strided_slice %827 {offsets = [0, 256], sizes = [8, 128], strides = [1, 1]} : vector<8x384xf32> to vector<8x128xf32>
      %849 = vector.extract_strided_slice %823 {offsets = [0, 256], sizes = [8, 128], strides = [1, 1]} : vector<8x384xf32> to vector<8x128xf32>
      %850 = arith.addf %849, %353 : vector<8x128xf32>
      %851 = arith.mulf %837, %850 : vector<8x128xf32>
      %852 = arith.addf %848, %851 : vector<8x128xf32>
      %853 = math.tanh %852 : vector<8x128xf32>
      %cst_365 = arith.constant 1.000000e+00 : f32
      %854 = vector.broadcast %cst_365 : f32 to vector<8x128xf32>
      %855 = arith.subf %854, %847 : vector<8x128xf32>
      %856 = arith.subf %853, %821 : vector<8x128xf32>
      %857 = arith.mulf %855, %856 : vector<8x128xf32>
      %858 = arith.addf %821, %857 : vector<8x128xf32>
      %c4_i32_366 = arith.constant 4 : i32
      %c0_367 = arith.constant 0 : index
      %c0_368 = arith.constant 0 : index
      %859 = vector.load %arg7[%c0_367, %c0_368] : memref<128x384xf32, #tpu.memory_space<vmem>>, vector<128x384xf32>
      %cst_369 = arith.constant dense<0.000000e+00> : vector<8x384xf32>
      %860 = tpu.matmul %858, %859, %cst_369 {dimension_numbers = #tpu.dot_dimension_numbers<[1], [0], [0], [1], [0, 0, 1, 1], [], []>} : vector<8x128xf32>, vector<128x384xf32>, vector<8x384xf32> -> vector<8x384xf32>
      %861 = arith.addi %710, %c4_i32_366 : i32
      %862 = arith.index_cast %861 : i32 to index
      %c0_370 = arith.constant 0 : index
      %c0_371 = arith.constant 0 : index
      %863 = vector.load %arg15[%862, %c0_370, %c0_371] : memref<16x8x384xf32, #tpu.memory_space<vmem>>, vector<1x8x384xf32>
      %864 = vector.shape_cast %863 : vector<1x8x384xf32> to vector<8x384xf32>
      %865 = vector.extract_strided_slice %864 {offsets = [0, 0], sizes = [8, 128], strides = [1, 1]} : vector<8x384xf32> to vector<8x128xf32>
      %866 = vector.extract_strided_slice %860 {offsets = [0, 0], sizes = [8, 128], strides = [1, 1]} : vector<8x384xf32> to vector<8x128xf32>
      %867 = arith.addf %865, %866 : vector<8x128xf32>
      %cst_372 = arith.constant 5.000000e-01 : f32
      %868 = vector.broadcast %cst_372 : f32 to vector<8x128xf32>
      %869 = arith.mulf %868, %867 : vector<8x128xf32>
      %870 = math.tanh %869 : vector<8x128xf32>
      %cst_373 = arith.constant 5.000000e-01 : f32
      %871 = vector.broadcast %cst_373 : f32 to vector<8x128xf32>
      %872 = arith.mulf %871, %870 : vector<8x128xf32>
      %cst_374 = arith.constant 5.000000e-01 : f32
      %873 = vector.broadcast %cst_374 : f32 to vector<8x128xf32>
      %874 = arith.addf %872, %873 : vector<8x128xf32>
      %875 = vector.extract_strided_slice %864 {offsets = [0, 128], sizes = [8, 128], strides = [1, 1]} : vector<8x384xf32> to vector<8x128xf32>
      %876 = vector.extract_strided_slice %860 {offsets = [0, 128], sizes = [8, 128], strides = [1, 1]} : vector<8x384xf32> to vector<8x128xf32>
      %877 = arith.addf %875, %876 : vector<8x128xf32>
      %cst_375 = arith.constant 5.000000e-01 : f32
      %878 = vector.broadcast %cst_375 : f32 to vector<8x128xf32>
      %879 = arith.mulf %878, %877 : vector<8x128xf32>
      %880 = math.tanh %879 : vector<8x128xf32>
      %cst_376 = arith.constant 5.000000e-01 : f32
      %881 = vector.broadcast %cst_376 : f32 to vector<8x128xf32>
      %882 = arith.mulf %881, %880 : vector<8x128xf32>
      %cst_377 = arith.constant 5.000000e-01 : f32
      %883 = vector.broadcast %cst_377 : f32 to vector<8x128xf32>
      %884 = arith.addf %882, %883 : vector<8x128xf32>
      %885 = vector.extract_strided_slice %864 {offsets = [0, 256], sizes = [8, 128], strides = [1, 1]} : vector<8x384xf32> to vector<8x128xf32>
      %886 = vector.extract_strided_slice %860 {offsets = [0, 256], sizes = [8, 128], strides = [1, 1]} : vector<8x384xf32> to vector<8x128xf32>
      %887 = arith.addf %886, %353 : vector<8x128xf32>
      %888 = arith.mulf %874, %887 : vector<8x128xf32>
      %889 = arith.addf %885, %888 : vector<8x128xf32>
      %890 = math.tanh %889 : vector<8x128xf32>
      %cst_378 = arith.constant 1.000000e+00 : f32
      %891 = vector.broadcast %cst_378 : f32 to vector<8x128xf32>
      %892 = arith.subf %891, %884 : vector<8x128xf32>
      %893 = arith.subf %890, %858 : vector<8x128xf32>
      %894 = arith.mulf %892, %893 : vector<8x128xf32>
      %895 = arith.addf %858, %894 : vector<8x128xf32>
      %c5_i32_379 = arith.constant 5 : i32
      %c0_380 = arith.constant 0 : index
      %c0_381 = arith.constant 0 : index
      %896 = vector.load %arg7[%c0_380, %c0_381] : memref<128x384xf32, #tpu.memory_space<vmem>>, vector<128x384xf32>
      %cst_382 = arith.constant dense<0.000000e+00> : vector<8x384xf32>
      %897 = tpu.matmul %895, %896, %cst_382 {dimension_numbers = #tpu.dot_dimension_numbers<[1], [0], [0], [1], [0, 0, 1, 1], [], []>} : vector<8x128xf32>, vector<128x384xf32>, vector<8x384xf32> -> vector<8x384xf32>
      %898 = arith.addi %710, %c5_i32_379 : i32
      %899 = arith.index_cast %898 : i32 to index
      %c0_383 = arith.constant 0 : index
      %c0_384 = arith.constant 0 : index
      %900 = vector.load %arg15[%899, %c0_383, %c0_384] : memref<16x8x384xf32, #tpu.memory_space<vmem>>, vector<1x8x384xf32>
      %901 = vector.shape_cast %900 : vector<1x8x384xf32> to vector<8x384xf32>
      %902 = vector.extract_strided_slice %901 {offsets = [0, 0], sizes = [8, 128], strides = [1, 1]} : vector<8x384xf32> to vector<8x128xf32>
      %903 = vector.extract_strided_slice %897 {offsets = [0, 0], sizes = [8, 128], strides = [1, 1]} : vector<8x384xf32> to vector<8x128xf32>
      %904 = arith.addf %902, %903 : vector<8x128xf32>
      %cst_385 = arith.constant 5.000000e-01 : f32
      %905 = vector.broadcast %cst_385 : f32 to vector<8x128xf32>
      %906 = arith.mulf %905, %904 : vector<8x128xf32>
      %907 = math.tanh %906 : vector<8x128xf32>
      %cst_386 = arith.constant 5.000000e-01 : f32
      %908 = vector.broadcast %cst_386 : f32 to vector<8x128xf32>
      %909 = arith.mulf %908, %907 : vector<8x128xf32>
      %cst_387 = arith.constant 5.000000e-01 : f32
      %910 = vector.broadcast %cst_387 : f32 to vector<8x128xf32>
      %911 = arith.addf %909, %910 : vector<8x128xf32>
      %912 = vector.extract_strided_slice %901 {offsets = [0, 128], sizes = [8, 128], strides = [1, 1]} : vector<8x384xf32> to vector<8x128xf32>
      %913 = vector.extract_strided_slice %897 {offsets = [0, 128], sizes = [8, 128], strides = [1, 1]} : vector<8x384xf32> to vector<8x128xf32>
      %914 = arith.addf %912, %913 : vector<8x128xf32>
      %cst_388 = arith.constant 5.000000e-01 : f32
      %915 = vector.broadcast %cst_388 : f32 to vector<8x128xf32>
      %916 = arith.mulf %915, %914 : vector<8x128xf32>
      %917 = math.tanh %916 : vector<8x128xf32>
      %cst_389 = arith.constant 5.000000e-01 : f32
      %918 = vector.broadcast %cst_389 : f32 to vector<8x128xf32>
      %919 = arith.mulf %918, %917 : vector<8x128xf32>
      %cst_390 = arith.constant 5.000000e-01 : f32
      %920 = vector.broadcast %cst_390 : f32 to vector<8x128xf32>
      %921 = arith.addf %919, %920 : vector<8x128xf32>
      %922 = vector.extract_strided_slice %901 {offsets = [0, 256], sizes = [8, 128], strides = [1, 1]} : vector<8x384xf32> to vector<8x128xf32>
      %923 = vector.extract_strided_slice %897 {offsets = [0, 256], sizes = [8, 128], strides = [1, 1]} : vector<8x384xf32> to vector<8x128xf32>
      %924 = arith.addf %923, %353 : vector<8x128xf32>
      %925 = arith.mulf %911, %924 : vector<8x128xf32>
      %926 = arith.addf %922, %925 : vector<8x128xf32>
      %927 = math.tanh %926 : vector<8x128xf32>
      %cst_391 = arith.constant 1.000000e+00 : f32
      %928 = vector.broadcast %cst_391 : f32 to vector<8x128xf32>
      %929 = arith.subf %928, %921 : vector<8x128xf32>
      %930 = arith.subf %927, %895 : vector<8x128xf32>
      %931 = arith.mulf %929, %930 : vector<8x128xf32>
      %932 = arith.addf %895, %931 : vector<8x128xf32>
      %c6_i32_392 = arith.constant 6 : i32
      %c0_393 = arith.constant 0 : index
      %c0_394 = arith.constant 0 : index
      %933 = vector.load %arg7[%c0_393, %c0_394] : memref<128x384xf32, #tpu.memory_space<vmem>>, vector<128x384xf32>
      %cst_395 = arith.constant dense<0.000000e+00> : vector<8x384xf32>
      %934 = tpu.matmul %932, %933, %cst_395 {dimension_numbers = #tpu.dot_dimension_numbers<[1], [0], [0], [1], [0, 0, 1, 1], [], []>} : vector<8x128xf32>, vector<128x384xf32>, vector<8x384xf32> -> vector<8x384xf32>
      %935 = arith.addi %710, %c6_i32_392 : i32
      %936 = arith.index_cast %935 : i32 to index
      %c0_396 = arith.constant 0 : index
      %c0_397 = arith.constant 0 : index
      %937 = vector.load %arg15[%936, %c0_396, %c0_397] : memref<16x8x384xf32, #tpu.memory_space<vmem>>, vector<1x8x384xf32>
      %938 = vector.shape_cast %937 : vector<1x8x384xf32> to vector<8x384xf32>
      %939 = vector.extract_strided_slice %938 {offsets = [0, 0], sizes = [8, 128], strides = [1, 1]} : vector<8x384xf32> to vector<8x128xf32>
      %940 = vector.extract_strided_slice %934 {offsets = [0, 0], sizes = [8, 128], strides = [1, 1]} : vector<8x384xf32> to vector<8x128xf32>
      %941 = arith.addf %939, %940 : vector<8x128xf32>
      %cst_398 = arith.constant 5.000000e-01 : f32
      %942 = vector.broadcast %cst_398 : f32 to vector<8x128xf32>
      %943 = arith.mulf %942, %941 : vector<8x128xf32>
      %944 = math.tanh %943 : vector<8x128xf32>
      %cst_399 = arith.constant 5.000000e-01 : f32
      %945 = vector.broadcast %cst_399 : f32 to vector<8x128xf32>
      %946 = arith.mulf %945, %944 : vector<8x128xf32>
      %cst_400 = arith.constant 5.000000e-01 : f32
      %947 = vector.broadcast %cst_400 : f32 to vector<8x128xf32>
      %948 = arith.addf %946, %947 : vector<8x128xf32>
      %949 = vector.extract_strided_slice %938 {offsets = [0, 128], sizes = [8, 128], strides = [1, 1]} : vector<8x384xf32> to vector<8x128xf32>
      %950 = vector.extract_strided_slice %934 {offsets = [0, 128], sizes = [8, 128], strides = [1, 1]} : vector<8x384xf32> to vector<8x128xf32>
      %951 = arith.addf %949, %950 : vector<8x128xf32>
      %cst_401 = arith.constant 5.000000e-01 : f32
      %952 = vector.broadcast %cst_401 : f32 to vector<8x128xf32>
      %953 = arith.mulf %952, %951 : vector<8x128xf32>
      %954 = math.tanh %953 : vector<8x128xf32>
      %cst_402 = arith.constant 5.000000e-01 : f32
      %955 = vector.broadcast %cst_402 : f32 to vector<8x128xf32>
      %956 = arith.mulf %955, %954 : vector<8x128xf32>
      %cst_403 = arith.constant 5.000000e-01 : f32
      %957 = vector.broadcast %cst_403 : f32 to vector<8x128xf32>
      %958 = arith.addf %956, %957 : vector<8x128xf32>
      %959 = vector.extract_strided_slice %938 {offsets = [0, 256], sizes = [8, 128], strides = [1, 1]} : vector<8x384xf32> to vector<8x128xf32>
      %960 = vector.extract_strided_slice %934 {offsets = [0, 256], sizes = [8, 128], strides = [1, 1]} : vector<8x384xf32> to vector<8x128xf32>
      %961 = arith.addf %960, %353 : vector<8x128xf32>
      %962 = arith.mulf %948, %961 : vector<8x128xf32>
      %963 = arith.addf %959, %962 : vector<8x128xf32>
      %964 = math.tanh %963 : vector<8x128xf32>
      %cst_404 = arith.constant 1.000000e+00 : f32
      %965 = vector.broadcast %cst_404 : f32 to vector<8x128xf32>
      %966 = arith.subf %965, %958 : vector<8x128xf32>
      %967 = arith.subf %964, %932 : vector<8x128xf32>
      %968 = arith.mulf %966, %967 : vector<8x128xf32>
      %969 = arith.addf %932, %968 : vector<8x128xf32>
      %c7_i32_405 = arith.constant 7 : i32
      %c0_406 = arith.constant 0 : index
      %c0_407 = arith.constant 0 : index
      %970 = vector.load %arg7[%c0_406, %c0_407] : memref<128x384xf32, #tpu.memory_space<vmem>>, vector<128x384xf32>
      %cst_408 = arith.constant dense<0.000000e+00> : vector<8x384xf32>
      %971 = tpu.matmul %969, %970, %cst_408 {dimension_numbers = #tpu.dot_dimension_numbers<[1], [0], [0], [1], [0, 0, 1, 1], [], []>} : vector<8x128xf32>, vector<128x384xf32>, vector<8x384xf32> -> vector<8x384xf32>
      %972 = arith.addi %710, %c7_i32_405 : i32
      %973 = arith.index_cast %972 : i32 to index
      %c0_409 = arith.constant 0 : index
      %c0_410 = arith.constant 0 : index
      %974 = vector.load %arg15[%973, %c0_409, %c0_410] : memref<16x8x384xf32, #tpu.memory_space<vmem>>, vector<1x8x384xf32>
      %975 = vector.shape_cast %974 : vector<1x8x384xf32> to vector<8x384xf32>
      %976 = vector.extract_strided_slice %975 {offsets = [0, 0], sizes = [8, 128], strides = [1, 1]} : vector<8x384xf32> to vector<8x128xf32>
      %977 = vector.extract_strided_slice %971 {offsets = [0, 0], sizes = [8, 128], strides = [1, 1]} : vector<8x384xf32> to vector<8x128xf32>
      %978 = arith.addf %976, %977 : vector<8x128xf32>
      %cst_411 = arith.constant 5.000000e-01 : f32
      %979 = vector.broadcast %cst_411 : f32 to vector<8x128xf32>
      %980 = arith.mulf %979, %978 : vector<8x128xf32>
      %981 = math.tanh %980 : vector<8x128xf32>
      %cst_412 = arith.constant 5.000000e-01 : f32
      %982 = vector.broadcast %cst_412 : f32 to vector<8x128xf32>
      %983 = arith.mulf %982, %981 : vector<8x128xf32>
      %cst_413 = arith.constant 5.000000e-01 : f32
      %984 = vector.broadcast %cst_413 : f32 to vector<8x128xf32>
      %985 = arith.addf %983, %984 : vector<8x128xf32>
      %986 = vector.extract_strided_slice %975 {offsets = [0, 128], sizes = [8, 128], strides = [1, 1]} : vector<8x384xf32> to vector<8x128xf32>
      %987 = vector.extract_strided_slice %971 {offsets = [0, 128], sizes = [8, 128], strides = [1, 1]} : vector<8x384xf32> to vector<8x128xf32>
      %988 = arith.addf %986, %987 : vector<8x128xf32>
      %cst_414 = arith.constant 5.000000e-01 : f32
      %989 = vector.broadcast %cst_414 : f32 to vector<8x128xf32>
      %990 = arith.mulf %989, %988 : vector<8x128xf32>
      %991 = math.tanh %990 : vector<8x128xf32>
      %cst_415 = arith.constant 5.000000e-01 : f32
      %992 = vector.broadcast %cst_415 : f32 to vector<8x128xf32>
      %993 = arith.mulf %992, %991 : vector<8x128xf32>
      %cst_416 = arith.constant 5.000000e-01 : f32
      %994 = vector.broadcast %cst_416 : f32 to vector<8x128xf32>
      %995 = arith.addf %993, %994 : vector<8x128xf32>
      %996 = vector.extract_strided_slice %975 {offsets = [0, 256], sizes = [8, 128], strides = [1, 1]} : vector<8x384xf32> to vector<8x128xf32>
      %997 = vector.extract_strided_slice %971 {offsets = [0, 256], sizes = [8, 128], strides = [1, 1]} : vector<8x384xf32> to vector<8x128xf32>
      %998 = arith.addf %997, %353 : vector<8x128xf32>
      %999 = arith.mulf %985, %998 : vector<8x128xf32>
      %1000 = arith.addf %996, %999 : vector<8x128xf32>
      %1001 = math.tanh %1000 : vector<8x128xf32>
      %cst_417 = arith.constant 1.000000e+00 : f32
      %1002 = vector.broadcast %cst_417 : f32 to vector<8x128xf32>
      %1003 = arith.subf %1002, %995 : vector<8x128xf32>
      %1004 = arith.subf %1001, %969 : vector<8x128xf32>
      %1005 = arith.mulf %1003, %1004 : vector<8x128xf32>
      %1006 = arith.addf %969, %1005 : vector<8x128xf32>
      %c8_i32_418 = arith.constant 8 : i32
      scf.yield %1006 : vector<8x128xf32>
    }
    %c0_i32_161 = arith.constant 0 : i32
    %c0_i32_162 = arith.constant 0 : i32
    %c0_163 = arith.constant 0 : index
    %c0_164 = arith.constant 0 : index
    %366 = vector.load %arg7[%c0_163, %c0_164] : memref<128x384xf32, #tpu.memory_space<vmem>>, vector<128x384xf32>
    %cst_165 = arith.constant dense<0.000000e+00> : vector<8x384xf32>
    %367 = tpu.matmul %365, %366, %cst_165 {dimension_numbers = #tpu.dot_dimension_numbers<[1], [0], [0], [1], [0, 0, 1, 1], [], []>} : vector<8x128xf32>, vector<128x384xf32>, vector<8x384xf32> -> vector<8x384xf32>
    %c0_i32_166 = arith.constant 0 : i32
    %368 = arith.addi %c0_i32_166, %c0_i32_162 : i32
    %369 = arith.index_cast %368 : i32 to index
    %c0_167 = arith.constant 0 : index
    %c0_168 = arith.constant 0 : index
    %370 = vector.load %arg15[%369, %c0_167, %c0_168] : memref<16x8x384xf32, #tpu.memory_space<vmem>>, vector<1x8x384xf32>
    %371 = vector.shape_cast %370 : vector<1x8x384xf32> to vector<8x384xf32>
    %372 = vector.extract_strided_slice %371 {offsets = [0, 0], sizes = [8, 128], strides = [1, 1]} : vector<8x384xf32> to vector<8x128xf32>
    %373 = vector.extract_strided_slice %367 {offsets = [0, 0], sizes = [8, 128], strides = [1, 1]} : vector<8x384xf32> to vector<8x128xf32>
    %374 = arith.addf %372, %373 : vector<8x128xf32>
    %cst_169 = arith.constant 5.000000e-01 : f32
    %375 = vector.broadcast %cst_169 : f32 to vector<8x128xf32>
    %376 = arith.mulf %375, %374 : vector<8x128xf32>
    %377 = math.tanh %376 : vector<8x128xf32>
    %cst_170 = arith.constant 5.000000e-01 : f32
    %378 = vector.broadcast %cst_170 : f32 to vector<8x128xf32>
    %379 = arith.mulf %378, %377 : vector<8x128xf32>
    %cst_171 = arith.constant 5.000000e-01 : f32
    %380 = vector.broadcast %cst_171 : f32 to vector<8x128xf32>
    %381 = arith.addf %379, %380 : vector<8x128xf32>
    %382 = vector.extract_strided_slice %371 {offsets = [0, 128], sizes = [8, 128], strides = [1, 1]} : vector<8x384xf32> to vector<8x128xf32>
    %383 = vector.extract_strided_slice %367 {offsets = [0, 128], sizes = [8, 128], strides = [1, 1]} : vector<8x384xf32> to vector<8x128xf32>
    %384 = arith.addf %382, %383 : vector<8x128xf32>
    %cst_172 = arith.constant 5.000000e-01 : f32
    %385 = vector.broadcast %cst_172 : f32 to vector<8x128xf32>
    %386 = arith.mulf %385, %384 : vector<8x128xf32>
    %387 = math.tanh %386 : vector<8x128xf32>
    %cst_173 = arith.constant 5.000000e-01 : f32
    %388 = vector.broadcast %cst_173 : f32 to vector<8x128xf32>
    %389 = arith.mulf %388, %387 : vector<8x128xf32>
    %cst_174 = arith.constant 5.000000e-01 : f32
    %390 = vector.broadcast %cst_174 : f32 to vector<8x128xf32>
    %391 = arith.addf %389, %390 : vector<8x128xf32>
    %392 = vector.extract_strided_slice %371 {offsets = [0, 256], sizes = [8, 128], strides = [1, 1]} : vector<8x384xf32> to vector<8x128xf32>
    %393 = vector.extract_strided_slice %367 {offsets = [0, 256], sizes = [8, 128], strides = [1, 1]} : vector<8x384xf32> to vector<8x128xf32>
    %394 = arith.addf %393, %353 : vector<8x128xf32>
    %395 = arith.mulf %381, %394 : vector<8x128xf32>
    %396 = arith.addf %392, %395 : vector<8x128xf32>
    %397 = math.tanh %396 : vector<8x128xf32>
    %cst_175 = arith.constant 1.000000e+00 : f32
    %398 = vector.broadcast %cst_175 : f32 to vector<8x128xf32>
    %399 = arith.subf %398, %391 : vector<8x128xf32>
    %400 = arith.subf %397, %365 : vector<8x128xf32>
    %401 = arith.mulf %399, %400 : vector<8x128xf32>
    %402 = arith.addf %365, %401 : vector<8x128xf32>
    %c1_i32_176 = arith.constant 1 : i32
    %c0_177 = arith.constant 0 : index
    %c0_178 = arith.constant 0 : index
    %403 = vector.load %arg7[%c0_177, %c0_178] : memref<128x384xf32, #tpu.memory_space<vmem>>, vector<128x384xf32>
    %cst_179 = arith.constant dense<0.000000e+00> : vector<8x384xf32>
    %404 = tpu.matmul %402, %403, %cst_179 {dimension_numbers = #tpu.dot_dimension_numbers<[1], [0], [0], [1], [0, 0, 1, 1], [], []>} : vector<8x128xf32>, vector<128x384xf32>, vector<8x384xf32> -> vector<8x384xf32>
    %c0_i32_180 = arith.constant 0 : i32
    %405 = arith.addi %c0_i32_180, %c1_i32_176 : i32
    %406 = arith.index_cast %405 : i32 to index
    %c0_181 = arith.constant 0 : index
    %c0_182 = arith.constant 0 : index
    %407 = vector.load %arg15[%406, %c0_181, %c0_182] : memref<16x8x384xf32, #tpu.memory_space<vmem>>, vector<1x8x384xf32>
    %408 = vector.shape_cast %407 : vector<1x8x384xf32> to vector<8x384xf32>
    %409 = vector.extract_strided_slice %408 {offsets = [0, 0], sizes = [8, 128], strides = [1, 1]} : vector<8x384xf32> to vector<8x128xf32>
    %410 = vector.extract_strided_slice %404 {offsets = [0, 0], sizes = [8, 128], strides = [1, 1]} : vector<8x384xf32> to vector<8x128xf32>
    %411 = arith.addf %409, %410 : vector<8x128xf32>
    %cst_183 = arith.constant 5.000000e-01 : f32
    %412 = vector.broadcast %cst_183 : f32 to vector<8x128xf32>
    %413 = arith.mulf %412, %411 : vector<8x128xf32>
    %414 = math.tanh %413 : vector<8x128xf32>
    %cst_184 = arith.constant 5.000000e-01 : f32
    %415 = vector.broadcast %cst_184 : f32 to vector<8x128xf32>
    %416 = arith.mulf %415, %414 : vector<8x128xf32>
    %cst_185 = arith.constant 5.000000e-01 : f32
    %417 = vector.broadcast %cst_185 : f32 to vector<8x128xf32>
    %418 = arith.addf %416, %417 : vector<8x128xf32>
    %419 = vector.extract_strided_slice %408 {offsets = [0, 128], sizes = [8, 128], strides = [1, 1]} : vector<8x384xf32> to vector<8x128xf32>
    %420 = vector.extract_strided_slice %404 {offsets = [0, 128], sizes = [8, 128], strides = [1, 1]} : vector<8x384xf32> to vector<8x128xf32>
    %421 = arith.addf %419, %420 : vector<8x128xf32>
    %cst_186 = arith.constant 5.000000e-01 : f32
    %422 = vector.broadcast %cst_186 : f32 to vector<8x128xf32>
    %423 = arith.mulf %422, %421 : vector<8x128xf32>
    %424 = math.tanh %423 : vector<8x128xf32>
    %cst_187 = arith.constant 5.000000e-01 : f32
    %425 = vector.broadcast %cst_187 : f32 to vector<8x128xf32>
    %426 = arith.mulf %425, %424 : vector<8x128xf32>
    %cst_188 = arith.constant 5.000000e-01 : f32
    %427 = vector.broadcast %cst_188 : f32 to vector<8x128xf32>
    %428 = arith.addf %426, %427 : vector<8x128xf32>
    %429 = vector.extract_strided_slice %408 {offsets = [0, 256], sizes = [8, 128], strides = [1, 1]} : vector<8x384xf32> to vector<8x128xf32>
    %430 = vector.extract_strided_slice %404 {offsets = [0, 256], sizes = [8, 128], strides = [1, 1]} : vector<8x384xf32> to vector<8x128xf32>
    %431 = arith.addf %430, %353 : vector<8x128xf32>
    %432 = arith.mulf %418, %431 : vector<8x128xf32>
    %433 = arith.addf %429, %432 : vector<8x128xf32>
    %434 = math.tanh %433 : vector<8x128xf32>
    %cst_189 = arith.constant 1.000000e+00 : f32
    %435 = vector.broadcast %cst_189 : f32 to vector<8x128xf32>
    %436 = arith.subf %435, %428 : vector<8x128xf32>
    %437 = arith.subf %434, %402 : vector<8x128xf32>
    %438 = arith.mulf %436, %437 : vector<8x128xf32>
    %439 = arith.addf %402, %438 : vector<8x128xf32>
    %c2_i32_190 = arith.constant 2 : i32
    %c0_191 = arith.constant 0 : index
    %c0_192 = arith.constant 0 : index
    %440 = vector.load %arg7[%c0_191, %c0_192] : memref<128x384xf32, #tpu.memory_space<vmem>>, vector<128x384xf32>
    %cst_193 = arith.constant dense<0.000000e+00> : vector<8x384xf32>
    %441 = tpu.matmul %439, %440, %cst_193 {dimension_numbers = #tpu.dot_dimension_numbers<[1], [0], [0], [1], [0, 0, 1, 1], [], []>} : vector<8x128xf32>, vector<128x384xf32>, vector<8x384xf32> -> vector<8x384xf32>
    %c0_i32_194 = arith.constant 0 : i32
    %442 = arith.addi %c0_i32_194, %c2_i32_190 : i32
    %443 = arith.index_cast %442 : i32 to index
    %c0_195 = arith.constant 0 : index
    %c0_196 = arith.constant 0 : index
    %444 = vector.load %arg15[%443, %c0_195, %c0_196] : memref<16x8x384xf32, #tpu.memory_space<vmem>>, vector<1x8x384xf32>
    %445 = vector.shape_cast %444 : vector<1x8x384xf32> to vector<8x384xf32>
    %446 = vector.extract_strided_slice %445 {offsets = [0, 0], sizes = [8, 128], strides = [1, 1]} : vector<8x384xf32> to vector<8x128xf32>
    %447 = vector.extract_strided_slice %441 {offsets = [0, 0], sizes = [8, 128], strides = [1, 1]} : vector<8x384xf32> to vector<8x128xf32>
    %448 = arith.addf %446, %447 : vector<8x128xf32>
    %cst_197 = arith.constant 5.000000e-01 : f32
    %449 = vector.broadcast %cst_197 : f32 to vector<8x128xf32>
    %450 = arith.mulf %449, %448 : vector<8x128xf32>
    %451 = math.tanh %450 : vector<8x128xf32>
    %cst_198 = arith.constant 5.000000e-01 : f32
    %452 = vector.broadcast %cst_198 : f32 to vector<8x128xf32>
    %453 = arith.mulf %452, %451 : vector<8x128xf32>
    %cst_199 = arith.constant 5.000000e-01 : f32
    %454 = vector.broadcast %cst_199 : f32 to vector<8x128xf32>
    %455 = arith.addf %453, %454 : vector<8x128xf32>
    %456 = vector.extract_strided_slice %445 {offsets = [0, 128], sizes = [8, 128], strides = [1, 1]} : vector<8x384xf32> to vector<8x128xf32>
    %457 = vector.extract_strided_slice %441 {offsets = [0, 128], sizes = [8, 128], strides = [1, 1]} : vector<8x384xf32> to vector<8x128xf32>
    %458 = arith.addf %456, %457 : vector<8x128xf32>
    %cst_200 = arith.constant 5.000000e-01 : f32
    %459 = vector.broadcast %cst_200 : f32 to vector<8x128xf32>
    %460 = arith.mulf %459, %458 : vector<8x128xf32>
    %461 = math.tanh %460 : vector<8x128xf32>
    %cst_201 = arith.constant 5.000000e-01 : f32
    %462 = vector.broadcast %cst_201 : f32 to vector<8x128xf32>
    %463 = arith.mulf %462, %461 : vector<8x128xf32>
    %cst_202 = arith.constant 5.000000e-01 : f32
    %464 = vector.broadcast %cst_202 : f32 to vector<8x128xf32>
    %465 = arith.addf %463, %464 : vector<8x128xf32>
    %466 = vector.extract_strided_slice %445 {offsets = [0, 256], sizes = [8, 128], strides = [1, 1]} : vector<8x384xf32> to vector<8x128xf32>
    %467 = vector.extract_strided_slice %441 {offsets = [0, 256], sizes = [8, 128], strides = [1, 1]} : vector<8x384xf32> to vector<8x128xf32>
    %468 = arith.addf %467, %353 : vector<8x128xf32>
    %469 = arith.mulf %455, %468 : vector<8x128xf32>
    %470 = arith.addf %466, %469 : vector<8x128xf32>
    %471 = math.tanh %470 : vector<8x128xf32>
    %cst_203 = arith.constant 1.000000e+00 : f32
    %472 = vector.broadcast %cst_203 : f32 to vector<8x128xf32>
    %473 = arith.subf %472, %465 : vector<8x128xf32>
    %474 = arith.subf %471, %439 : vector<8x128xf32>
    %475 = arith.mulf %473, %474 : vector<8x128xf32>
    %476 = arith.addf %439, %475 : vector<8x128xf32>
    %c3_i32_204 = arith.constant 3 : i32
    %c0_205 = arith.constant 0 : index
    %c0_206 = arith.constant 0 : index
    %477 = vector.load %arg7[%c0_205, %c0_206] : memref<128x384xf32, #tpu.memory_space<vmem>>, vector<128x384xf32>
    %cst_207 = arith.constant dense<0.000000e+00> : vector<8x384xf32>
    %478 = tpu.matmul %476, %477, %cst_207 {dimension_numbers = #tpu.dot_dimension_numbers<[1], [0], [0], [1], [0, 0, 1, 1], [], []>} : vector<8x128xf32>, vector<128x384xf32>, vector<8x384xf32> -> vector<8x384xf32>
    %c0_i32_208 = arith.constant 0 : i32
    %479 = arith.addi %c0_i32_208, %c3_i32_204 : i32
    %480 = arith.index_cast %479 : i32 to index
    %c0_209 = arith.constant 0 : index
    %c0_210 = arith.constant 0 : index
    %481 = vector.load %arg15[%480, %c0_209, %c0_210] : memref<16x8x384xf32, #tpu.memory_space<vmem>>, vector<1x8x384xf32>
    %482 = vector.shape_cast %481 : vector<1x8x384xf32> to vector<8x384xf32>
    %483 = vector.extract_strided_slice %482 {offsets = [0, 0], sizes = [8, 128], strides = [1, 1]} : vector<8x384xf32> to vector<8x128xf32>
    %484 = vector.extract_strided_slice %478 {offsets = [0, 0], sizes = [8, 128], strides = [1, 1]} : vector<8x384xf32> to vector<8x128xf32>
    %485 = arith.addf %483, %484 : vector<8x128xf32>
    %cst_211 = arith.constant 5.000000e-01 : f32
    %486 = vector.broadcast %cst_211 : f32 to vector<8x128xf32>
    %487 = arith.mulf %486, %485 : vector<8x128xf32>
    %488 = math.tanh %487 : vector<8x128xf32>
    %cst_212 = arith.constant 5.000000e-01 : f32
    %489 = vector.broadcast %cst_212 : f32 to vector<8x128xf32>
    %490 = arith.mulf %489, %488 : vector<8x128xf32>
    %cst_213 = arith.constant 5.000000e-01 : f32
    %491 = vector.broadcast %cst_213 : f32 to vector<8x128xf32>
    %492 = arith.addf %490, %491 : vector<8x128xf32>
    %493 = vector.extract_strided_slice %482 {offsets = [0, 128], sizes = [8, 128], strides = [1, 1]} : vector<8x384xf32> to vector<8x128xf32>
    %494 = vector.extract_strided_slice %478 {offsets = [0, 128], sizes = [8, 128], strides = [1, 1]} : vector<8x384xf32> to vector<8x128xf32>
    %495 = arith.addf %493, %494 : vector<8x128xf32>
    %cst_214 = arith.constant 5.000000e-01 : f32
    %496 = vector.broadcast %cst_214 : f32 to vector<8x128xf32>
    %497 = arith.mulf %496, %495 : vector<8x128xf32>
    %498 = math.tanh %497 : vector<8x128xf32>
    %cst_215 = arith.constant 5.000000e-01 : f32
    %499 = vector.broadcast %cst_215 : f32 to vector<8x128xf32>
    %500 = arith.mulf %499, %498 : vector<8x128xf32>
    %cst_216 = arith.constant 5.000000e-01 : f32
    %501 = vector.broadcast %cst_216 : f32 to vector<8x128xf32>
    %502 = arith.addf %500, %501 : vector<8x128xf32>
    %503 = vector.extract_strided_slice %482 {offsets = [0, 256], sizes = [8, 128], strides = [1, 1]} : vector<8x384xf32> to vector<8x128xf32>
    %504 = vector.extract_strided_slice %478 {offsets = [0, 256], sizes = [8, 128], strides = [1, 1]} : vector<8x384xf32> to vector<8x128xf32>
    %505 = arith.addf %504, %353 : vector<8x128xf32>
    %506 = arith.mulf %492, %505 : vector<8x128xf32>
    %507 = arith.addf %503, %506 : vector<8x128xf32>
    %508 = math.tanh %507 : vector<8x128xf32>
    %cst_217 = arith.constant 1.000000e+00 : f32
    %509 = vector.broadcast %cst_217 : f32 to vector<8x128xf32>
    %510 = arith.subf %509, %502 : vector<8x128xf32>
    %511 = arith.subf %508, %476 : vector<8x128xf32>
    %512 = arith.mulf %510, %511 : vector<8x128xf32>
    %513 = arith.addf %476, %512 : vector<8x128xf32>
    %c4_i32_218 = arith.constant 4 : i32
    %c0_219 = arith.constant 0 : index
    %c0_220 = arith.constant 0 : index
    %514 = vector.load %arg7[%c0_219, %c0_220] : memref<128x384xf32, #tpu.memory_space<vmem>>, vector<128x384xf32>
    %cst_221 = arith.constant dense<0.000000e+00> : vector<8x384xf32>
    %515 = tpu.matmul %513, %514, %cst_221 {dimension_numbers = #tpu.dot_dimension_numbers<[1], [0], [0], [1], [0, 0, 1, 1], [], []>} : vector<8x128xf32>, vector<128x384xf32>, vector<8x384xf32> -> vector<8x384xf32>
    %c0_i32_222 = arith.constant 0 : i32
    %516 = arith.addi %c0_i32_222, %c4_i32_218 : i32
    %517 = arith.index_cast %516 : i32 to index
    %c0_223 = arith.constant 0 : index
    %c0_224 = arith.constant 0 : index
    %518 = vector.load %arg15[%517, %c0_223, %c0_224] : memref<16x8x384xf32, #tpu.memory_space<vmem>>, vector<1x8x384xf32>
    %519 = vector.shape_cast %518 : vector<1x8x384xf32> to vector<8x384xf32>
    %520 = vector.extract_strided_slice %519 {offsets = [0, 0], sizes = [8, 128], strides = [1, 1]} : vector<8x384xf32> to vector<8x128xf32>
    %521 = vector.extract_strided_slice %515 {offsets = [0, 0], sizes = [8, 128], strides = [1, 1]} : vector<8x384xf32> to vector<8x128xf32>
    %522 = arith.addf %520, %521 : vector<8x128xf32>
    %cst_225 = arith.constant 5.000000e-01 : f32
    %523 = vector.broadcast %cst_225 : f32 to vector<8x128xf32>
    %524 = arith.mulf %523, %522 : vector<8x128xf32>
    %525 = math.tanh %524 : vector<8x128xf32>
    %cst_226 = arith.constant 5.000000e-01 : f32
    %526 = vector.broadcast %cst_226 : f32 to vector<8x128xf32>
    %527 = arith.mulf %526, %525 : vector<8x128xf32>
    %cst_227 = arith.constant 5.000000e-01 : f32
    %528 = vector.broadcast %cst_227 : f32 to vector<8x128xf32>
    %529 = arith.addf %527, %528 : vector<8x128xf32>
    %530 = vector.extract_strided_slice %519 {offsets = [0, 128], sizes = [8, 128], strides = [1, 1]} : vector<8x384xf32> to vector<8x128xf32>
    %531 = vector.extract_strided_slice %515 {offsets = [0, 128], sizes = [8, 128], strides = [1, 1]} : vector<8x384xf32> to vector<8x128xf32>
    %532 = arith.addf %530, %531 : vector<8x128xf32>
    %cst_228 = arith.constant 5.000000e-01 : f32
    %533 = vector.broadcast %cst_228 : f32 to vector<8x128xf32>
    %534 = arith.mulf %533, %532 : vector<8x128xf32>
    %535 = math.tanh %534 : vector<8x128xf32>
    %cst_229 = arith.constant 5.000000e-01 : f32
    %536 = vector.broadcast %cst_229 : f32 to vector<8x128xf32>
    %537 = arith.mulf %536, %535 : vector<8x128xf32>
    %cst_230 = arith.constant 5.000000e-01 : f32
    %538 = vector.broadcast %cst_230 : f32 to vector<8x128xf32>
    %539 = arith.addf %537, %538 : vector<8x128xf32>
    %540 = vector.extract_strided_slice %519 {offsets = [0, 256], sizes = [8, 128], strides = [1, 1]} : vector<8x384xf32> to vector<8x128xf32>
    %541 = vector.extract_strided_slice %515 {offsets = [0, 256], sizes = [8, 128], strides = [1, 1]} : vector<8x384xf32> to vector<8x128xf32>
    %542 = arith.addf %541, %353 : vector<8x128xf32>
    %543 = arith.mulf %529, %542 : vector<8x128xf32>
    %544 = arith.addf %540, %543 : vector<8x128xf32>
    %545 = math.tanh %544 : vector<8x128xf32>
    %cst_231 = arith.constant 1.000000e+00 : f32
    %546 = vector.broadcast %cst_231 : f32 to vector<8x128xf32>
    %547 = arith.subf %546, %539 : vector<8x128xf32>
    %548 = arith.subf %545, %513 : vector<8x128xf32>
    %549 = arith.mulf %547, %548 : vector<8x128xf32>
    %550 = arith.addf %513, %549 : vector<8x128xf32>
    %c5_i32_232 = arith.constant 5 : i32
    %c0_233 = arith.constant 0 : index
    %c0_234 = arith.constant 0 : index
    %551 = vector.load %arg7[%c0_233, %c0_234] : memref<128x384xf32, #tpu.memory_space<vmem>>, vector<128x384xf32>
    %cst_235 = arith.constant dense<0.000000e+00> : vector<8x384xf32>
    %552 = tpu.matmul %550, %551, %cst_235 {dimension_numbers = #tpu.dot_dimension_numbers<[1], [0], [0], [1], [0, 0, 1, 1], [], []>} : vector<8x128xf32>, vector<128x384xf32>, vector<8x384xf32> -> vector<8x384xf32>
    %c0_i32_236 = arith.constant 0 : i32
    %553 = arith.addi %c0_i32_236, %c5_i32_232 : i32
    %554 = arith.index_cast %553 : i32 to index
    %c0_237 = arith.constant 0 : index
    %c0_238 = arith.constant 0 : index
    %555 = vector.load %arg15[%554, %c0_237, %c0_238] : memref<16x8x384xf32, #tpu.memory_space<vmem>>, vector<1x8x384xf32>
    %556 = vector.shape_cast %555 : vector<1x8x384xf32> to vector<8x384xf32>
    %557 = vector.extract_strided_slice %556 {offsets = [0, 0], sizes = [8, 128], strides = [1, 1]} : vector<8x384xf32> to vector<8x128xf32>
    %558 = vector.extract_strided_slice %552 {offsets = [0, 0], sizes = [8, 128], strides = [1, 1]} : vector<8x384xf32> to vector<8x128xf32>
    %559 = arith.addf %557, %558 : vector<8x128xf32>
    %cst_239 = arith.constant 5.000000e-01 : f32
    %560 = vector.broadcast %cst_239 : f32 to vector<8x128xf32>
    %561 = arith.mulf %560, %559 : vector<8x128xf32>
    %562 = math.tanh %561 : vector<8x128xf32>
    %cst_240 = arith.constant 5.000000e-01 : f32
    %563 = vector.broadcast %cst_240 : f32 to vector<8x128xf32>
    %564 = arith.mulf %563, %562 : vector<8x128xf32>
    %cst_241 = arith.constant 5.000000e-01 : f32
    %565 = vector.broadcast %cst_241 : f32 to vector<8x128xf32>
    %566 = arith.addf %564, %565 : vector<8x128xf32>
    %567 = vector.extract_strided_slice %556 {offsets = [0, 128], sizes = [8, 128], strides = [1, 1]} : vector<8x384xf32> to vector<8x128xf32>
    %568 = vector.extract_strided_slice %552 {offsets = [0, 128], sizes = [8, 128], strides = [1, 1]} : vector<8x384xf32> to vector<8x128xf32>
    %569 = arith.addf %567, %568 : vector<8x128xf32>
    %cst_242 = arith.constant 5.000000e-01 : f32
    %570 = vector.broadcast %cst_242 : f32 to vector<8x128xf32>
    %571 = arith.mulf %570, %569 : vector<8x128xf32>
    %572 = math.tanh %571 : vector<8x128xf32>
    %cst_243 = arith.constant 5.000000e-01 : f32
    %573 = vector.broadcast %cst_243 : f32 to vector<8x128xf32>
    %574 = arith.mulf %573, %572 : vector<8x128xf32>
    %cst_244 = arith.constant 5.000000e-01 : f32
    %575 = vector.broadcast %cst_244 : f32 to vector<8x128xf32>
    %576 = arith.addf %574, %575 : vector<8x128xf32>
    %577 = vector.extract_strided_slice %556 {offsets = [0, 256], sizes = [8, 128], strides = [1, 1]} : vector<8x384xf32> to vector<8x128xf32>
    %578 = vector.extract_strided_slice %552 {offsets = [0, 256], sizes = [8, 128], strides = [1, 1]} : vector<8x384xf32> to vector<8x128xf32>
    %579 = arith.addf %578, %353 : vector<8x128xf32>
    %580 = arith.mulf %566, %579 : vector<8x128xf32>
    %581 = arith.addf %577, %580 : vector<8x128xf32>
    %582 = math.tanh %581 : vector<8x128xf32>
    %cst_245 = arith.constant 1.000000e+00 : f32
    %583 = vector.broadcast %cst_245 : f32 to vector<8x128xf32>
    %584 = arith.subf %583, %576 : vector<8x128xf32>
    %585 = arith.subf %582, %550 : vector<8x128xf32>
    %586 = arith.mulf %584, %585 : vector<8x128xf32>
    %587 = arith.addf %550, %586 : vector<8x128xf32>
    %c6_i32_246 = arith.constant 6 : i32
    %c0_247 = arith.constant 0 : index
    %c0_248 = arith.constant 0 : index
    %588 = vector.load %arg7[%c0_247, %c0_248] : memref<128x384xf32, #tpu.memory_space<vmem>>, vector<128x384xf32>
    %cst_249 = arith.constant dense<0.000000e+00> : vector<8x384xf32>
    %589 = tpu.matmul %587, %588, %cst_249 {dimension_numbers = #tpu.dot_dimension_numbers<[1], [0], [0], [1], [0, 0, 1, 1], [], []>} : vector<8x128xf32>, vector<128x384xf32>, vector<8x384xf32> -> vector<8x384xf32>
    %c0_i32_250 = arith.constant 0 : i32
    %590 = arith.addi %c0_i32_250, %c6_i32_246 : i32
    %591 = arith.index_cast %590 : i32 to index
    %c0_251 = arith.constant 0 : index
    %c0_252 = arith.constant 0 : index
    %592 = vector.load %arg15[%591, %c0_251, %c0_252] : memref<16x8x384xf32, #tpu.memory_space<vmem>>, vector<1x8x384xf32>
    %593 = vector.shape_cast %592 : vector<1x8x384xf32> to vector<8x384xf32>
    %594 = vector.extract_strided_slice %593 {offsets = [0, 0], sizes = [8, 128], strides = [1, 1]} : vector<8x384xf32> to vector<8x128xf32>
    %595 = vector.extract_strided_slice %589 {offsets = [0, 0], sizes = [8, 128], strides = [1, 1]} : vector<8x384xf32> to vector<8x128xf32>
    %596 = arith.addf %594, %595 : vector<8x128xf32>
    %cst_253 = arith.constant 5.000000e-01 : f32
    %597 = vector.broadcast %cst_253 : f32 to vector<8x128xf32>
    %598 = arith.mulf %597, %596 : vector<8x128xf32>
    %599 = math.tanh %598 : vector<8x128xf32>
    %cst_254 = arith.constant 5.000000e-01 : f32
    %600 = vector.broadcast %cst_254 : f32 to vector<8x128xf32>
    %601 = arith.mulf %600, %599 : vector<8x128xf32>
    %cst_255 = arith.constant 5.000000e-01 : f32
    %602 = vector.broadcast %cst_255 : f32 to vector<8x128xf32>
    %603 = arith.addf %601, %602 : vector<8x128xf32>
    %604 = vector.extract_strided_slice %593 {offsets = [0, 128], sizes = [8, 128], strides = [1, 1]} : vector<8x384xf32> to vector<8x128xf32>
    %605 = vector.extract_strided_slice %589 {offsets = [0, 128], sizes = [8, 128], strides = [1, 1]} : vector<8x384xf32> to vector<8x128xf32>
    %606 = arith.addf %604, %605 : vector<8x128xf32>
    %cst_256 = arith.constant 5.000000e-01 : f32
    %607 = vector.broadcast %cst_256 : f32 to vector<8x128xf32>
    %608 = arith.mulf %607, %606 : vector<8x128xf32>
    %609 = math.tanh %608 : vector<8x128xf32>
    %cst_257 = arith.constant 5.000000e-01 : f32
    %610 = vector.broadcast %cst_257 : f32 to vector<8x128xf32>
    %611 = arith.mulf %610, %609 : vector<8x128xf32>
    %cst_258 = arith.constant 5.000000e-01 : f32
    %612 = vector.broadcast %cst_258 : f32 to vector<8x128xf32>
    %613 = arith.addf %611, %612 : vector<8x128xf32>
    %614 = vector.extract_strided_slice %593 {offsets = [0, 256], sizes = [8, 128], strides = [1, 1]} : vector<8x384xf32> to vector<8x128xf32>
    %615 = vector.extract_strided_slice %589 {offsets = [0, 256], sizes = [8, 128], strides = [1, 1]} : vector<8x384xf32> to vector<8x128xf32>
    %616 = arith.addf %615, %353 : vector<8x128xf32>
    %617 = arith.mulf %603, %616 : vector<8x128xf32>
    %618 = arith.addf %614, %617 : vector<8x128xf32>
    %619 = math.tanh %618 : vector<8x128xf32>
    %cst_259 = arith.constant 1.000000e+00 : f32
    %620 = vector.broadcast %cst_259 : f32 to vector<8x128xf32>
    %621 = arith.subf %620, %613 : vector<8x128xf32>
    %622 = arith.subf %619, %587 : vector<8x128xf32>
    %623 = arith.mulf %621, %622 : vector<8x128xf32>
    %624 = arith.addf %587, %623 : vector<8x128xf32>
    %c7_i32_260 = arith.constant 7 : i32
    %c0_261 = arith.constant 0 : index
    %c0_262 = arith.constant 0 : index
    %625 = vector.load %arg7[%c0_261, %c0_262] : memref<128x384xf32, #tpu.memory_space<vmem>>, vector<128x384xf32>
    %cst_263 = arith.constant dense<0.000000e+00> : vector<8x384xf32>
    %626 = tpu.matmul %624, %625, %cst_263 {dimension_numbers = #tpu.dot_dimension_numbers<[1], [0], [0], [1], [0, 0, 1, 1], [], []>} : vector<8x128xf32>, vector<128x384xf32>, vector<8x384xf32> -> vector<8x384xf32>
    %c0_i32_264 = arith.constant 0 : i32
    %627 = arith.addi %c0_i32_264, %c7_i32_260 : i32
    %628 = arith.index_cast %627 : i32 to index
    %c0_265 = arith.constant 0 : index
    %c0_266 = arith.constant 0 : index
    %629 = vector.load %arg15[%628, %c0_265, %c0_266] : memref<16x8x384xf32, #tpu.memory_space<vmem>>, vector<1x8x384xf32>
    %630 = vector.shape_cast %629 : vector<1x8x384xf32> to vector<8x384xf32>
    %631 = vector.extract_strided_slice %630 {offsets = [0, 0], sizes = [8, 128], strides = [1, 1]} : vector<8x384xf32> to vector<8x128xf32>
    %632 = vector.extract_strided_slice %626 {offsets = [0, 0], sizes = [8, 128], strides = [1, 1]} : vector<8x384xf32> to vector<8x128xf32>
    %633 = arith.addf %631, %632 : vector<8x128xf32>
    %cst_267 = arith.constant 5.000000e-01 : f32
    %634 = vector.broadcast %cst_267 : f32 to vector<8x128xf32>
    %635 = arith.mulf %634, %633 : vector<8x128xf32>
    %636 = math.tanh %635 : vector<8x128xf32>
    %cst_268 = arith.constant 5.000000e-01 : f32
    %637 = vector.broadcast %cst_268 : f32 to vector<8x128xf32>
    %638 = arith.mulf %637, %636 : vector<8x128xf32>
    %cst_269 = arith.constant 5.000000e-01 : f32
    %639 = vector.broadcast %cst_269 : f32 to vector<8x128xf32>
    %640 = arith.addf %638, %639 : vector<8x128xf32>
    %641 = vector.extract_strided_slice %630 {offsets = [0, 128], sizes = [8, 128], strides = [1, 1]} : vector<8x384xf32> to vector<8x128xf32>
    %642 = vector.extract_strided_slice %626 {offsets = [0, 128], sizes = [8, 128], strides = [1, 1]} : vector<8x384xf32> to vector<8x128xf32>
    %643 = arith.addf %641, %642 : vector<8x128xf32>
    %cst_270 = arith.constant 5.000000e-01 : f32
    %644 = vector.broadcast %cst_270 : f32 to vector<8x128xf32>
    %645 = arith.mulf %644, %643 : vector<8x128xf32>
    %646 = math.tanh %645 : vector<8x128xf32>
    %cst_271 = arith.constant 5.000000e-01 : f32
    %647 = vector.broadcast %cst_271 : f32 to vector<8x128xf32>
    %648 = arith.mulf %647, %646 : vector<8x128xf32>
    %cst_272 = arith.constant 5.000000e-01 : f32
    %649 = vector.broadcast %cst_272 : f32 to vector<8x128xf32>
    %650 = arith.addf %648, %649 : vector<8x128xf32>
    %651 = vector.extract_strided_slice %630 {offsets = [0, 256], sizes = [8, 128], strides = [1, 1]} : vector<8x384xf32> to vector<8x128xf32>
    %652 = vector.extract_strided_slice %626 {offsets = [0, 256], sizes = [8, 128], strides = [1, 1]} : vector<8x384xf32> to vector<8x128xf32>
    %653 = arith.addf %652, %353 : vector<8x128xf32>
    %654 = arith.mulf %640, %653 : vector<8x128xf32>
    %655 = arith.addf %651, %654 : vector<8x128xf32>
    %656 = math.tanh %655 : vector<8x128xf32>
    %cst_273 = arith.constant 1.000000e+00 : f32
    %657 = vector.broadcast %cst_273 : f32 to vector<8x128xf32>
    %658 = arith.subf %657, %650 : vector<8x128xf32>
    %659 = arith.subf %656, %624 : vector<8x128xf32>
    %660 = arith.mulf %658, %659 : vector<8x128xf32>
    %661 = arith.addf %624, %660 : vector<8x128xf32>
    %c8_i32_274 = arith.constant 8 : i32
    %c0_275 = arith.constant 0 : index
    %c0_276 = arith.constant 0 : index
    %662 = vector.load %arg10[%c0_275, %c0_276] : memref<128x128xf32, #tpu.memory_space<vmem>>, vector<128x128xf32>
    %cst_277 = arith.constant dense<0.000000e+00> : vector<8x128xf32>
    %663 = tpu.matmul %661, %662, %cst_277 {dimension_numbers = #tpu.dot_dimension_numbers<[1], [0], [0], [1], [0, 0, 1, 1], [], []>} : vector<8x128xf32>, vector<128x128xf32>, vector<8x128xf32> -> vector<8x128xf32>
    %c0_278 = arith.constant 0 : index
    %c0_279 = arith.constant 0 : index
    %664 = vector.load %arg11[%c0_278, %c0_279] : memref<1x128xf32, #tpu.memory_space<vmem>>, vector<1x128xf32>
    %665 = vector.broadcast %664 : vector<1x128xf32> to vector<8x128xf32>
    %666 = arith.addf %663, %665 : vector<8x128xf32>
    %cst_280 = arith.constant 0.000000e+00 : f32
    %667 = vector.broadcast %cst_280 : f32 to vector<8x128xf32>
    %668 = arith.maximumf %666, %667 : vector<8x128xf32>
    %c0_281 = arith.constant 0 : index
    %c0_282 = arith.constant 0 : index
    %669 = vector.load %arg12[%c0_281, %c0_282] : memref<128x128xf32, #tpu.memory_space<vmem>>, vector<128x128xf32>
    %cst_283 = arith.constant dense<0.000000e+00> : vector<8x128xf32>
    %670 = tpu.matmul %668, %669, %cst_283 {dimension_numbers = #tpu.dot_dimension_numbers<[1], [0], [0], [1], [0, 0, 1, 1], [], []>} : vector<8x128xf32>, vector<128x128xf32>, vector<8x128xf32> -> vector<8x128xf32>
    %c0_284 = arith.constant 0 : index
    %c0_285 = arith.constant 0 : index
    %671 = vector.load %arg13[%c0_284, %c0_285] : memref<1x128xf32, #tpu.memory_space<vmem>>, vector<1x128xf32>
    %672 = vector.broadcast %671 : vector<1x128xf32> to vector<8x128xf32>
    %673 = arith.addf %670, %672 : vector<8x128xf32>
    %c0_286 = arith.constant 0 : index
    %c0_287 = arith.constant 0 : index
    %674 = vector.load %arg14[%c0_286, %c0_287] : memref<8x128xf32, #tpu.memory_space<vmem>>, vector<8x128xf32>
    tpu.vector_store %arg14[%c0_286, %c0_287], %673 {strides = array<i32>} : memref<8x128xf32, #tpu.memory_space<vmem>>, vector<8x128xf32>,
    return
  }
  func.func @transform_0(%arg0: i32) -> (i32, i32, i32) {
    %c0_i32 = arith.constant 0 : i32
    %c0_i32_0 = arith.constant 0 : i32
    %c0_i32_1 = arith.constant 0 : i32
    return %c0_i32, %arg0, %c0_i32_0 : i32, i32, i32
  }
  func.func @transform_1(%arg0: i32) -> (i32, i32) {
    %c0_i32 = arith.constant 0 : i32
    %c0_i32_0 = arith.constant 0 : i32
    %c0_i32_1 = arith.constant 0 : i32
    return %c0_i32, %c0_i32_0 : i32, i32
  }
  func.func @transform_2(%arg0: i32) -> (i32, i32) {
    %c0_i32 = arith.constant 0 : i32
    %c0_i32_0 = arith.constant 0 : i32
    %c0_i32_1 = arith.constant 0 : i32
    return %c0_i32, %c0_i32_0 : i32, i32
  }
  func.func @transform_3(%arg0: i32) -> (i32, i32) {
    %c0_i32 = arith.constant 0 : i32
    %c0_i32_0 = arith.constant 0 : i32
    %c0_i32_1 = arith.constant 0 : i32
    return %c0_i32, %c0_i32_0 : i32, i32
  }
  func.func @transform_4(%arg0: i32) -> (i32, i32) {
    %c0_i32 = arith.constant 0 : i32
    %c0_i32_0 = arith.constant 0 : i32
    %c0_i32_1 = arith.constant 0 : i32
    return %c0_i32, %c0_i32_0 : i32, i32
  }
  func.func @transform_5(%arg0: i32) -> (i32, i32) {
    %c0_i32 = arith.constant 0 : i32
    %c0_i32_0 = arith.constant 0 : i32
    %c0_i32_1 = arith.constant 0 : i32
    return %c0_i32, %c0_i32_0 : i32, i32
  }
  func.func @transform_6(%arg0: i32) -> (i32, i32) {
    %c0_i32 = arith.constant 0 : i32
    %c0_i32_0 = arith.constant 0 : i32
    %c0_i32_1 = arith.constant 0 : i32
    return %c0_i32, %c0_i32_0 : i32, i32
  }
  func.func @transform_7(%arg0: i32) -> (i32, i32) {
    %c0_i32 = arith.constant 0 : i32
    %c0_i32_0 = arith.constant 0 : i32
    %c0_i32_1 = arith.constant 0 : i32
    return %c0_i32, %c0_i32_0 : i32, i32
  }
  func.func @transform_8(%arg0: i32) -> (i32, i32) {
    %c0_i32 = arith.constant 0 : i32
    %c0_i32_0 = arith.constant 0 : i32
    %c0_i32_1 = arith.constant 0 : i32
    return %c0_i32, %c0_i32_0 : i32, i32
  }
  func.func @transform_9(%arg0: i32) -> (i32, i32) {
    %c0_i32 = arith.constant 0 : i32
    %c0_i32_0 = arith.constant 0 : i32
    %c0_i32_1 = arith.constant 0 : i32
    return %c0_i32, %c0_i32_0 : i32, i32
  }
  func.func @transform_10(%arg0: i32) -> (i32, i32) {
    %c0_i32 = arith.constant 0 : i32
    %c0_i32_0 = arith.constant 0 : i32
    %c0_i32_1 = arith.constant 0 : i32
    return %c0_i32, %c0_i32_0 : i32, i32
  }
  func.func @transform_11(%arg0: i32) -> (i32, i32) {
    %c0_i32 = arith.constant 0 : i32
    %c0_i32_0 = arith.constant 0 : i32
    %c0_i32_1 = arith.constant 0 : i32
    return %c0_i32, %c0_i32_0 : i32, i32
  }
  func.func @transform_12(%arg0: i32) -> (i32, i32) {
    %c0_i32 = arith.constant 0 : i32
    %c0_i32_0 = arith.constant 0 : i32
    %c0_i32_1 = arith.constant 0 : i32
    return %c0_i32, %c0_i32_0 : i32, i32
  }
  func.func @transform_13(%arg0: i32) -> (i32, i32) {
    %c0_i32 = arith.constant 0 : i32
    %c0_i32_0 = arith.constant 0 : i32
    return %arg0, %c0_i32 : i32, i32
  }
}

</mosaic_0001>

<bundles_post_ra>
// kernel: tpu_custom_call.1
= control target key start
LH: loop header
LB: loop body
LE: loop exit
PB: predicated region body
PF: predicated region fallthrough
CT: control target
= control target key end

     0   :  { %18 = vsyncpa [#allocation5], 0  ;;  %s4380_s0 = inlined_call_operand.hbm [shape: f32[8,8,128], index: 0, kind: input, shape index: {}]   ;;  %s4381_s1 = inlined_call_operand.hbm [shape: f32[128,384], index: 1, kind: input, shape index: {}]   ;;  %s4382_s2 = inlined_call_operand.hbm [shape: f32[128,384], index: 2, kind: input, shape index: {}]   ;;  %s4383_s3 = inlined_call_operand.hbm [shape: f32[1,384], index: 3, kind: input, shape index: {}]   ;;  %s4384_s4 = inlined_call_operand.vmem [shape: f32[1,128], index: 4, kind: input, shape index: {}]   ;;  %s4385_s5 = inlined_call_operand.hbm [shape: f32[128,384], index: 5, kind: input, shape index: {}]   ;;  %s4386_s6 = inlined_call_operand.hbm [shape: f32[128,384], index: 6, kind: input, shape index: {}]   ;;  %s4387_s7 = inlined_call_operand.vmem [shape: f32[1,384], index: 7, kind: input, shape index: {}]   ;;  %s4388_s8 = inlined_call_operand.vmem [shape: f32[1,128], index: 8, kind: input, shape index: {}]   ;;  %s4389_s9 = inlined_call_operand.hbm [shape: f32[128,128], index: 9, kind: input, shape index: {}]   ;;  %s4390_s10 = inlined_call_operand.vmem [shape: f32[1,128], index: 10, kind: input, shape index: {}]   ;;  %s4391_s11 = inlined_call_operand.hbm [shape: f32[128,128], index: 11, kind: input, shape index: {}]   ;;  %s4392_s12 = inlined_call_operand.vmem [shape: f32[1,128], index: 12, kind: input, shape index: {}]   ;;  %s4393_s13 = inlined_call_operand.hbm [shape: f32[8,128], index: 13, kind: output, shape index: {}]  }
   0x1   :  { %19 = vsyncpa [#allocation8], 0 }
   0x2   :  { %20 = vsyncpa [#allocation11], 0 }
   0x3   :  { %21 = vsyncpa [#allocation14], 0 }
   0x4   :  { %22 = vsyncpa [#allocation17], 0  ;;  %s41_s27 = sshll.u32 %s4381_s1, 4  ;;  %s42_s27 = int_to_ptr.hbm [resolvable:$true] %s41_s27 }
   0x5   :  { %23 = vsyncpa [#allocation6], 0  ;;  %s2829_s28 = smov [#allocation7]   ;;  %s68_s15 = sshll.u32 %s4383_s3, 4  ;;  %s69_s15 = int_to_ptr.hbm [resolvable:$true] %s68_s15 }
   0x6   :  { %s43_s29 = sshll.u32 %s2829_s28, 4  ;;  %s2830_s16 = smov 384   ;;  %s44_s29 = int_to_ptr.vmem [resolvable:$true] %s43_s29 }
   0x7   :  { %s2831_s17 = smov 24   ;;  %s2832_s18 = smov [#allocation10]  }
   0x8   :  { %49 = dma.hbm_to_vmem [thread:$0]  %s42_s27, 6144, %s44_s29, [#allocation8], %s2830_s16, %s2830_s16, %s2831_s17  }
   0x9   :  { %s70_s19 = sshll.u32 %s2832_s18, 4  ;;  %s93_s21 = sshll.u32 %s4386_s6, 4  ;;  %s71_s19 = int_to_ptr.vmem [resolvable:$true] %s70_s19  ;;  %s94_s21 = int_to_ptr.hbm [resolvable:$true] %s93_s21 }
   0xa   :  { %73 = dma.hbm_to_vmem [thread:$0]  %s69_s15, 48, %s71_s19, [#allocation11]  }
   0xb   :  { %s28_s3 = sshll.u32 %s4380_s0, 4  ;;  %s2833_s24 = smov [#allocation13]   ;;  %s29_s3 = int_to_ptr.hbm [resolvable:$true] %s28_s3 }
   0xc   :  { %s95_s25 = sshll.u32 %s2833_s24, 4  ;;  %s2834_s26 = smov [#allocation4]   ;;  %s96_s25 = int_to_ptr.vmem [resolvable:$true] %s95_s25 }
   0xd   :  { %101 = dma.hbm_to_vmem [thread:$0]  %s94_s21, 6144, %s96_s25, [#allocation14], %s2830_s16, %s2830_s16, %s2831_s17  }
   0xe   :  { %s30_s27 = sshll.u32 %s2834_s26, 4  ;;  %s2835_s28 = smov 128   ;;  %s31_s27 = int_to_ptr.vmem [resolvable:$true] %s30_s27 }
   0xf   :  { %s2836_s6 = smov 8   ;;  %s54_s14 = sshll.u32 %s4382_s2, 4  ;;  %s55_s14 = int_to_ptr.hbm [resolvable:$true] %s54_s14 }
  0x10   :  { %36 = dma.hbm_to_vmem [thread:$0]  %s29_s3, 1024, %s31_s27, [#allocation5], %s2835_s28, %s2835_s28, %s2836_s6  }
  0x11   :  { %s2837_s0 = smov [#allocation9]   ;;  %s80_s20 = sshll.u32 %s4385_s5, 4  ;;  %s81_s20 = int_to_ptr.hbm [resolvable:$true] %s80_s20 }
  0x12   :  { %s56_s15 = sshll.u32 %s2837_s0, 4  ;;  %s2838_s1 = smov [#allocation12]   ;;  %s57_s15 = int_to_ptr.vmem [resolvable:$true] %s56_s15 }
  0x13   :  { %62 = dma.hbm_to_vmem [thread:$0]  %s55_s14, 6144, %s57_s15, [#allocation8], %s2830_s16, %s2830_s16, %s2831_s17  }
  0x14   :  { %s82_s21 = sshll.u32 %s2838_s1, 4  ;;  %s110_s3 = sshll.u32 %s4389_s9, 4  ;;  %s83_s21 = int_to_ptr.vmem [resolvable:$true] %s82_s21  ;;  %s111_s3 = int_to_ptr.hbm [resolvable:$true] %s110_s3 }
  0x15   :  { %88 = dma.hbm_to_vmem [thread:$0]  %s81_s20, 6144, %s83_s21, [#allocation11], %s2830_s16, %s2830_s16, %s2831_s17  }
  0x16   :  { %s125_s5 = sshll.u32 %s4391_s11, 4  ;;  %s2839_s25 = smov [#allocation15]   ;;  %s126_s5 = int_to_ptr.hbm [resolvable:$true] %s125_s5 }
  0x17   :  { %s112_s26 = sshll.u32 %s2839_s25, 4  ;;  %s2840_s27 = smov [#allocation16]   ;;  %s113_s26 = int_to_ptr.vmem [resolvable:$true] %s112_s26 }
  0x18   :  { %118 = dma.hbm_to_vmem [thread:$0]  %s111_s3, 2048, %s113_s26, [#allocation14], %s2835_s28, %s2835_s28, %s2836_s6  }
  0x19   :  { %s127_s29 = sshll.u32 %s2840_s27, 4  ;;  %s128_s29 = int_to_ptr.vmem [resolvable:$true] %s127_s29 }
  0x1a   :  { %133 = dma.hbm_to_vmem [thread:$0]  %s126_s5, 2048, %s128_s29, [#allocation17], %s2835_s28, %s2835_s28, %s2836_s6  }
  0x1b   :  { %2817 = dma.done.wait [#allocation5], 1024  }
  0x1c   :  { %2818 = vsyncadd [#allocation5], 4294966272 }
  0x1d   :  { %2819 = dma.done.wait [#allocation8], 12288  }
  0x1e   :  { %2820 = vsyncadd [#allocation8], 4294955008 }
  0x1f   :  { %2821 = dma.done.wait [#allocation11], 6192  }
  0x20   :  { %2822 = vsyncadd [#allocation11], 4294961104 }
  0x21   :  { %2823 = dma.done.wait [#allocation14], 8192  }
  0x22   :  { %2824 = vsyncadd [#allocation14], 4294959104 }
  0x23   :  { %2825 = dma.done.wait [#allocation17], 2048  }
  0x24   :  { %2826 = vsyncadd [#allocation17], 4294965248  ;;  %v225_v0 = vld [vmem:[#allocation7 + $0x168] sm:$0xff]  ;;  %v222_v2 = vld [vmem:[#allocation7 + $0x150] sm:$0xff]  ;;  %v4394_v41 = vmov 0.0   ;;  %s2842_s15 = smov [#allocation18]  }
  0x25   :  { %v2949_v1 = vld [vmem:[#allocation9 + $0x168] sm:$0xff]  ;;  %236 = vmatpush.msra.mxu0 %v225_v0  ;;  %v2952_v3 = vld [vmem:[#allocation9 + $0x150] sm:$0xff]  ;;  %v219_v4 = vld [vmem:[#allocation7 + $0x138] sm:$0xff]  ;;  %s2433_s18 = sshll.u32 %s2842_s15, 4  ;;  %s2435_s1 = sshll.u32 %s4393_s13, 4  ;;  %s2434_s18 = int_to_ptr.vmem [resolvable:$true] %s2433_s18  ;;  %s2436_s1 = int_to_ptr.hbm [resolvable:$true] %s2435_s1 }
  0x26   :  { %431 = vmatpush.msra.mxu3 %v2949_v1  ;;  %v2954_v5 = vld [vmem:[#allocation9 + $0x138] sm:$0xff]  ;;  %v216_v6 = vld [vmem:[#allocation7 + $0x120] sm:$0xff]  ;;  %v213_v8 = vld [vmem:[#allocation7 + $0x108] sm:$0xff] }
  0x27   :  { %237 = vmatpush.msra.mxu0 %v222_v2  ;;  %v2957_v7 = vld [vmem:[#allocation9 + $0x120] sm:$0xff]  ;;  %v2960_v9 = vld [vmem:[#allocation9 + $0x108] sm:$0xff]  ;;  %v210_v10 = vld [vmem:[#allocation7 + $0xf0] sm:$0xff] }
  0x28   :  { %432 = vmatpush.msra.mxu3 %v2952_v3  ;;  %v2963_v11 = vld [vmem:[#allocation9 + $0xf0] sm:$0xff]  ;;  %v207_v12 = vld [vmem:[#allocation7 + $0xd8] sm:$0xff]  ;;  %v204_v14 = vld [vmem:[#allocation7 + $0xc0] sm:$0xff] }
  0x29   :  { %238 = vmatpush.msra.mxu0 %v219_v4  ;;  %v2966_v13 = vld [vmem:[#allocation9 + $0xd8] sm:$0xff]  ;;  %v2969_v15 = vld [vmem:[#allocation9 + $0xc0] sm:$0xff]  ;;  %v201_v16 = vld [vmem:[#allocation7 + $0xa8] sm:$0xff] }
  0x2a   :  { %433 = vmatpush.msra.mxu3 %v2954_v5  ;;  %v2972_v17 = vld [vmem:[#allocation9 + $0xa8] sm:$0xff]  ;;  %v198_v18 = vld [vmem:[#allocation7 + $0x90] sm:$0xff]  ;;  %v195_v20 = vld [vmem:[#allocation7 + $0x78] sm:$0xff] }
  0x2b   :  { %239 = vmatpush.msra.mxu0 %v216_v6  ;;  %v2975_v19 = vld [vmem:[#allocation9 + $0x90] sm:$0xff]  ;;  %v2978_v21 = vld [vmem:[#allocation9 + $0x78] sm:$0xff]  ;;  %v192_v22 = vld [vmem:[#allocation7 + $0x60] sm:$0xff] }
  0x2c   :  { %434 = vmatpush.msra.mxu3 %v2957_v7  ;;  %v2981_v23 = vld [vmem:[#allocation9 + $0x60] sm:$0xff]  ;;  %v189_v24 = vld [vmem:[#allocation7 + $0x48] sm:$0xff]  ;;  %v186_v26 = vld [vmem:[#allocation7 + $0x30] sm:$0xff] }
  0x2d   :  { %240 = vmatpush.msra.mxu0 %v213_v8  ;;  %v2984_v25 = vld [vmem:[#allocation9 + $0x48] sm:$0xff]  ;;  %v2987_v27 = vld [vmem:[#allocation9 + $0x30] sm:$0xff]  ;;  %v223_v29 = vld [vmem:[#allocation7 + $0x158] sm:$0xff] }
  0x2e   :  { %435 = vmatpush.msra.mxu3 %v2960_v9  ;;  %v226_v28 = vld [vmem:[#allocation7 + $0x170] sm:$0xff]  ;;  %v183_v30 = vld [vmem:[#allocation7 + $0x18] sm:$0xff]  ;;  %v220_v33 = vld [vmem:[#allocation7 + $0x140] sm:$0xff] }
  0x2f   :  { %241 = vmatpush.msra.mxu0 %v210_v10  ;;  %v2990_v31 = vld [vmem:[#allocation9 + $0x18] sm:$0xff]  ;;  %277 = vmatpush.msra.mxu1 %v226_v28  ;;  %v224_v34 = vld [vmem:[#allocation7 + $0x160] sm:$0xff]  ;;  %v3000_v39 = vld [vmem:[#allocation9 + $0x170] sm:$0xff] }
  0x30   :  { %436 = vmatpush.msra.mxu3 %v2963_v11  ;;  %v227_v32 = vld [vmem:[#allocation7 + $0x178] sm:$0xff]  ;;  %v180_v35 = vld [vmem:[#allocation7] sm:$0xff]  ;;  %v217_v43 = vld [vmem:[#allocation7 + $0x128] sm:$0xff] }
  0x31   :  { %242 = vmatpush.msra.mxu0 %v207_v12  ;;  %v2993_v36 = vld [vmem:[#allocation9] sm:$0xff]  ;;  %278 = vmatpush.msra.mxu1 %v223_v29  ;;  %v2998_v38 = vld [vmem:[#allocation9 + $0x178] sm:$0xff]  ;;  %v221_v44 = vld [vmem:[#allocation7 + $0x148] sm:$0xff] }
  0x32   :  { %437 = vmatpush.msra.mxu3 %v2966_v13  ;;  %318 = vmatpush.msra.mxu2 %v227_v32  ;;  %v2996_v37 = vld [vmem:[#allocation4] sm:$0xff]  ;;  %v3007_v42 = vld [vmem:[#allocation9 + $0x158] sm:$0xff]  ;;  %v214_v45 = vld [vmem:[#allocation7 + $0x110] sm:$0xff] }
  0x33   :  { %243 = vmatpush.msra.mxu0 %v204_v14  ;;  %279 = vmatpush.msra.mxu1 %v220_v33  ;;  %v3003_v40 = vld [vmem:[#allocation9 + $0x160] sm:$0xff]  ;;  %v218_v46 = vld [vmem:[#allocation7 + $0x130] sm:$0xff]  ;;  %v3011_v47 = vld [vmem:[#allocation9 + $0x148] sm:$0xff] }
  0x34   :  { %438 = vmatpush.msra.mxu3 %v2969_v15  ;;  %319 = vmatpush.msra.mxu2 %v224_v34  ;;  %v3013_v48 = vld [vmem:[#allocation9 + $0x140] sm:$0xff]  ;;  %v211_v49 = vld [vmem:[#allocation7 + $0xf8] sm:$0xff]  ;;  %v3017_v51 = vld [vmem:[#allocation9 + $0x130] sm:$0xff] }
  0x35   :  { %244 = vmatpush.msra.mxu0 %v201_v16  ;;  %280 = vmatpush.msra.mxu1 %v217_v43  ;;  %v215_v50 = vld [vmem:[#allocation7 + $0x118] sm:$0xff]  ;;  %v3019_v52 = vld [vmem:[#allocation9 + $0x128] sm:$0xff]  ;;  %v208_v54 = vld [vmem:[#allocation7 + $0xe0] sm:$0xff] }
  0x36   :  { %439 = vmatpush.msra.mxu3 %v2972_v17  ;;  %320 = vmatpush.msra.mxu2 %v221_v44  ;;  %v3021_v53 = vld [vmem:[#allocation4 + $0x8] sm:$0xff]  ;;  %v3025_v55 = vld [vmem:[#allocation9 + $0x118] sm:$0xff]  ;;  %v3027_v56 = vld [vmem:[#allocation9 + $0x110] sm:$0xff] }
  0x37   :  { %245 = vmatpush.msra.mxu0 %v198_v18  ;;  %281 = vmatpush.msra.mxu1 %v214_v45  ;;  %v212_v57 = vld [vmem:[#allocation7 + $0x100] sm:$0xff]  ;;  %v3034_v59 = vld [vmem:[#allocation9 + $0xf8] sm:$0xff]  ;;  %v205_v60 = vld [vmem:[#allocation7 + $0xc8] sm:$0xff] }
  0x38   :  { %440 = vmatpush.msra.mxu3 %v2975_v19  ;;  %321 = vmatpush.msra.mxu2 %v218_v46  ;;  %v3032_v58 = vld [vmem:[#allocation9 + $0x100] sm:$0xff]  ;;  %v209_v61 = vld [vmem:[#allocation7 + $0xe8] sm:$0xff]  ;;  %v202_v62 = vld [vmem:[#allocation7 + $0xb0] sm:$0xff] }
  0x39   :  { %246 = vmatpush.msra.mxu0 %v195_v20  ;;  %282 = vmatpush.msra.mxu1 %v211_v49  ;;  %v3038_v63 = vld [vmem:[#allocation9 + $0xe8] sm:$0xff]  ;;  %v3040_v0 = vld [vmem:[#allocation9 + $0xe0] sm:$0xff]  ;;  %v206_v2 = vld [vmem:[#allocation7 + $0xd0] sm:$0xff] }
  0x3a   :  { %441 = vmatpush.msra.mxu3 %v2978_v21  ;;  %322 = vmatpush.msra.mxu2 %v215_v50  ;;  %v199_v4 = vld [vmem:[#allocation7 + $0x98] sm:$0xff]  ;;  %v3044_v6 = vld [vmem:[#allocation9 + $0xd0] sm:$0xff]  ;;  %v3046_v8 = vld [vmem:[#allocation9 + $0xc8] sm:$0xff] }
  0x3b   :  { %247 = vmatpush.msra.mxu0 %v192_v22  ;;  %283 = vmatpush.msra.mxu1 %v208_v54  ;;  %v3048_v10 = vld [vmem:[#allocation4 + $0x10] sm:$0xff]  ;;  %v203_v12 = vld [vmem:[#allocation7 + $0xb8] sm:$0xff]  ;;  %v196_v18 = vld [vmem:[#allocation7 + $0x80] sm:$0xff] }
  0x3c   :  { %442 = vmatpush.msra.mxu3 %v2981_v23  ;;  %323 = vmatpush.msra.mxu2 %v212_v57  ;;  %v3052_v14 = vld [vmem:[#allocation9 + $0xb8] sm:$0xff]  ;;  %v3054_v16 = vld [vmem:[#allocation9 + $0xb0] sm:$0xff]  ;;  %v200_v20 = vld [vmem:[#allocation7 + $0xa0] sm:$0xff] }
  0x3d   :  { %248 = vmatpush.msra.mxu0 %v189_v24  ;;  %284 = vmatpush.msra.mxu1 %v205_v60  ;;  %v3059_v22 = vld [vmem:[#allocation9 + $0xa0] sm:$0xff]  ;;  %v3061_v24 = vld [vmem:[#allocation9 + $0x98] sm:$0xff]  ;;  %v197_v28 = vld [vmem:[#allocation7 + $0x88] sm:$0xff] }
  0x3e   :  { %443 = vmatpush.msra.mxu3 %v2984_v25  ;;  %324 = vmatpush.msra.mxu2 %v209_v61  ;;  %v3065_v29 = vld [vmem:[#allocation9 + $0x88] sm:$0xff]  ;;  %v190_v32 = vld [vmem:[#allocation7 + $0x50] sm:$0xff]  ;;  %v3075_v43 = vld [vmem:[#allocation4 + $0x18] sm:$0xff] }
  0x3f   :  { %249 = vmatpush.msra.mxu0 %v186_v26  ;;  %285 = vmatpush.msra.mxu1 %v202_v62  ;;  %v193_v26 = vld [vmem:[#allocation7 + $0x68] sm:$0xff]  ;;  %v194_v33 = vld [vmem:[#allocation7 + $0x70] sm:$0xff]  ;;  %v187_v44 = vld [vmem:[#allocation7 + $0x38] sm:$0xff] }
  0x40   :  { %444 = vmatpush.msra.mxu3 %v2987_v27  ;;  %325 = vmatpush.msra.mxu2 %v206_v2  ;;  %v3071_v34 = vld [vmem:[#allocation9 + $0x70] sm:$0xff]  ;;  %v3081_v46 = vld [vmem:[#allocation9 + $0x58] sm:$0xff]  ;;  %v184_v50 = vld [vmem:[#allocation7 + $0x20] sm:$0xff] }
  0x41   :  { %250 = vmatpush.msra.mxu0 %v183_v30  ;;  %286 = vmatpush.msra.mxu1 %v199_v4  ;;  %v3067_v30 = vld [vmem:[#allocation9 + $0x80] sm:$0xff]  ;;  %v3079_v45 = vld [vmem:[#allocation9 + $0x50] sm:$0xff]  ;;  %v191_v49 = vld [vmem:[#allocation7 + $0x58] sm:$0xff] }
  0x42   :  { %445 = vmatpush.msra.mxu3 %v2990_v31  ;;  %326 = vmatpush.msra.mxu2 %v203_v12  ;;  %v3086_v54 = vld [vmem:[#allocation9 + $0x38] sm:$0xff]  ;;  %v3088_v57 = vld [vmem:[#allocation9 + $0x40] sm:$0xff]  ;;  %v181_v61 = vld [vmem:[#allocation7 + $0x8] sm:$0xff] }
  0x43   :  { %251 = vmatpush.msra.mxu0 %v180_v35  ;;  %287 = vmatpush.msra.mxu1 %v196_v18  ;;  %v3073_v35 = vld [vmem:[#allocation9 + $0x68] sm:$0xff]  ;;  %v188_v60 = vld [vmem:[#allocation7 + $0x40] sm:$0xff]  ;;  %v3100_v18 = vld [vmem:[#allocation9 + $0x10] sm:$0xff] }
  0x44   :  { %446 = vmatpush.msra.mxu3 %v2993_v36  ;;  %252 = vmatmul.f32.vlgmr.msra.gmra.mxu0 %v2996_v37  ;;  %v3092_v62 = vld [vmem:[#allocation9 + $0x20] sm:$0xff]  ;;  %v3094_v2 = vld [vmem:[#allocation9 + $0x28] sm:$0xff] }
  0x45   :  { %447 = vmatmul.f32.vlgmr.msra.gmra.mxu3 %v4394_v41  ;;  %471 = vmatpush.msrb.mxu0 %v2998_v38  ;;  %v185_v4 = vld [vmem:[#allocation7 + $0x28] sm:$0xff] }
  0x46   :  { %451 = vmatpush.msrb.mxu3 %v3000_v39  ;;  %327 = vmatpush.msra.mxu2 %v200_v20  ;;  %v3098_v12 = vld [vmem:[#allocation9 + $0x8] sm:$0xff]  ;;  %v3102_v20 = vld [vmem:[#allocation4 + $0x20] sm:$0xff] }
  0x47   :  { %472 = vmatpush.msrb.mxu0 %v3003_v40  ;;  %288 = vmatpush.msra.mxu1 %v193_v26  ;;  %v182_v26 = vld [vmem:[#allocation7 + $0x10] sm:$0xff] }
  0x48   :  { %452 = vmatpush.msrb.mxu3 %v3007_v42  ;;  %328 = vmatpush.msra.mxu2 %v197_v28  ;;  %v3118_v28 = vld [vmem:[#allocation4 + $0x28] sm:$0xff] }
  0x49   :  { %473 = vmatpush.msrb.mxu0 %v3011_v47  ;;  %289 = vmatpush.msra.mxu1 %v190_v32 }
  0x4a   :  { %453 = vmatpush.msrb.mxu3 %v3013_v48  ;;  %329 = vmatpush.msra.mxu2 %v194_v33  ;;  %v3279_v33 = vld [vmem:[%s4384_s4] ss:$0 sm:$0xff] }
  0x4b   :  { %474 = vmatpush.msrb.mxu0 %v3017_v51  ;;  %290 = vmatpush.msra.mxu1 %v187_v44 }
  0x4c   :  { %454 = vmatpush.msrb.mxu3 %v3019_v52  ;;  %255 = vmatmul.f32.gmra.mxu0 %v3021_v53 }
  0x4d   :  { %475 = vmatpush.msrb.mxu0 %v3025_v55  ;;  %330 = vmatpush.msra.mxu2 %v191_v49 }
  0x4e   :  { %455 = vmatpush.msrb.mxu3 %v3027_v56  ;;  %291 = vmatpush.msra.mxu1 %v184_v50 }
  0x4f   :  { %476 = vmatpush.msrb.mxu0 %v3032_v58  ;;  %331 = vmatpush.msra.mxu2 %v188_v60 }
  0x50   :  { %456 = vmatpush.msrb.mxu3 %v3034_v59  ;;  %292 = vmatpush.msra.mxu1 %v181_v61 }
  0x51   :  { %477 = vmatpush.msrb.mxu0 %v3038_v63  ;;  %332 = vmatpush.msra.mxu2 %v185_v4 }
  0x52   :  { %457 = vmatpush.msrb.mxu3 %v3040_v0  ;;  %293 = vmatmul.f32.vlgmr.msra.gmra.mxu1 %v2996_v37 }
  0x53   :  { %478 = vmatpush.msrb.mxu0 %v3044_v6  ;;  %333 = vmatpush.msra.mxu2 %v182_v26 }
  0x54   :  { %458 = vmatpush.msrb.mxu3 %v3046_v8  ;;  %258 = vmatmul.f32.gmra.mxu0 %v3048_v10 }
  0x55   :  { %479 = vmatpush.msrb.mxu0 %v3052_v14  ;;  %560 = vmatpush.msrb.mxu1 %v2949_v1 }
  0x56   :  { %459 = vmatpush.msrb.mxu3 %v3054_v16  ;;  %334 = vmatmul.f32.vlgmr.msra.gmra.mxu2 %v2996_v37 }
  0x57   :  { %480 = vmatpush.msrb.mxu0 %v3059_v22  ;;  %561 = vmatpush.msrb.mxu1 %v2952_v3 }
  0x58   :  { %460 = vmatpush.msrb.mxu3 %v3061_v24  ;;  %580 = vmatpush.msrb.mxu2 %v3000_v39 }
  0x59   :  { %481 = vmatpush.msrb.mxu0 %v3065_v29  ;;  %562 = vmatpush.msrb.mxu1 %v2954_v5 }
  0x5a   :  { %461 = vmatpush.msrb.mxu3 %v3067_v30  ;;  %581 = vmatpush.msrb.mxu2 %v3007_v42 }
  0x5b   :  { %482 = vmatpush.msrb.mxu0 %v3071_v34  ;;  %296 = vmatmul.f32.gmra.mxu1 %v3021_v53 }
  0x5c   :  { %462 = vmatpush.msrb.mxu3 %v3073_v35  ;;  %261 = vmatmul.f32.gmra.mxu0 %v3075_v43 }
  0x5d   :  { %483 = vmatpush.msrb.mxu0 %v3081_v46  ;;  %563 = vmatpush.msrb.mxu1 %v2957_v7 }
  0x5e   :  { %463 = vmatpush.msrb.mxu3 %v3079_v45  ;;  %582 = vmatpush.msrb.mxu2 %v3013_v48 }
  0x5f   :  { %484 = vmatpush.msrb.mxu0 %v3088_v57  ;;  %564 = vmatpush.msrb.mxu1 %v2960_v9 }
  0x60   :  { %464 = vmatpush.msrb.mxu3 %v3086_v54  ;;  %583 = vmatpush.msrb.mxu2 %v3019_v52 }
  0x61   :  { %485 = vmatpush.msrb.mxu0 %v3094_v2  ;;  %337 = vmatmul.f32.gmra.mxu2 %v3021_v53 }
  0x62   :  { %465 = vmatpush.msrb.mxu3 %v3092_v62  ;;  %565 = vmatpush.msrb.mxu1 %v2963_v11 }
  0x63   :  { %486 = vmatpush.msrb.mxu0 %v3100_v18  ;;  %584 = vmatpush.msrb.mxu2 %v3027_v56 }
  0x64   :  { %466 = vmatpush.msrb.mxu3 %v3098_v12  ;;  %264 = vmatmul.f32.gmra.mxu0 %v3102_v20 }
  0x65   :  { %467 = vmatmul.f32.vlgmr.msrb.gmra.mxu3 %v4394_v41  ;;  %692 = vmatpush.msra.mxu0 %v2949_v1  ;;  %v3136_v1 = vld [vmem:[#allocation4 + $0x30] sm:$0xff] }
  0x66   :  { %600 = vmatpush.msra.mxu3 %v2998_v38  ;;  %566 = vmatpush.msrb.mxu1 %v2966_v13 }
  0x67   :  { %693 = vmatpush.msra.mxu0 %v2952_v3  ;;  %585 = vmatpush.msrb.mxu2 %v3034_v59  ;;  %v3154_v3 = vld [vmem:[#allocation4 + $0x38] sm:$0xff] }
  0x68   :  { %601 = vmatpush.msra.mxu3 %v3003_v40  ;;  %299 = vmatmul.f32.gmra.mxu1 %v3048_v10 }
  0x69   :  { %567 = vmatpush.msrb.mxu1 %v2969_v15  ;;  %586 = vmatpush.msrb.mxu2 %v3040_v0 }
  0x6a   :  { %602 = vmatpush.msra.mxu3 %v3011_v47  ;;  %340 = vmatmul.f32.gmra.mxu2 %v3048_v10 }
  0x6b   :  { %568 = vmatpush.msrb.mxu1 %v2972_v17  ;;  %587 = vmatpush.msrb.mxu2 %v3046_v8 }
  0x6c   :  { %267 = vmatmul.f32.gmra.mxu0 %v3118_v28  ;;  %603 = vmatpush.msra.mxu3 %v3017_v51 }
  0x6d   :  { %569 = vmatpush.msrb.mxu1 %v2975_v19  ;;  %588 = vmatpush.msrb.mxu2 %v3054_v16 }
  0x6e   :  { %604 = vmatpush.msra.mxu3 %v3025_v55  ;;  %694 = vmatpush.msra.mxu0 %v2954_v5 }
  0x6f   :  { %570 = vmatpush.msrb.mxu1 %v2978_v21  ;;  %589 = vmatpush.msrb.mxu2 %v3061_v24 }
  0x70   :  { %605 = vmatpush.msra.mxu3 %v3032_v58  ;;  %302 = vmatmul.f32.gmra.mxu1 %v3075_v43 }
  0x71   :  { %571 = vmatpush.msrb.mxu1 %v2981_v23  ;;  %590 = vmatpush.msrb.mxu2 %v3067_v30 }
  0x72   :  { %606 = vmatpush.msra.mxu3 %v3038_v63  ;;  %343 = vmatmul.f32.gmra.mxu2 %v3075_v43 }
  0x73   :  { %572 = vmatpush.msrb.mxu1 %v2984_v25  ;;  %591 = vmatpush.msrb.mxu2 %v3073_v35 }
  0x74   :  { %270 = vmatmul.f32.gmra.mxu0 %v3136_v1  ;;  %607 = vmatpush.msra.mxu3 %v3044_v6 }
  0x75   :  { %573 = vmatpush.msrb.mxu1 %v2987_v27  ;;  %592 = vmatpush.msrb.mxu2 %v3079_v45 }
  0x76   :  { %608 = vmatpush.msra.mxu3 %v3052_v14  ;;  %695 = vmatpush.msra.mxu0 %v2957_v7 }
  0x77   :  { %574 = vmatpush.msrb.mxu1 %v2990_v31  ;;  %593 = vmatpush.msrb.mxu2 %v3086_v54 }
  0x78   :  { %609 = vmatpush.msra.mxu3 %v3059_v22  ;;  %305 = vmatmul.f32.gmra.mxu1 %v3102_v20 }
  0x79   :  { %575 = vmatpush.msrb.mxu1 %v2993_v36  ;;  %594 = vmatpush.msrb.mxu2 %v3092_v62 }
  0x7a   :  { %610 = vmatpush.msra.mxu3 %v3065_v29  ;;  %346 = vmatmul.f32.gmra.mxu2 %v3102_v20 }
  0x7b   :  { %595 = vmatpush.msrb.mxu2 %v3098_v12  ;;  %712 = vmatpush.msra.mxu1 %v3000_v39 }
  0x7c   :  { %273 = vmatmul.f32.gmra.mxu0 %v3154_v3  ;;  %611 = vmatpush.msra.mxu3 %v3071_v34 }
  0x7d   :  { %696 = vmatpush.msra.mxu0 %v2960_v9  ;;  %732 = vmatpush.msra.mxu2 %v2998_v38 }
  0x7e   :  { %612 = vmatpush.msra.mxu3 %v3081_v46  ;;  %713 = vmatpush.msra.mxu1 %v3007_v42 }
  0x7f   :  { %697 = vmatpush.msra.mxu0 %v2963_v11  ;;  %733 = vmatpush.msra.mxu2 %v3003_v40 }
  0x80   :  { %613 = vmatpush.msra.mxu3 %v3088_v57  ;;  %714 = vmatpush.msra.mxu1 %v3013_v48 }
  0x81   :  { %308 = vmatmul.f32.gmra.mxu1 %v3118_v28  ;;  %698 = vmatpush.msra.mxu0 %v2966_v13  ;;  %v228_v13 = vld [vmem:[#allocation10] sm:$0x7] }
  0x82   :  { %614 = vmatpush.msra.mxu3 %v3094_v2  ;;  %734 = vmatpush.msra.mxu2 %v3011_v47 }
  0x83   :  { %715 = vmatpush.msra.mxu1 %v3019_v52  ;;  %699 = vmatpush.msra.mxu0 %v2969_v15  ;;  %v3254_v15 = vperm.slane %v228_v13, 0 }
  0x84   :  { %487 = vmatmul.f32.vlgmr.msrb.gmra.mxu0 %v4394_v41  ;;  %615 = vmatpush.msra.mxu3 %v3100_v18  ;;  %v3535_v41 = vld [vmem:[#allocation9 + $0x58] sm:$0xff] }
  0x85   :  { %735 = vmatpush.msra.mxu2 %v3017_v51  ;;  %716 = vmatpush.msra.mxu1 %v3027_v56 }
  0x86   :  { %349 = vmatmul.f32.gmra.mxu2 %v3118_v28  ;;  %700 = vmatpush.msra.mxu0 %v2972_v17 }
  0x87   :  { %736 = vmatpush.msra.mxu2 %v3025_v55  ;;  %717 = vmatpush.msra.mxu1 %v3034_v59 }
  0x88   :  { %701 = vmatpush.msra.mxu0 %v2975_v19 }
  0x89   :  { %737 = vmatpush.msra.mxu2 %v3032_v58  ;;  %718 = vmatpush.msra.mxu1 %v3040_v0 }
  0x8a   :  { %311 = vmatmul.f32.gmra.mxu1 %v3136_v1  ;;  %702 = vmatpush.msra.mxu0 %v2978_v21 }
  0x8b   :  { %738 = vmatpush.msra.mxu2 %v3038_v63  ;;  %719 = vmatpush.msra.mxu1 %v3046_v8 }
  0x8c   :  { %703 = vmatpush.msra.mxu0 %v2981_v23 }
  0x8d   :  { %739 = vmatpush.msra.mxu2 %v3044_v6  ;;  %720 = vmatpush.msra.mxu1 %v3054_v16 }
  0x8e   :  { %352 = vmatmul.f32.gmra.mxu2 %v3136_v1  ;;  %704 = vmatpush.msra.mxu0 %v2984_v25 }
  0x8f   :  { %740 = vmatpush.msra.mxu2 %v3052_v14  ;;  %721 = vmatpush.msra.mxu1 %v3061_v24 }
  0x90   :  { %705 = vmatpush.msra.mxu0 %v2987_v27  ;;  %v3262_v27 = vperm.slane %v228_v13, 1 }
  0x91   :  { %741 = vmatpush.msra.mxu2 %v3059_v22  ;;  %722 = vmatpush.msra.mxu1 %v3067_v30 }
  0x92   :  { %314 = vmatmul.f32.gmra.mxu1 %v3154_v3  ;;  %706 = vmatpush.msra.mxu0 %v2990_v31 }
  0x93   :  { %742 = vmatpush.msra.mxu2 %v3065_v29  ;;  %723 = vmatpush.msra.mxu1 %v3073_v35 }
  0x94   :  { %707 = vmatpush.msra.mxu0 %v2993_v36 }
  0x95   :  { %743 = vmatpush.msra.mxu2 %v3071_v34  ;;  %724 = vmatpush.msra.mxu1 %v3079_v45 }
  0x96   :  { %355 = vmatmul.f32.gmra.mxu2 %v3154_v3  ;;  %844 = vmatpush.msrb.mxu0 %v3000_v39 }
  0x97   :  { %744 = vmatpush.msra.mxu2 %v3081_v46  ;;  %725 = vmatpush.msra.mxu1 %v3086_v54 }
  0x98   :  { %845 = vmatpush.msrb.mxu0 %v3007_v42 }
  0x99   :  { %745 = vmatpush.msra.mxu2 %v3088_v57  ;;  %726 = vmatpush.msra.mxu1 %v3092_v62 }
  0x9a   :  { %846 = vmatpush.msrb.mxu0 %v3013_v48 }
  0x9b   :  { %746 = vmatpush.msra.mxu2 %v3094_v2  ;;  %727 = vmatpush.msra.mxu1 %v3098_v12 }
  0x9c   :  { %847 = vmatpush.msrb.mxu0 %v3019_v52 }
  0x9d   :  { %747 = vmatpush.msra.mxu2 %v3100_v18 }
  0x9e   :  { %848 = vmatpush.msrb.mxu0 %v3027_v56 }
  0xa0   :  { %849 = vmatpush.msrb.mxu0 %v3034_v59 }
  0xa2   :  { %850 = vmatpush.msrb.mxu0 %v3040_v0 }
  0xa4   :  { %851 = vmatpush.msrb.mxu0 %v3046_v8 }
  0xa6   :  { %852 = vmatpush.msrb.mxu0 %v3054_v16 }
  0xa8   :  { %853 = vmatpush.msrb.mxu0 %v3061_v24 }
  0xaa   :  { %854 = vmatpush.msrb.mxu0 %v3067_v30 }
  0xac   :  { %855 = vmatpush.msrb.mxu0 %v3073_v35  ;;  %v3281_v35 = vperm.slane %v228_v13, 2 }
  0xae   :  { %856 = vmatpush.msrb.mxu0 %v3079_v45  ;;  %4420 = vst [vmem:[#allocation27_spill] sm:$0xff] %v3281_v35 }
  0xb0   :  { %857 = vmatpush.msrb.mxu0 %v3086_v54 }
  0xb2   :  { %858 = vmatpush.msrb.mxu0 %v3092_v62 }
  0xb4   :  { %859 = vmatpush.msrb.mxu0 %v3098_v12 }
  0xc1   :  { %v253_v5 = vpop.f32.mrf.mxu0 }
  0xc2   :  { %v254_v36 = vadd.f32 %v253_v5, %v3254_v15 }
  0xc8   :  { %v448_v21 = vpop.f32.mrf.mxu3 }
  0xc9   :  { %v3248_v7 = vpop.f32.mrf.mxu0  ;;  %v494_v39 = vadd.f32 %v448_v21, %v254_v36 }
  0xcb   :  { %v495_v52 = vmul.f32 0.5, %v494_v39 }
  0xcd   :  { %2467 = vtanh.f32 %v495_v52 }
  0xcf   :  { %v294_v37 = vpop.f32.mrf.mxu1 }
  0xd0   :  { %v295_v42 = vadd.f32 %v294_v37, %v3262_v27 }
  0xd1   :  { %v3250_v9 = vpop.f32.mrf.mxu0 }
  0xd3   :  { %v2468_v30 = vpop.eup %2467 }
  0xd4   :  { %v497_v32 = vmul.f32 0.5, %v2468_v30 }
  0xd6   :  { %v498_v45 = vadd.f32 0.5, %v497_v32 }
  0xd9   :  { %v3252_v11 = vpop.f32.mrf.mxu0  ;;  %v335_v31 = vpop.f32.mrf.mxu2 }
  0xda   :  { %v336_v50 = vadd.f32 %v335_v31, %v3281_v35 }
  0xe1   :  { %v265_v17 = vpop.f32.mrf.mxu0 }
  0xe2   :  { %v3257_v19 = vadd.f32 %v265_v17, %v3254_v15 }
  0xe4   :  { %v3269_v0 = vpop.f32.mrf.mxu2 }
  0xe8   :  { %v468_v48 = vpop.f32.mrf.mxu3 }
  0xe9   :  { %v268_v23 = vpop.f32.mrf.mxu0  ;;  %v499_v59 = vadd.f32 %v468_v48, %v295_v42  ;;  %v339_v42 = vadd.f32 %v3269_v0, %v3281_v35  ;;  %v3345_v0 = vld [vmem:[#allocation9 + $0x168] sm:$0xff] }
  0xea   :  { %v3260_v25 = vadd.f32 %v268_v23, %v3254_v15  ;;  %824 = vmatpush.msrb.mxu3 %v3345_v0 }
  0xeb   :  { %v500_v8 = vmul.f32 0.5, %v499_v59 }
  0xed   :  { %2469 = vtanh.f32 %v500_v8  ;;  %v3274_v24 = vpop.f32.mrf.mxu2 }
  0xf1   :  { %v271_v53 = vpop.f32.mrf.mxu0 }
  0xf2   :  { %v3267_v56 = vadd.f32 %v271_v53, %v3254_v15 }
  0xf3   :  { %v2470_v43 = vpop.eup %2469 }
  0xf4   :  { %4418 = vst [vmem:[#allocation25_spill] sm:$0xff] %v3267_v56  ;;  %v502_v60 = vmul.f32 0.5, %v2470_v43 }
  0xf5   :  { %v344_v54 = vpop.f32.mrf.mxu2 }
  0xf6   :  { %v3286_v61 = vadd.f32 %v344_v54, %v3281_v35  ;;  %v503_v12 = vadd.f32 0.5, %v502_v60  ;;  %v3369_v54 = vld [vmem:[#allocation9 + $0xf0] sm:$0xff]  ;;  %v3374_v60 = vld [vmem:[#allocation9 + $0xd8] sm:$0xff] }
  0xf8   :  { %v508_v26 = vsub.f32 1.0, %v503_v12  ;;  %v3389_v12 = vld [vmem:[#allocation9 + $0x90] sm:$0xff] }
  0xf9   :  { %v274_v10 = vpop.f32.mrf.mxu0 }
  0xfa   :  { %v3272_v16 = vadd.f32 %v274_v10, %v3254_v15 }
  0xfc   :  { %4419 = vst [vmem:[#allocation26_spill] sm:$0xff] %v3272_v16  ;;  %v3549_v16 = vld [vmem:[#allocation9 + $0x20] sm:$0xff] }
  0xfd   :  { %v347_v20 = vpop.f32.mrf.mxu2 }
  0xfe   :  { %v3289_v28 = vadd.f32 %v347_v20, %v3281_v35  ;;  %v3394_v20 = vld [vmem:[#allocation9 + $0x78] sm:$0xff] }
 0x101   :  { %v488_v44 = vpop.f32.mrf.mxu0 }
 0x102   :  { %v504_v49 = vadd.f32 %v3279_v33, %v488_v44  ;;  %v3349_v44 = vld [vmem:[#allocation9 + $0x150] sm:$0xff] }
 0x103   :  { %825 = vmatpush.msrb.mxu3 %v3349_v44 }
 0x104   :  { %v505_v62 = vmul.f32 %v504_v49, %v498_v45  ;;  %v3354_v45 = vld [vmem:[#allocation9 + $0x138] sm:$0xff]  ;;  %v3359_v49 = vld [vmem:[#allocation9 + $0x120] sm:$0xff] }
 0x105   :  { %826 = vmatpush.msrb.mxu3 %v3354_v45 }
 0x106   :  { %v506_v4 = vadd.f32 %v505_v62, %v336_v50  ;;  %v3364_v50 = vld [vmem:[#allocation9 + $0x108] sm:$0xff]  ;;  %v3379_v62 = vld [vmem:[#allocation9 + $0xc0] sm:$0xff] }
 0x107   :  { %827 = vmatpush.msrb.mxu3 %v3359_v49 }
 0x108   :  { %2471 = vtanh.f32 %v506_v4  ;;  %v3384_v4 = vld [vmem:[#allocation9 + $0xa8] sm:$0xff] }
 0x109   :  { %v350_v5 = vpop.f32.mrf.mxu2  ;;  %828 = vmatpush.msrb.mxu3 %v3364_v50 }
 0x10a   :  { %v3298_v13 = vadd.f32 %v350_v5, %v3281_v35  ;;  %v3409_v5 = vld [vmem:[#allocation9 + $0x30] sm:$0xff] }
 0x10b   :  { %829 = vmatpush.msrb.mxu3 %v3369_v54 }
 0x10c   :  { %4422 = vst [vmem:[#allocation29_spill] sm:$0xff] %v3298_v13 }
 0x10d   :  { %830 = vmatpush.msrb.mxu3 %v3374_v60 }
 0x10e   :  { %v2472_v1 = vpop.eup %2471 }
 0x10f   :  { %v3291_v3 = vmul.f32 %v2472_v1, %v508_v26  ;;  %831 = vmatpush.msrb.mxu3 %v3379_v62  ;;  %v3399_v26 = vld [vmem:[#allocation9 + $0x60] sm:$0xff]  ;;  %v3404_v1 = vld [vmem:[#allocation9 + $0x48] sm:$0xff] }
 0x111   :  { %4421 = vst [vmem:[#allocation28_spill] sm:$0xff] %v3291_v3  ;;  %576 = vmatmul.f32.vlgmr.msrb.gmra.mxu1 %v3291_v3  ;;  %596 = vmatmul.f32.vlgmr.msrb.gmra.mxu2 %v3291_v3  ;;  %v353_v17 = vpop.f32.mrf.mxu2 }
 0x112   :  { %616 = vmatmul.f32.vlgmr.msra.gmra.mxu3 %v3291_v3  ;;  %864 = vmatpush.msrb.mxu1 %v2998_v38  ;;  %v3305_v21 = vadd.f32 %v353_v17, %v3281_v35  ;;  %v297_v38 = vpop.f32.mrf.mxu1  ;;  %v3414_v17 = vld [vmem:[#allocation9 + $0x18] sm:$0xff] }
 0x113   :  { %956 = vmatpush.msrb.mxu2 %v3345_v0  ;;  %832 = vmatpush.msrb.mxu3 %v3384_v4 }
 0x114   :  { %865 = vmatpush.msrb.mxu1 %v3003_v40  ;;  %4423 = vst [vmem:[#allocation30_spill] sm:$0xff] %v3305_v21  ;;  %v263_v21 = vadd.f32 %v3252_v11, %v3254_v15 }
 0x115   :  { %957 = vmatpush.msrb.mxu2 %v3349_v44  ;;  %833 = vmatpush.msrb.mxu3 %v3389_v12 }
 0x116   :  { %866 = vmatpush.msrb.mxu1 %v3011_v47 }
 0x117   :  { %958 = vmatpush.msrb.mxu2 %v3354_v45  ;;  %834 = vmatpush.msrb.mxu3 %v3394_v20 }
 0x118   :  { %867 = vmatpush.msrb.mxu1 %v3017_v51 }
 0x119   :  { %959 = vmatpush.msrb.mxu2 %v3359_v49  ;;  %835 = vmatpush.msrb.mxu3 %v3399_v26 }
 0x11a   :  { %868 = vmatpush.msrb.mxu1 %v3025_v55  ;;  %v3318_v40 = vpop.f32.mrf.mxu1 }
 0x11b   :  { %960 = vmatpush.msrb.mxu2 %v3364_v50  ;;  %836 = vmatpush.msrb.mxu3 %v3404_v1 }
 0x11c   :  { %869 = vmatpush.msrb.mxu1 %v3032_v58 }
 0x11d   :  { %961 = vmatpush.msrb.mxu2 %v3369_v54  ;;  %837 = vmatpush.msrb.mxu3 %v3409_v5 }
 0x11e   :  { %870 = vmatpush.msrb.mxu1 %v3038_v63 }
 0x11f   :  { %962 = vmatpush.msrb.mxu2 %v3374_v60  ;;  %838 = vmatpush.msrb.mxu3 %v3414_v17 }
 0x120   :  { %871 = vmatpush.msrb.mxu1 %v3044_v6  ;;  %v3330_v6 = vpop.f32.mrf.mxu2 }
 0x121   :  { %4427 = vst [vmem:[#allocation34_spill] sm:$0xff] %v3330_v6  ;;  %963 = vmatpush.msrb.mxu2 %v3379_v62  ;;  %v3541_v6 = vld [vmem:[#allocation9 + $0x38] sm:$0xff] }
 0x122   :  { %872 = vmatpush.msrb.mxu1 %v3052_v14  ;;  %v3320_v47 = vpop.f32.mrf.mxu1  ;;  %v257_v14 = vadd.f32 %v3248_v7, %v3254_v15 }
 0x123   :  { %964 = vmatpush.msrb.mxu2 %v3384_v4 }
 0x124   :  { %873 = vmatpush.msrb.mxu1 %v3059_v22 }
 0x125   :  { %965 = vmatpush.msrb.mxu2 %v3389_v12 }
 0x126   :  { %874 = vmatpush.msrb.mxu1 %v3065_v29 }
 0x127   :  { %966 = vmatpush.msrb.mxu2 %v3394_v20 }
 0x128   :  { %875 = vmatpush.msrb.mxu1 %v3071_v34 }
 0x129   :  { %967 = vmatpush.msrb.mxu2 %v3399_v26 }
 0x12a   :  { %876 = vmatpush.msrb.mxu1 %v3081_v46  ;;  %v3322_v51 = vpop.f32.mrf.mxu1  ;;  %v298_v46 = vadd.f32 %v297_v38, %v3262_v27  ;;  %v260_v38 = vadd.f32 %v3250_v9, %v3254_v15 }
 0x12b   :  { %968 = vmatpush.msrb.mxu2 %v3404_v1 }
 0x12c   :  { %877 = vmatpush.msrb.mxu1 %v3088_v57 }
 0x12d   :  { %969 = vmatpush.msrb.mxu2 %v3409_v5 }
 0x12e   :  { %878 = vmatpush.msrb.mxu1 %v3094_v2 }
 0x12f   :  { %970 = vmatpush.msrb.mxu2 %v3414_v17 }
 0x130   :  { %879 = vmatpush.msrb.mxu1 %v3100_v18 }
 0x132   :  { %v3324_v55 = vpop.f32.mrf.mxu1 }
 0x133   :  { %4424 = vst [vmem:[#allocation31_spill] sm:$0xff] %v3324_v55 }
 0x13a   :  { %v3326_v58 = vpop.f32.mrf.mxu1 }
 0x13b   :  { %4425 = vst [vmem:[#allocation32_spill] sm:$0xff] %v3326_v58  ;;  %v3559_v58 = vld [vmem:[#allocation9 + $0x8] sm:$0xff] }
 0x142   :  { %v3328_v63 = vpop.f32.mrf.mxu1 }
 0x143   :  { %4426 = vst [vmem:[#allocation33_spill] sm:$0xff] %v3328_v63  ;;  %v3551_v63 = vld [vmem:[#allocation9 + $0x28] sm:$0xff] }
 0x18e   :  { %v577_v22 = vpop.f32.mrf.mxu1 }
 0x18f   :  { %v624_v29 = vadd.f32 %v577_v22, %v257_v14  ;;  %v3420_v14 = vld [vmem:[#allocation9] sm:$0xff]  ;;  %v301_v22 = vadd.f32 %v3318_v40, %v3262_v27 }
 0x190   :  { %839 = vmatpush.msrb.mxu3 %v3420_v14  ;;  %971 = vmatpush.msrb.mxu2 %v3420_v14 }
 0x191   :  { %v625_v34 = vmul.f32 0.5, %v624_v29 }
 0x193   :  { %2473 = vtanh.f32 %v625_v34 }
 0x194   :  { %v597_v57 = vpop.f32.mrf.mxu2 }
 0x195   :  { %v629_v2 = vadd.f32 %v597_v57, %v298_v46  ;;  %v617_v31 = vpop.f32.mrf.mxu3 }
 0x196   :  { %v634_v39 = vadd.f32 %v3279_v33, %v617_v31 }
 0x197   :  { %v630_v18 = vmul.f32 0.5, %v629_v2 }
 0x199   :  { %v2474_v23 = vpop.eup %2473  ;;  %2475 = vtanh.f32 %v630_v18 }
 0x19a   :  { %v627_v36 = vmul.f32 0.5, %v2474_v23 }
 0x19c   :  { %v628_v37 = vadd.f32 0.5, %v627_v36 }
 0x19e   :  { %v635_v7 = vmul.f32 %v634_v39, %v628_v37  ;;  %v342_v39 = vadd.f32 %v3274_v24, %v3281_v35  ;;  %v3439_v24 = vld [vmem:[#allocation9 + $0x170] sm:$0xff]  ;;  %v3543_v35 = vld [vmem:[#allocation9 + $0x40] sm:$0xff] }
 0x19f   :  { %v2476_v48 = vpop.eup %2475  ;;  %976 = vmatpush.msra.mxu3 %v3439_v24 }
 0x1a0   :  { %v636_v52 = vadd.f32 %v635_v7, %v339_v42  ;;  %v632_v53 = vmul.f32 0.5, %v2476_v48 }
 0x1a2   :  { %2477 = vtanh.f32 %v636_v52  ;;  %v633_v59 = vadd.f32 0.5, %v632_v53 }
 0x1a4   :  { %v638_v10 = vsub.f32 1.0, %v633_v59 }
 0x1a8   :  { %v2478_v8 = vpop.eup %2477 }
 0x1a9   :  { %v639_v30 = vsub.f32 %v2478_v8, %v3291_v3 }
 0x1ab   :  { %v640_v32 = vmul.f32 %v639_v30, %v638_v10 }
 0x1ad   :  { %v3340_v43 = vadd.f32 %v640_v32, %v3291_v3  ;;  %v3441_v32 = vld [vmem:[#allocation9 + $0x178] sm:$0xff]  ;;  %v304_v3 = vadd.f32 %v3320_v47, %v3262_v27 }
 0x1af   :  { %4428 = vst [vmem:[#allocation35_spill] sm:$0xff] %v3340_v43  ;;  %708 = vmatmul.f32.vlgmr.msra.gmra.mxu0 %v3340_v43  ;;  %728 = vmatmul.f32.vlgmr.msra.gmra.mxu1 %v3340_v43 }
 0x1b0   :  { %748 = vmatmul.f32.vlgmr.msra.gmra.mxu2 %v3340_v43  ;;  %1088 = vmatpush.msra.mxu1 %v3345_v0 }
 0x1b1   :  { %996 = vmatpush.msra.mxu0 %v3441_v32  ;;  %1108 = vmatpush.msra.mxu2 %v3439_v24 }
 0x1b2   :  { %1089 = vmatpush.msra.mxu1 %v3349_v44 }
 0x1b4   :  { %1090 = vmatpush.msra.mxu1 %v3354_v45 }
 0x1b6   :  { %1091 = vmatpush.msra.mxu1 %v3359_v49 }
 0x1b8   :  { %1092 = vmatpush.msra.mxu1 %v3364_v50 }
 0x1ba   :  { %1093 = vmatpush.msra.mxu1 %v3369_v54 }
 0x1bc   :  { %1094 = vmatpush.msra.mxu1 %v3374_v60 }
 0x1be   :  { %1095 = vmatpush.msra.mxu1 %v3379_v62 }
 0x1c0   :  { %1096 = vmatpush.msra.mxu1 %v3384_v4 }
 0x1c2   :  { %1097 = vmatpush.msra.mxu1 %v3389_v12 }
 0x1c4   :  { %1098 = vmatpush.msra.mxu1 %v3394_v20 }
 0x1c6   :  { %1099 = vmatpush.msra.mxu1 %v3399_v26 }
 0x1c8   :  { %1100 = vmatpush.msra.mxu1 %v3404_v1 }
 0x1ca   :  { %1101 = vmatpush.msra.mxu1 %v3409_v5 }
 0x1cc   :  { %1102 = vmatpush.msra.mxu1 %v3414_v17 }
 0x1ce   :  { %1103 = vmatpush.msra.mxu1 %v3420_v14 }
 0x22c   :  { %v709_v29 = vpop.f32.mrf.mxu0  ;;  %v729_v34 = vpop.f32.mrf.mxu1 }
 0x22d   :  { %v756_v46 = vadd.f32 %v709_v29, %v260_v38  ;;  %v761_v57 = vadd.f32 %v729_v34, %v301_v22  ;;  %v3445_v38 = vld [vmem:[#allocation9 + $0x158] sm:$0xff]  ;;  %v3447_v22 = vld [vmem:[#allocation9 + $0x160] sm:$0xff]  ;;  %v3455_v34 = vld [vmem:[#allocation9 + $0x148] sm:$0xff] }
 0x22e   :  { %977 = vmatpush.msra.mxu3 %v3445_v38  ;;  %997 = vmatpush.msra.mxu0 %v3447_v22  ;;  %v3453_v29 = vld [vmem:[#allocation9 + $0x140] sm:$0xff] }
 0x22f   :  { %v757_v9 = vmul.f32 0.5, %v756_v46  ;;  %v762_v2 = vmul.f32 0.5, %v761_v57  ;;  %1109 = vmatpush.msra.mxu2 %v3445_v38  ;;  %v3461_v46 = vld [vmem:[#allocation9 + $0x128] sm:$0xff]  ;;  %v3463_v57 = vld [vmem:[#allocation9 + $0x130] sm:$0xff] }
 0x230   :  { %978 = vmatpush.msra.mxu3 %v3453_v29  ;;  %998 = vmatpush.msra.mxu0 %v3455_v34 }
 0x231   :  { %2479 = vtanh.f32 %v757_v9  ;;  %1110 = vmatpush.msra.mxu2 %v3453_v29  ;;  %v3469_v9 = vld [vmem:[#allocation9 + $0x110] sm:$0xff] }
 0x232   :  { %2481 = vtanh.f32 %v762_v2  ;;  %979 = vmatpush.msra.mxu3 %v3461_v46  ;;  %999 = vmatpush.msra.mxu0 %v3463_v57  ;;  %v3471_v2 = vld [vmem:[#allocation9 + $0x118] sm:$0xff] }
 0x233   :  { %v749_v23 = vpop.f32.mrf.mxu2  ;;  %1111 = vmatpush.msra.mxu2 %v3461_v46 }
 0x234   :  { %v766_v36 = vadd.f32 %v3279_v33, %v749_v23  ;;  %980 = vmatpush.msra.mxu3 %v3469_v9  ;;  %1000 = vmatpush.msra.mxu0 %v3471_v2  ;;  %v3479_v23 = vld [vmem:[#allocation9 + $0x100] sm:$0xff] }
 0x235   :  { %1112 = vmatpush.msra.mxu2 %v3469_v9 }
 0x236   :  { %1001 = vmatpush.msra.mxu0 %v3479_v23 }
 0x237   :  { %v2480_v18 = vpop.eup %2479 }
 0x238   :  { %v759_v31 = vmul.f32 0.5, %v2480_v18  ;;  %v2482_v37 = vpop.eup %2481  ;;  %v3477_v18 = vld [vmem:[#allocation9 + $0xf8] sm:$0xff] }
 0x239   :  { %v764_v48 = vmul.f32 0.5, %v2482_v37  ;;  %981 = vmatpush.msra.mxu3 %v3477_v18  ;;  %1113 = vmatpush.msra.mxu2 %v3477_v18  ;;  %v3495_v37 = vld [vmem:[#allocation9 + $0xd0] sm:$0xff] }
 0x23a   :  { %v760_v40 = vadd.f32 0.5, %v759_v31  ;;  %v3485_v31 = vld [vmem:[#allocation9 + $0xe0] sm:$0xff] }
 0x23b   :  { %v765_v52 = vadd.f32 0.5, %v764_v48  ;;  %982 = vmatpush.msra.mxu3 %v3485_v31  ;;  %1114 = vmatpush.msra.mxu2 %v3485_v31  ;;  %v3511_v48 = vld [vmem:[#allocation9 + $0xa0] sm:$0xff] }
 0x23c   :  { %v767_v42 = vmul.f32 %v766_v36, %v760_v40  ;;  %v3487_v40 = vld [vmem:[#allocation9 + $0xe8] sm:$0xff] }
 0x23d   :  { %v770_v59 = vsub.f32 1.0, %v765_v52  ;;  %1002 = vmatpush.msra.mxu0 %v3487_v40  ;;  %v3493_v36 = vld [vmem:[#allocation9 + $0xc8] sm:$0xff]  ;;  %v3517_v52 = vld [vmem:[#allocation9 + $0x80] sm:$0xff] }
 0x23e   :  { %v768_v7 = vadd.f32 %v767_v42, %v342_v39  ;;  %983 = vmatpush.msra.mxu3 %v3493_v36  ;;  %v3501_v39 = vld [vmem:[#allocation9 + $0xb0] sm:$0xff]  ;;  %v3503_v42 = vld [vmem:[#allocation9 + $0xb8] sm:$0xff]  ;;  %1115 = vmatpush.msra.mxu2 %v3493_v36 }
 0x23f   :  { %1003 = vmatpush.msra.mxu0 %v3495_v37 }
 0x240   :  { %2483 = vtanh.f32 %v768_v7  ;;  %984 = vmatpush.msra.mxu3 %v3501_v39  ;;  %v3509_v7 = vld [vmem:[#allocation9 + $0x98] sm:$0xff]  ;;  %1116 = vmatpush.msra.mxu2 %v3501_v39 }
 0x241   :  { %1004 = vmatpush.msra.mxu0 %v3503_v42 }
 0x242   :  { %985 = vmatpush.msra.mxu3 %v3509_v7  ;;  %1117 = vmatpush.msra.mxu2 %v3509_v7 }
 0x243   :  { %1005 = vmatpush.msra.mxu0 %v3511_v48 }
 0x244   :  { %986 = vmatpush.msra.mxu3 %v3517_v52  ;;  %1118 = vmatpush.msra.mxu2 %v3517_v52 }
 0x246   :  { %v2484_v53 = vpop.eup %2483 }
 0x247   :  { %v771_v8 = vsub.f32 %v2484_v53, %v3340_v43  ;;  %v3519_v53 = vld [vmem:[#allocation9 + $0x88] sm:$0xff] }
 0x248   :  { %1006 = vmatpush.msra.mxu0 %v3519_v53 }
 0x249   :  { %v772_v10 = vmul.f32 %v771_v8, %v770_v59  ;;  %v3525_v59 = vld [vmem:[#allocation9 + $0x68] sm:$0xff]  ;;  %v3527_v8 = vld [vmem:[#allocation9 + $0x70] sm:$0xff] }
 0x24a   :  { %987 = vmatpush.msra.mxu3 %v3525_v59  ;;  %1007 = vmatpush.msra.mxu0 %v3527_v8 }
 0x24b   :  { %v3434_v30 = vadd.f32 %v772_v10, %v3340_v43  ;;  %v3533_v10 = vld [vmem:[#allocation9 + $0x50] sm:$0xff]  ;;  %1119 = vmatpush.msra.mxu2 %v3525_v59 }
 0x24c   :  { %988 = vmatpush.msra.mxu3 %v3533_v10  ;;  %1008 = vmatpush.msra.mxu0 %v3535_v41  ;;  %v3561_v43 = vld [vmem:[#allocation9 + $0x10] sm:$0xff] }
 0x24d   :  { %840 = vmatmul.f32.vlgmr.msrb.gmra.mxu3 %v3434_v30  ;;  %860 = vmatmul.f32.vlgmr.msrb.gmra.mxu0 %v3434_v30 }
 0x24e   :  { %880 = vmatmul.f32.vlgmr.msrb.gmra.mxu1 %v3434_v30  ;;  %1120 = vmatpush.msra.mxu2 %v3533_v10 }
 0x24f   :  { %1240 = vmatpush.msrb.mxu1 %v3439_v24  ;;  %989 = vmatpush.msra.mxu3 %v3541_v6 }
 0x250   :  { %1009 = vmatpush.msra.mxu0 %v3543_v35  ;;  %1121 = vmatpush.msra.mxu2 %v3541_v6 }
 0x251   :  { %1241 = vmatpush.msrb.mxu1 %v3445_v38  ;;  %990 = vmatpush.msra.mxu3 %v3549_v16 }
 0x252   :  { %1010 = vmatpush.msra.mxu0 %v3551_v63  ;;  %1122 = vmatpush.msra.mxu2 %v3549_v16 }
 0x253   :  { %1242 = vmatpush.msrb.mxu1 %v3453_v29  ;;  %991 = vmatpush.msra.mxu3 %v3559_v58 }
 0x254   :  { %1011 = vmatpush.msra.mxu0 %v3561_v43  ;;  %1123 = vmatpush.msra.mxu2 %v3559_v58 }
 0x255   :  { %1243 = vmatpush.msrb.mxu1 %v3461_v46  ;;  %1128 = vmatpush.msrb.mxu3 %v3441_v32 }
 0x256   :  { %1220 = vmatpush.msrb.mxu0 %v3345_v0 }
 0x257   :  { %1244 = vmatpush.msrb.mxu1 %v3469_v9  ;;  %1129 = vmatpush.msrb.mxu3 %v3447_v22 }
 0x258   :  { %1221 = vmatpush.msrb.mxu0 %v3349_v44 }
 0x259   :  { %1245 = vmatpush.msrb.mxu1 %v3477_v18  ;;  %1130 = vmatpush.msrb.mxu3 %v3455_v34 }
 0x25a   :  { %1222 = vmatpush.msrb.mxu0 %v3354_v45 }
 0x25b   :  { %1246 = vmatpush.msrb.mxu1 %v3485_v31  ;;  %1131 = vmatpush.msrb.mxu3 %v3463_v57 }
 0x25c   :  { %1223 = vmatpush.msrb.mxu0 %v3359_v49 }
 0x25d   :  { %1247 = vmatpush.msrb.mxu1 %v3493_v36  ;;  %1132 = vmatpush.msrb.mxu3 %v3471_v2 }
 0x25e   :  { %1224 = vmatpush.msrb.mxu0 %v3364_v50 }
 0x25f   :  { %1248 = vmatpush.msrb.mxu1 %v3501_v39  ;;  %1133 = vmatpush.msrb.mxu3 %v3479_v23 }
 0x260   :  { %1225 = vmatpush.msrb.mxu0 %v3369_v54 }
 0x261   :  { %1249 = vmatpush.msrb.mxu1 %v3509_v7  ;;  %1134 = vmatpush.msrb.mxu3 %v3487_v40 }
 0x262   :  { %1226 = vmatpush.msrb.mxu0 %v3374_v60 }
 0x263   :  { %1250 = vmatpush.msrb.mxu1 %v3517_v52  ;;  %1135 = vmatpush.msrb.mxu3 %v3495_v37 }
 0x264   :  { %1227 = vmatpush.msrb.mxu0 %v3379_v62 }
 0x265   :  { %1251 = vmatpush.msrb.mxu1 %v3525_v59  ;;  %1136 = vmatpush.msrb.mxu3 %v3503_v42 }
 0x266   :  { %1228 = vmatpush.msrb.mxu0 %v3384_v4 }
 0x267   :  { %1252 = vmatpush.msrb.mxu1 %v3533_v10  ;;  %1137 = vmatpush.msrb.mxu3 %v3511_v48 }
 0x268   :  { %1229 = vmatpush.msrb.mxu0 %v3389_v12 }
 0x269   :  { %1253 = vmatpush.msrb.mxu1 %v3541_v6  ;;  %1138 = vmatpush.msrb.mxu3 %v3519_v53 }
 0x26a   :  { %1230 = vmatpush.msrb.mxu0 %v3394_v20 }
 0x26b   :  { %1254 = vmatpush.msrb.mxu1 %v3549_v16  ;;  %1139 = vmatpush.msrb.mxu3 %v3527_v8 }
 0x26c   :  { %1231 = vmatpush.msrb.mxu0 %v3399_v26  ;;  %v307_v26 = vadd.f32 %v3322_v51, %v3262_v27 }
 0x26d   :  { %1255 = vmatpush.msrb.mxu1 %v3559_v58  ;;  %1140 = vmatpush.msrb.mxu3 %v3535_v41 }
 0x26e   :  { %1232 = vmatpush.msrb.mxu0 %v3404_v1 }
 0x26f   :  { %1141 = vmatpush.msrb.mxu3 %v3543_v35 }
 0x270   :  { %1233 = vmatpush.msrb.mxu0 %v3409_v5 }
 0x271   :  { %1142 = vmatpush.msrb.mxu3 %v3551_v63 }
 0x272   :  { %1234 = vmatpush.msrb.mxu0 %v3414_v17 }
 0x273   :  { %1143 = vmatpush.msrb.mxu3 %v3561_v43 }
 0x274   :  { %1235 = vmatpush.msrb.mxu0 %v3420_v14 }
 0x2ca   :  { %v861_v56 = vpop.f32.mrf.mxu0 }
 0x2cb   :  { %v893_v11 = vadd.f32 %v861_v56, %v304_v3  ;;  %v881_v3 = vpop.f32.mrf.mxu1 }
 0x2cc   :  { %v898_v47 = vadd.f32 %v3279_v33, %v881_v3 }
 0x2d0   :  { %v841_v13 = vpop.f32.mrf.mxu3 }
 0x2d1   :  { %v888_v55 = vadd.f32 %v841_v13, %v263_v21  ;;  %v894_v13 = vmul.f32 0.5, %v893_v11 }
 0x2d3   :  { %v889_v15 = vmul.f32 0.5, %v888_v55 }
 0x2d5   :  { %2485 = vtanh.f32 %v889_v15 }
 0x2d6   :  { %2487 = vtanh.f32 %v894_v13 }
 0x2db   :  { %v2486_v56 = vpop.eup %2485 }
 0x2dc   :  { %v891_v21 = vmul.f32 0.5, %v2486_v56  ;;  %v2488_v0 = vpop.eup %2487 }
 0x2dd   :  { %v896_v15 = vmul.f32 0.5, %v2488_v0 }
 0x2de   :  { %v892_v55 = vadd.f32 0.5, %v891_v21 }
 0x2df   :  { %v897_v13 = vadd.f32 0.5, %v896_v15 }
 0x2e0   :  { %v899_v44 = vmul.f32 %v898_v47, %v892_v55  ;;  %v4429_v55 = vld [vmem:[#allocation31_spill] sm:$0xff] }
 0x2e1   :  { %v902_v56 = vsub.f32 1.0, %v897_v13  ;;  %v310_v0 = vadd.f32 %v4429_v55, %v3262_v27  ;;  %v1471_v55 = vld [vmem:[#allocation12 + $0xb8] sm:$0xff] }
 0x2e2   :  { %v900_v11 = vadd.f32 %v899_v44, %v3286_v61 }
 0x2e4   :  { %2489 = vtanh.f32 %v900_v11  ;;  %v1448_v11 = vld [vmem:[#allocation12] sm:$0xff] }
 0x2ea   :  { %v2490_v61 = vpop.eup %2489 }
 0x2eb   :  { %v903_v3 = vsub.f32 %v2490_v61, %v3434_v30 }
 0x2ed   :  { %v904_v21 = vmul.f32 %v903_v3, %v902_v56 }
 0x2ef   :  { %v3604_v47 = vadd.f32 %v904_v21, %v3434_v30 }
 0x2f1   :  { %972 = vmatmul.f32.vlgmr.msrb.gmra.mxu2 %v3604_v47  ;;  %992 = vmatmul.f32.vlgmr.msra.gmra.mxu3 %v3604_v47 }
 0x2f2   :  { %1012 = vmatmul.f32.vlgmr.msra.gmra.mxu0 %v3604_v47  ;;  %1260 = vmatpush.msrb.mxu2 %v3441_v32 }
 0x2f3   :  { %1372 = vmatpush.msra.mxu0 %v3439_v24 }
 0x2f4   :  { %1261 = vmatpush.msrb.mxu2 %v3447_v22 }
 0x2f5   :  { %1373 = vmatpush.msra.mxu0 %v3445_v38 }
 0x2f6   :  { %1262 = vmatpush.msrb.mxu2 %v3455_v34 }
 0x2f7   :  { %1374 = vmatpush.msra.mxu0 %v3453_v29 }
 0x2f8   :  { %1263 = vmatpush.msrb.mxu2 %v3463_v57 }
 0x2f9   :  { %1375 = vmatpush.msra.mxu0 %v3461_v46 }
 0x2fa   :  { %1264 = vmatpush.msrb.mxu2 %v3471_v2 }
 0x2fb   :  { %1376 = vmatpush.msra.mxu0 %v3469_v9 }
 0x2fc   :  { %1265 = vmatpush.msrb.mxu2 %v3479_v23 }
 0x2fd   :  { %1377 = vmatpush.msra.mxu0 %v3477_v18 }
 0x2fe   :  { %1266 = vmatpush.msrb.mxu2 %v3487_v40 }
 0x2ff   :  { %1378 = vmatpush.msra.mxu0 %v3485_v31 }
 0x300   :  { %1267 = vmatpush.msrb.mxu2 %v3495_v37 }
 0x301   :  { %1379 = vmatpush.msra.mxu0 %v3493_v36 }
 0x302   :  { %1268 = vmatpush.msrb.mxu2 %v3503_v42 }
 0x303   :  { %1380 = vmatpush.msra.mxu0 %v3501_v39 }
 0x304   :  { %1269 = vmatpush.msrb.mxu2 %v3511_v48 }
 0x305   :  { %1381 = vmatpush.msra.mxu0 %v3509_v7 }
 0x306   :  { %1270 = vmatpush.msrb.mxu2 %v3519_v53 }
 0x307   :  { %1382 = vmatpush.msra.mxu0 %v3517_v52 }
 0x308   :  { %1271 = vmatpush.msrb.mxu2 %v3527_v8 }
 0x309   :  { %1383 = vmatpush.msra.mxu0 %v3525_v59 }
 0x30a   :  { %1272 = vmatpush.msrb.mxu2 %v3535_v41 }
 0x30b   :  { %1384 = vmatpush.msra.mxu0 %v3533_v10  ;;  %v1451_v10 = vld [vmem:[#allocation12 + $0x18] sm:$0xff] }
 0x30c   :  { %1273 = vmatpush.msrb.mxu2 %v3543_v35 }
 0x30d   :  { %1385 = vmatpush.msra.mxu0 %v3541_v6 }
 0x30e   :  { %1274 = vmatpush.msrb.mxu2 %v3551_v63 }
 0x30f   :  { %1386 = vmatpush.msra.mxu0 %v3549_v16 }
 0x310   :  { %1275 = vmatpush.msrb.mxu2 %v3561_v43 }
 0x311   :  { %1387 = vmatpush.msra.mxu0 %v3559_v58 }
 0x36f   :  { %v1013_v6 = vpop.f32.mrf.mxu0 }
 0x370   :  { %v1030_v9 = vadd.f32 %v3279_v33, %v1013_v6 }
 0x374   :  { %v973_v1 = vpop.f32.mrf.mxu2  ;;  %v993_v5 = vpop.f32.mrf.mxu3 }
 0x375   :  { %v1020_v17 = vadd.f32 %v973_v1, %v3257_v19  ;;  %v1025_v14 = vadd.f32 %v993_v5, %v307_v26  ;;  %v4430_v5 = vld [vmem:[#allocation29_spill] sm:$0xff] }
 0x377   :  { %v1021_v24 = vmul.f32 0.5, %v1020_v17  ;;  %v1026_v38 = vmul.f32 0.5, %v1025_v14 }
 0x379   :  { %2491 = vtanh.f32 %v1021_v24 }
 0x37a   :  { %2493 = vtanh.f32 %v1026_v38 }
 0x37f   :  { %v2492_v29 = vpop.eup %2491 }
 0x380   :  { %v1023_v46 = vmul.f32 0.5, %v2492_v29  ;;  %v2494_v18 = vpop.eup %2493 }
 0x381   :  { %v1028_v51 = vmul.f32 0.5, %v2494_v18  ;;  %v1349_v18 = vld [vmem:[#allocation9 + $0x168] sm:$0xff] }
 0x382   :  { %v1024_v16 = vadd.f32 0.5, %v1023_v46  ;;  %1352 = vmatpush.msra.mxu3 %v1349_v18  ;;  %v1455_v18 = vld [vmem:[#allocation12 + $0x38] sm:$0xff] }
 0x383   :  { %v1029_v36 = vadd.f32 0.5, %v1028_v51  ;;  %v1495_v51 = vld [vmem:[#allocation12 + $0x178] sm:$0xff] }
 0x384   :  { %v1031_v58 = vmul.f32 %v1030_v9, %v1024_v16  ;;  %v4432_v16 = vld [vmem:[#allocation35_spill] sm:$0xff] }
 0x385   :  { %v1034_v19 = vsub.f32 1.0, %v1029_v36  ;;  %v3711_v36 = vld [vmem:[#allocation13 + $0x108] sm:$0xff] }
 0x386   :  { %v1032_v31 = vadd.f32 %v1031_v58, %v3289_v28  ;;  %v1493_v28 = vld [vmem:[#allocation12 + $0x168] sm:$0xff] }
 0x387   :  { %v1346_v58 = vld [vmem:[#allocation9 + $0x150] sm:$0xff] }
 0x388   :  { %2495 = vtanh.f32 %v1032_v31  ;;  %1353 = vmatpush.msra.mxu3 %v1346_v58  ;;  %v1494_v31 = vld [vmem:[#allocation12 + $0x170] sm:$0xff]  ;;  %v1456_v58 = vld [vmem:[#allocation12 + $0x40] sm:$0xff] }
 0x38a   :  { %1354 = vmatpush.msra.mxu3 %v3354_v45  ;;  %v1316_v45 = vld [vmem:[#allocation9 + $0x60] sm:$0xff] }
 0x38c   :  { %1355 = vmatpush.msra.mxu3 %v3359_v49  ;;  %v3699_v49 = vld [vmem:[#allocation13 + $0x168] sm:$0xff] }
 0x38e   :  { %v2496_v39 = vpop.eup %2495  ;;  %1356 = vmatpush.msra.mxu3 %v3364_v50  ;;  %v1313_v50 = vld [vmem:[#allocation9 + $0x48] sm:$0xff] }
 0x38f   :  { %v1035_v7 = vsub.f32 %v2496_v39, %v3604_v47  ;;  %v1491_v39 = vld [vmem:[#allocation12 + $0x158] sm:$0xff] }
 0x390   :  { %1357 = vmatpush.msra.mxu3 %v3369_v54  ;;  %v3702_v54 = vld [vmem:[#allocation13 + $0x150] sm:$0xff] }
 0x391   :  { %v1036_v52 = vmul.f32 %v1035_v7, %v1034_v19  ;;  %v1492_v19 = vld [vmem:[#allocation12 + $0x160] sm:$0xff]  ;;  %v3714_v7 = vld [vmem:[#allocation13 + $0xf0] sm:$0xff] }
 0x392   :  { %1358 = vmatpush.msra.mxu3 %v3374_v60  ;;  %v1310_v60 = vld [vmem:[#allocation9 + $0x30] sm:$0xff] }
 0x393   :  { %v3651_v59 = vadd.f32 %v1036_v52, %v3604_v47  ;;  %v1488_v52 = vld [vmem:[#allocation12 + $0x140] sm:$0xff] }
 0x394   :  { %1359 = vmatpush.msra.mxu3 %v3379_v62  ;;  %v3705_v62 = vld [vmem:[#allocation13 + $0x138] sm:$0xff] }
 0x395   :  { %1104 = vmatmul.f32.vlgmr.msra.gmra.mxu1 %v3651_v59  ;;  %1124 = vmatmul.f32.vlgmr.msra.gmra.mxu2 %v3651_v59 }
 0x396   :  { %1144 = vmatmul.f32.vlgmr.msrb.gmra.mxu3 %v3651_v59  ;;  %1392 = vmatpush.msra.mxu1 %v3441_v32  ;;  %v1490_v32 = vld [vmem:[#allocation12 + $0x150] sm:$0xff] }
 0x397   :  { %1504 = vmatpush.msra.mxu2 %v1493_v28  ;;  %1360 = vmatpush.msra.mxu3 %v3384_v4  ;;  %v1307_v4 = vld [vmem:[#allocation9 + $0x18] sm:$0xff]  ;;  %v1489_v28 = vld [vmem:[#allocation12 + $0x148] sm:$0xff] }
 0x398   :  { %1393 = vmatpush.msra.mxu1 %v3447_v22  ;;  %v1487_v22 = vld [vmem:[#allocation12 + $0x138] sm:$0xff] }
 0x399   :  { %1505 = vmatpush.msra.mxu2 %v1490_v32  ;;  %1361 = vmatpush.msra.mxu3 %v3389_v12  ;;  %v3708_v12 = vld [vmem:[#allocation13 + $0x120] sm:$0xff]  ;;  %v3717_v32 = vld [vmem:[#allocation13 + $0xd8] sm:$0xff] }
 0x39a   :  { %1394 = vmatpush.msra.mxu1 %v3455_v34  ;;  %v1484_v34 = vld [vmem:[#allocation12 + $0x120] sm:$0xff] }
 0x39b   :  { %1506 = vmatpush.msra.mxu2 %v1487_v22  ;;  %1362 = vmatpush.msra.mxu3 %v3394_v20  ;;  %v1304_v20 = vld [vmem:[#allocation9] sm:$0xff]  ;;  %v1485_v22 = vld [vmem:[#allocation12 + $0x128] sm:$0xff] }
 0x39c   :  { %1395 = vmatpush.msra.mxu1 %v3463_v57  ;;  %v1481_v57 = vld [vmem:[#allocation12 + $0x108] sm:$0xff] }
 0x39d   :  { %1507 = vmatpush.msra.mxu2 %v1484_v34  ;;  %1363 = vmatpush.msra.mxu3 %v1316_v45  ;;  %v1486_v34 = vld [vmem:[#allocation12 + $0x130] sm:$0xff] }
 0x39e   :  { %1396 = vmatpush.msra.mxu1 %v3471_v2  ;;  %v1478_v2 = vld [vmem:[#allocation12 + $0xf0] sm:$0xff] }
 0x39f   :  { %1508 = vmatpush.msra.mxu2 %v1481_v57  ;;  %1364 = vmatpush.msra.mxu3 %v1313_v50  ;;  %v3720_v57 = vld [vmem:[#allocation13 + $0xc0] sm:$0xff] }
 0x3a0   :  { %1397 = vmatpush.msra.mxu1 %v3479_v23  ;;  %v1475_v23 = vld [vmem:[#allocation12 + $0xd8] sm:$0xff]  ;;  %v1452_v50 = vld [vmem:[#allocation12 + $0x20] sm:$0xff] }
 0x3a1   :  { %1509 = vmatpush.msra.mxu2 %v1478_v2  ;;  %1365 = vmatpush.msra.mxu3 %v1310_v60  ;;  %v1482_v2 = vld [vmem:[#allocation12 + $0x110] sm:$0xff]  ;;  %v1453_v60 = vld [vmem:[#allocation12 + $0x28] sm:$0xff] }
 0x3a2   :  { %1398 = vmatpush.msra.mxu1 %v3487_v40  ;;  %v1460_v40 = vld [vmem:[#allocation12 + $0x60] sm:$0xff] }
 0x3a3   :  { %1510 = vmatpush.msra.mxu2 %v1475_v23  ;;  %1366 = vmatpush.msra.mxu3 %v1307_v4  ;;  %v1483_v23 = vld [vmem:[#allocation12 + $0x118] sm:$0xff]  ;;  %v1449_v4 = vld [vmem:[#allocation12 + $0x8] sm:$0xff] }
 0x3a4   :  { %1399 = vmatpush.msra.mxu1 %v3495_v37 }
 0x3a5   :  { %1367 = vmatpush.msra.mxu3 %v1304_v20  ;;  %v1450_v20 = vld [vmem:[#allocation12 + $0x10] sm:$0xff] }
 0x3a6   :  { %1400 = vmatpush.msra.mxu1 %v3503_v42 }
 0x3a7   :  { %1545 = vmatpush.msrb.mxu3 %v1494_v31 }
 0x3a8   :  { %1401 = vmatpush.msra.mxu1 %v3511_v48  ;;  %v1457_v48 = vld [vmem:[#allocation12 + $0x48] sm:$0xff] }
 0x3a9   :  { %1546 = vmatpush.msrb.mxu3 %v1491_v39 }
 0x3aa   :  { %1402 = vmatpush.msra.mxu1 %v3519_v53  ;;  %v1454_v53 = vld [vmem:[#allocation12 + $0x30] sm:$0xff] }
 0x3ab   :  { %1547 = vmatpush.msrb.mxu3 %v1488_v52  ;;  %v3753_v52 = vld [vmem:[%s4384_s4] ss:$0 sm:$0xff] }
 0x3ac   :  { %1403 = vmatpush.msra.mxu1 %v3527_v8 }
 0x3ad   :  { %1548 = vmatpush.msrb.mxu3 %v1485_v22 }
 0x3ae   :  { %1404 = vmatpush.msra.mxu1 %v3535_v41  ;;  %v1472_v41 = vld [vmem:[#allocation12 + $0xc0] sm:$0xff] }
 0x3af   :  { %1511 = vmatpush.msra.mxu2 %v1472_v41  ;;  %v3723_v41 = vld [vmem:[#allocation13 + $0xa8] sm:$0xff]  ;;  %1549 = vmatpush.msrb.mxu3 %v1482_v2  ;;  %v4438_v2 = vld [vmem:[#allocation30_spill] sm:$0xff] }
 0x3b0   :  { %1405 = vmatpush.msra.mxu1 %v3543_v35  ;;  %v1469_v35 = vld [vmem:[#allocation12 + $0xa8] sm:$0xff] }
 0x3b1   :  { %1512 = vmatpush.msra.mxu2 %v1469_v35  ;;  %v1479_v35 = vld [vmem:[#allocation12 + $0xf8] sm:$0xff] }
 0x3b2   :  { %1406 = vmatpush.msra.mxu1 %v3551_v63  ;;  %v1466_v63 = vld [vmem:[#allocation12 + $0x90] sm:$0xff]  ;;  %1550 = vmatpush.msrb.mxu3 %v1479_v35 }
 0x3b3   :  { %1513 = vmatpush.msra.mxu2 %v1466_v63  ;;  %v1480_v63 = vld [vmem:[#allocation12 + $0x100] sm:$0xff] }
 0x3b4   :  { %1407 = vmatpush.msra.mxu1 %v3561_v43  ;;  %v1463_v43 = vld [vmem:[#allocation12 + $0x78] sm:$0xff] }
 0x3b5   :  { %1514 = vmatpush.msra.mxu2 %v1463_v43  ;;  %v3726_v43 = vld [vmem:[#allocation13 + $0x90] sm:$0xff] }
 0x3b7   :  { %1515 = vmatpush.msra.mxu2 %v1460_v40  ;;  %v1476_v40 = vld [vmem:[#allocation12 + $0xe0] sm:$0xff] }
 0x3b8   :  { %1551 = vmatpush.msrb.mxu3 %v1476_v40 }
 0x3b9   :  { %1516 = vmatpush.msra.mxu2 %v1457_v48  ;;  %v1473_v48 = vld [vmem:[#allocation12 + $0xc8] sm:$0xff] }
 0x3ba   :  { %1552 = vmatpush.msrb.mxu3 %v1473_v48 }
 0x3bb   :  { %1517 = vmatpush.msra.mxu2 %v1454_v53  ;;  %v1474_v53 = vld [vmem:[#allocation12 + $0xd0] sm:$0xff] }
 0x3bd   :  { %1518 = vmatpush.msra.mxu2 %v1451_v10  ;;  %v1470_v10 = vld [vmem:[#allocation12 + $0xb0] sm:$0xff] }
 0x3be   :  { %1553 = vmatpush.msrb.mxu3 %v1470_v10 }
 0x3bf   :  { %1519 = vmatpush.msra.mxu2 %v1448_v11  ;;  %v1468_v11 = vld [vmem:[#allocation12 + $0xa0] sm:$0xff] }
 0x412   :  { %v1105_v37 = vpop.f32.mrf.mxu1 }
 0x413   :  { %v1152_v42 = vadd.f32 %v1105_v37, %v3260_v25  ;;  %v1477_v37 = vld [vmem:[#allocation12 + $0xe8] sm:$0xff] }
 0x415   :  { %v1153_v8 = vmul.f32 0.5, %v1152_v42  ;;  %v3729_v42 = vld [vmem:[#allocation13 + $0x78] sm:$0xff] }
 0x417   :  { %2497 = vtanh.f32 %v1153_v8  ;;  %v3732_v8 = vld [vmem:[#allocation13 + $0x60] sm:$0xff] }
 0x418   :  { %v1125_v44 = vpop.f32.mrf.mxu2 }
 0x419   :  { %v1157_v15 = vadd.f32 %v1125_v44, %v310_v0  ;;  %v1145_v25 = vpop.f32.mrf.mxu3  ;;  %v3735_v0 = vld [vmem:[#allocation13 + $0x48] sm:$0xff]  ;;  %v1467_v44 = vld [vmem:[#allocation12 + $0x98] sm:$0xff] }
 0x41a   :  { %v1162_v21 = vadd.f32 %v3279_v33, %v1145_v25  ;;  %v4431_v33 = vld [vmem:[#allocation28_spill] sm:$0xff]  ;;  %1554 = vmatpush.msrb.mxu3 %v1467_v44  ;;  %v3741_v25 = vld [vmem:[#allocation13 + $0x18] sm:$0xff] }
 0x41b   :  { %v1158_v13 = vmul.f32 0.5, %v1157_v15  ;;  %v3738_v15 = vld [vmem:[#allocation13 + $0x30] sm:$0xff]  ;;  %4434 = vst [vmem:[#allocation29_spill] sm:$0xff] %v3741_v25  ;;  %v3767_v44 = vld [vmem:[#allocation13 + $0x158] sm:$0xff] }
 0x41c   :  { %4433 = vst [vmem:[#allocation31_spill] sm:$0xff] %v3738_v15 }
 0x41d   :  { %v2498_v61 = vpop.eup %2497  ;;  %2499 = vtanh.f32 %v1158_v13  ;;  %v1464_v13 = vld [vmem:[#allocation12 + $0x80] sm:$0xff] }
 0x41e   :  { %v1155_v56 = vmul.f32 0.5, %v2498_v61  ;;  %v1465_v61 = vld [vmem:[#allocation12 + $0x88] sm:$0xff]  ;;  %1555 = vmatpush.msrb.mxu3 %v1464_v13 }
 0x41f   :  { %v3776_v13 = vld [vmem:[#allocation13 + $0x128] sm:$0xff] }
 0x420   :  { %v1156_v3 = vadd.f32 0.5, %v1155_v56  ;;  %v4435_v56 = vld [vmem:[#allocation32_spill] sm:$0xff] }
 0x422   :  { %v1163_v26 = vmul.f32 %v1162_v21, %v1156_v3  ;;  %v313_v3 = vadd.f32 %v4435_v56, %v3262_v27  ;;  %v4439_v56 = vmov 0.0  }
 0x423   :  { %v2500_v1 = vpop.eup %2499 }
 0x424   :  { %v1164_v17 = vadd.f32 %v1163_v26, %v4430_v5  ;;  %v1160_v14 = vmul.f32 0.5, %v2500_v1  ;;  %v1461_v1 = vld [vmem:[#allocation12 + $0x68] sm:$0xff]  ;;  %v1462_v5 = vld [vmem:[#allocation12 + $0x70] sm:$0xff] }
 0x425   :  { %1556 = vmatpush.msrb.mxu3 %v1461_v1  ;;  %v3808_v1 = vld [vmem:[#allocation13 + $0x98] sm:$0xff] }
 0x426   :  { %2501 = vtanh.f32 %v1164_v17  ;;  %v1161_v24 = vadd.f32 0.5, %v1160_v14  ;;  %v3746_v17 = vld [vmem:[#allocation13] sm:$0xff]  ;;  %v4437_v14 = vld [vmem:[#allocation25_spill] sm:$0xff] }
 0x427   :  { %4436 = vst [vmem:[#allocation28_spill] sm:$0xff] %v3746_v17 }
 0x428   :  { %v1166_v29 = vsub.f32 1.0, %v1161_v24 }
 0x42c   :  { %v2502_v38 = vpop.eup %2501 }
 0x42d   :  { %v1167_v6 = vsub.f32 %v2502_v38, %v3651_v59 }
 0x42f   :  { %v1168_v46 = vmul.f32 %v1167_v6, %v1166_v29  ;;  %v1458_v6 = vld [vmem:[#allocation12 + $0x50] sm:$0xff] }
 0x430   :  { %1557 = vmatpush.msrb.mxu3 %v1458_v6  ;;  %v3838_v6 = vld [vmem:[#allocation13 + $0x20] sm:$0xff] }
 0x431   :  { %v3679_v9 = vadd.f32 %v1168_v46, %v3651_v59  ;;  %v1459_v46 = vld [vmem:[#allocation12 + $0x58] sm:$0xff]  ;;  %4441 = vst [vmem:[#allocation32_spill] sm:$0xff] %v3838_v6 }
 0x432   :  { %1558 = vmatpush.msrb.mxu3 %v1455_v18  ;;  %v3852_v18 = vld [vmem:[#allocation13 + $0x130] sm:$0xff] }
 0x433   :  { %1236 = vmatmul.f32.vlgmr.msrb.gmra.mxu0 %v3679_v9  ;;  %1256 = vmatmul.f32.vlgmr.msrb.gmra.mxu1 %v3679_v9 }
 0x434   :  { %1276 = vmatmul.f32.vlgmr.msrb.gmra.mxu2 %v3679_v9  ;;  %1699 = vmatpush.msrb.mxu1 %v3699_v49 }
 0x435   :  { %1586 = vmatpush.msrb.mxu0 %v1495_v51  ;;  %1559 = vmatpush.msrb.mxu3 %v1452_v50  ;;  %v3918_v50 = vld [vmem:[#allocation13 + $0xa0] sm:$0xff] }
 0x436   :  { %1700 = vmatpush.msrb.mxu1 %v3702_v54 }
 0x437   :  { %1587 = vmatpush.msrb.mxu0 %v1492_v19  ;;  %1560 = vmatpush.msrb.mxu3 %v1449_v4  ;;  %v3928_v4 = vld [vmem:[#allocation13 + $0x70] sm:$0xff] }
 0x438   :  { %1701 = vmatpush.msrb.mxu1 %v3705_v62 }
 0x439   :  { %1588 = vmatpush.msrb.mxu0 %v1489_v28 }
 0x43a   :  { %1702 = vmatpush.msrb.mxu1 %v3708_v12 }
 0x43b   :  { %1589 = vmatpush.msrb.mxu0 %v1486_v34 }
 0x43c   :  { %1520 = vmatmul.f32.vlgmr.msra.gmra.mxu2 %v4431_v33  ;;  %1703 = vmatpush.msrb.mxu1 %v3711_v36 }
 0x43d   :  { %1590 = vmatpush.msrb.mxu0 %v1483_v23 }
 0x43e   :  { %1704 = vmatpush.msrb.mxu1 %v3714_v7 }
 0x43f   :  { %1591 = vmatpush.msrb.mxu0 %v1480_v63 }
 0x440   :  { %1705 = vmatpush.msrb.mxu1 %v3717_v32 }
 0x441   :  { %1592 = vmatpush.msrb.mxu0 %v1477_v37 }
 0x442   :  { %1706 = vmatpush.msrb.mxu1 %v3720_v57 }
 0x443   :  { %1593 = vmatpush.msrb.mxu0 %v1474_v53 }
 0x444   :  { %1523 = vmatmul.f32.gmra.mxu2 %v4432_v16  ;;  %1707 = vmatpush.msrb.mxu1 %v3723_v41 }
 0x445   :  { %1594 = vmatpush.msrb.mxu0 %v1471_v55  ;;  %v3761_v55 = vld [vmem:[#allocation13 + $0x170] sm:$0xff] }
 0x446   :  { %1708 = vmatpush.msrb.mxu1 %v3726_v43 }
 0x447   :  { %1595 = vmatpush.msrb.mxu0 %v1468_v11  ;;  %v3771_v11 = vld [vmem:[#allocation13 + $0x140] sm:$0xff] }
 0x448   :  { %1709 = vmatpush.msrb.mxu1 %v3729_v42 }
 0x449   :  { %1596 = vmatpush.msrb.mxu0 %v1465_v61  ;;  %v3781_v61 = vld [vmem:[#allocation13 + $0x110] sm:$0xff] }
 0x44a   :  { %1710 = vmatpush.msrb.mxu1 %v3732_v8 }
 0x44b   :  { %1597 = vmatpush.msrb.mxu0 %v1462_v5  ;;  %v3813_v5 = vld [vmem:[#allocation13 + $0x80] sm:$0xff] }
 0x44c   :  { %1526 = vmatmul.f32.gmra.mxu2 %v3434_v30  ;;  %1711 = vmatpush.msrb.mxu1 %v3735_v0 }
 0x44d   :  { %1598 = vmatpush.msrb.mxu0 %v1459_v46  ;;  %v3840_v46 = vld [vmem:[#allocation13 + $0x148] sm:$0xff] }
 0x44e   :  { %1712 = vmatpush.msrb.mxu1 %v3738_v15 }
 0x44f   :  { %1599 = vmatpush.msrb.mxu0 %v1456_v58  ;;  %v3860_v58 = vld [vmem:[#allocation13 + $0x118] sm:$0xff] }
 0x450   :  { %1713 = vmatpush.msrb.mxu1 %v3741_v25 }
 0x451   :  { %1600 = vmatpush.msrb.mxu0 %v1453_v60  ;;  %v3923_v60 = vld [vmem:[#allocation13 + $0x88] sm:$0xff] }
 0x452   :  { %1714 = vmatpush.msrb.mxu1 %v3746_v17 }
 0x453   :  { %1601 = vmatpush.msrb.mxu0 %v1450_v20 }
 0x454   :  { %1529 = vmatmul.f32.gmra.mxu2 %v3604_v47 }
 0x45c   :  { %1532 = vmatmul.f32.gmra.mxu2 %v3651_v59 }
 0x464   :  { %1535 = vmatmul.f32.gmra.mxu2 %v3679_v9 }
 0x4b0   :  { %v1237_v21 = vpop.f32.mrf.mxu0  ;;  %v1257_v26 = vpop.f32.mrf.mxu1 }
 0x4b1   :  { %v1284_v24 = vadd.f32 %v1237_v21, %v4437_v14  ;;  %v1289_v38 = vadd.f32 %v1257_v26, %v313_v3  ;;  %v3788_v3 = vld [vmem:[#allocation13 + $0xf8] sm:$0xff]  ;;  %v3792_v21 = vld [vmem:[#allocation13 + $0xe0] sm:$0xff]  ;;  %v3797_v26 = vld [vmem:[#allocation13 + $0xc8] sm:$0xff] }
 0x4b2   :  { %v3818_v14 = vld [vmem:[#allocation13 + $0x68] sm:$0xff] }
 0x4b3   :  { %v1285_v29 = vmul.f32 0.5, %v1284_v24  ;;  %v1290_v45 = vmul.f32 0.5, %v1289_v38  ;;  %v3829_v24 = vld [vmem:[#allocation13 + $0x38] sm:$0xff] }
 0x4b4   :  { %4440 = vst [vmem:[#allocation35_spill] sm:$0xff] %v3829_v24  ;;  %v3831_v38 = vld [vmem:[#allocation13 + $0x178] sm:$0xff] }
 0x4b5   :  { %2503 = vtanh.f32 %v1285_v29  ;;  %v3833_v29 = vld [vmem:[#allocation13 + $0x160] sm:$0xff]  ;;  %1739 = vmatpush.msrb.mxu2 %v3831_v38 }
 0x4b6   :  { %2505 = vtanh.f32 %v1290_v45  ;;  %v3913_v45 = vld [vmem:[#allocation13 + $0xb8] sm:$0xff] }
 0x4b7   :  { %v1277_v51 = vpop.f32.mrf.mxu2  ;;  %1740 = vmatpush.msrb.mxu2 %v3833_v29 }
 0x4b8   :  { %v1294_v28 = vadd.f32 %v3753_v52, %v1277_v51 }
 0x4b9   :  { %1741 = vmatpush.msrb.mxu2 %v3840_v46 }
 0x4bb   :  { %v2504_v31 = vpop.eup %2503  ;;  %1742 = vmatpush.msrb.mxu2 %v3852_v18 }
 0x4bc   :  { %v1287_v39 = vmul.f32 0.5, %v2504_v31  ;;  %v2506_v22 = vpop.eup %2505  ;;  %v4443_v31 = vld [vmem:[#allocation33_spill] sm:$0xff] }
 0x4bd   :  { %v1292_v35 = vmul.f32 0.5, %v2506_v22  ;;  %1743 = vmatpush.msrb.mxu2 %v3860_v58  ;;  %v316_v51 = vadd.f32 %v4443_v31, %v3262_v27  ;;  %v3949_v27 = vld [vmem:[#allocation13 + $0x28] sm:$0xff] }
 0x4be   :  { %v1288_v19 = vadd.f32 0.5, %v1287_v39  ;;  %4445 = vst [vmem:[#allocation30_spill] sm:$0xff] %v3949_v27 }
 0x4bf   :  { %v1293_v63 = vadd.f32 0.5, %v1292_v35 }
 0x4c0   :  { %v1295_v34 = vmul.f32 %v1294_v28, %v1288_v19  ;;  %v4444_v19 = vld [vmem:[#allocation26_spill] sm:$0xff] }
 0x4c1   :  { %v1298_v37 = vsub.f32 1.0, %v1293_v63  ;;  %v3954_v63 = vld [vmem:[#allocation13 + $0x10] sm:$0xff] }
 0x4c2   :  { %v1296_v23 = vadd.f32 %v1295_v34, %v4438_v2  ;;  %v3940_v2 = vld [vmem:[#allocation13 + $0x58] sm:$0xff]  ;;  %4446 = vst [vmem:[#allocation33_spill] sm:$0xff] %v3954_v63 }
 0x4c4   :  { %2507 = vtanh.f32 %v1296_v23  ;;  %v3944_v23 = vld [vmem:[#allocation13 + $0x40] sm:$0xff] }
 0x4ca   :  { %v2508_v40 = vpop.eup %2507 }
 0x4cb   :  { %v1299_v48 = vsub.f32 %v2508_v40, %v3679_v9 }
 0x4cd   :  { %v1300_v53 = vmul.f32 %v1299_v48, %v1298_v37 }
 0x4cf   :  { %v3759_v10 = vadd.f32 %v1300_v53, %v3679_v9 }
 0x4d1   :  { %1368 = vmatmul.f32.vlgmr.msra.gmra.mxu3 %v3759_v10  ;;  %1388 = vmatmul.f32.vlgmr.msra.gmra.mxu0 %v3759_v10 }
 0x4d2   :  { %1408 = vmatmul.f32.vlgmr.msra.gmra.mxu1 %v3759_v10  ;;  %1538 = vmatmul.f32.gmra.mxu2 %v3759_v10 }
 0x4d3   :  { %1719 = vmatpush.msra.mxu1 %v3761_v55  ;;  %1779 = vmatpush.msra.mxu3 %v3699_v49 }
 0x4d4   :  { %1799 = vmatpush.msra.mxu0 %v3761_v55 }
 0x4d5   :  { %1720 = vmatpush.msra.mxu1 %v3767_v44  ;;  %1780 = vmatpush.msra.mxu3 %v3702_v54 }
 0x4d6   :  { %1800 = vmatpush.msra.mxu0 %v3767_v44 }
 0x4d7   :  { %1721 = vmatpush.msra.mxu1 %v3771_v11  ;;  %1781 = vmatpush.msra.mxu3 %v3705_v62 }
 0x4d8   :  { %1801 = vmatpush.msra.mxu0 %v3771_v11 }
 0x4d9   :  { %1722 = vmatpush.msra.mxu1 %v3776_v13  ;;  %1561 = vmatmul.f32.vlgmr.msrb.gmra.mxu3 %v4431_v33 }
 0x4da   :  { %1602 = vmatmul.f32.vlgmr.msrb.gmra.mxu0 %v4431_v33  ;;  %1715 = vmatmul.f32.vlgmr.msrb.gmra.mxu1 %v4439_v56  ;;  %v3802_v33 = vld [vmem:[#allocation13 + $0xb0] sm:$0xff] }
 0x4db   :  { %1723 = vmatpush.msra.mxu1 %v3781_v61  ;;  %1782 = vmatpush.msra.mxu3 %v3708_v12 }
 0x4dc   :  { %1802 = vmatpush.msra.mxu0 %v3776_v13 }
 0x4dd   :  { %1724 = vmatpush.msra.mxu1 %v3788_v3  ;;  %1783 = vmatpush.msra.mxu3 %v3711_v36 }
 0x4de   :  { %1803 = vmatpush.msra.mxu0 %v3781_v61 }
 0x4df   :  { %1725 = vmatpush.msra.mxu1 %v3792_v21  ;;  %1784 = vmatpush.msra.mxu3 %v3714_v7 }
 0x4e0   :  { %1804 = vmatpush.msra.mxu0 %v3788_v3 }
 0x4e1   :  { %1726 = vmatpush.msra.mxu1 %v3797_v26  ;;  %1564 = vmatmul.f32.gmra.mxu3 %v4432_v16 }
 0x4e2   :  { %1605 = vmatmul.f32.gmra.mxu0 %v4432_v16  ;;  %1785 = vmatpush.msra.mxu3 %v3717_v32  ;;  %v3823_v16 = vld [vmem:[#allocation13 + $0x50] sm:$0xff] }
 0x4e3   :  { %1727 = vmatpush.msra.mxu1 %v3802_v33  ;;  %1805 = vmatpush.msra.mxu0 %v3792_v21 }
 0x4e4   :  { %1786 = vmatpush.msra.mxu3 %v3720_v57 }
 0x4e5   :  { %1728 = vmatpush.msra.mxu1 %v3808_v1  ;;  %1806 = vmatpush.msra.mxu0 %v3797_v26 }
 0x4e6   :  { %1787 = vmatpush.msra.mxu3 %v3723_v41 }
 0x4e7   :  { %1729 = vmatpush.msra.mxu1 %v3813_v5  ;;  %1807 = vmatpush.msra.mxu0 %v3802_v33 }
 0x4e8   :  { %1788 = vmatpush.msra.mxu3 %v3726_v43 }
 0x4e9   :  { %1730 = vmatpush.msra.mxu1 %v3818_v14  ;;  %1567 = vmatmul.f32.gmra.mxu3 %v3434_v30 }
 0x4ea   :  { %1608 = vmatmul.f32.gmra.mxu0 %v3434_v30  ;;  %1789 = vmatpush.msra.mxu3 %v3729_v42  ;;  %v3846_v30 = vld [vmem:[#allocation13 + $0x8] sm:$0xff] }
 0x4eb   :  { %1731 = vmatpush.msra.mxu1 %v3823_v16  ;;  %1808 = vmatpush.msra.mxu0 %v3808_v1  ;;  %4442 = vst [vmem:[#allocation25_spill] sm:$0xff] %v3846_v30 }
 0x4ec   :  { %1790 = vmatpush.msra.mxu3 %v3732_v8 }
 0x4ed   :  { %1732 = vmatpush.msra.mxu1 %v3829_v24  ;;  %1809 = vmatpush.msra.mxu0 %v3813_v5 }
 0x4ee   :  { %1791 = vmatpush.msra.mxu3 %v3735_v0 }
 0x4ef   :  { %1733 = vmatpush.msra.mxu1 %v3838_v6  ;;  %1810 = vmatpush.msra.mxu0 %v3818_v14 }
 0x4f0   :  { %1792 = vmatpush.msra.mxu3 %v3738_v15 }
 0x4f1   :  { %1734 = vmatpush.msra.mxu1 %v3846_v30  ;;  %1570 = vmatmul.f32.gmra.mxu3 %v3604_v47 }
 0x4f2   :  { %1735 = vmatmul.f32.vlgmr.msra.gmra.mxu1 %v4439_v56  ;;  %1611 = vmatmul.f32.gmra.mxu0 %v3604_v47  ;;  %v3902_v47 = vld [vmem:[#allocation13 + $0x100] sm:$0xff] }
 0x4f3   :  { %1819 = vmatpush.msrb.mxu1 %v3831_v38  ;;  %1793 = vmatpush.msra.mxu3 %v3741_v25 }
 0x4f4   :  { %1811 = vmatpush.msra.mxu0 %v3823_v16  ;;  %1744 = vmatpush.msrb.mxu2 %v3902_v47 }
 0x4f5   :  { %1820 = vmatpush.msrb.mxu1 %v3833_v29  ;;  %1794 = vmatpush.msra.mxu3 %v3746_v17 }
 0x4f6   :  { %1812 = vmatpush.msra.mxu0 %v3829_v24 }
 0x4f7   :  { %1821 = vmatpush.msrb.mxu1 %v3840_v46  ;;  %1880 = vmatpush.msrb.mxu3 %v3761_v55 }
 0x4f8   :  { %1813 = vmatpush.msra.mxu0 %v3838_v6 }
 0x4f9   :  { %1573 = vmatmul.f32.gmra.mxu3 %v3651_v59  ;;  %1822 = vmatpush.msrb.mxu1 %v3852_v18 }
 0x4fa   :  { %1614 = vmatmul.f32.gmra.mxu0 %v3651_v59  ;;  %1881 = vmatpush.msrb.mxu3 %v3767_v44  ;;  %v3907_v59 = vld [vmem:[#allocation13 + $0xe8] sm:$0xff] }
 0x4fb   :  { %1823 = vmatpush.msrb.mxu1 %v3860_v58  ;;  %1814 = vmatpush.msra.mxu0 %v3846_v30 }
 0x4fc   :  { %1882 = vmatpush.msrb.mxu3 %v3771_v11  ;;  %1745 = vmatpush.msrb.mxu2 %v3907_v59 }
 0x4fd   :  { %1900 = vmatpush.msrb.mxu0 %v3831_v38  ;;  %1824 = vmatpush.msrb.mxu1 %v3902_v47 }
 0x4fe   :  { %1883 = vmatpush.msrb.mxu3 %v3776_v13 }
 0x4ff   :  { %1901 = vmatpush.msrb.mxu0 %v3833_v29  ;;  %1825 = vmatpush.msrb.mxu1 %v3907_v59 }
 0x500   :  { %1884 = vmatpush.msrb.mxu3 %v3781_v61 }
 0x501   :  { %1902 = vmatpush.msrb.mxu0 %v3840_v46  ;;  %1576 = vmatmul.f32.gmra.mxu3 %v3679_v9 }
 0x502   :  { %1617 = vmatmul.f32.gmra.mxu0 %v3679_v9  ;;  %1885 = vmatpush.msrb.mxu3 %v3788_v3  ;;  %v3909_v9 = vld [vmem:[#allocation13 + $0xd0] sm:$0xff] }
 0x503   :  { %1903 = vmatpush.msrb.mxu0 %v3852_v18  ;;  %1746 = vmatpush.msrb.mxu2 %v3909_v9 }
 0x504   :  { %1886 = vmatpush.msrb.mxu3 %v3792_v21  ;;  %1826 = vmatpush.msrb.mxu1 %v3909_v9 }
 0x505   :  { %1904 = vmatpush.msrb.mxu0 %v3860_v58  ;;  %1747 = vmatpush.msrb.mxu2 %v3913_v45 }
 0x506   :  { %1887 = vmatpush.msrb.mxu3 %v3797_v26  ;;  %1827 = vmatpush.msrb.mxu1 %v3913_v45 }
 0x507   :  { %1905 = vmatpush.msrb.mxu0 %v3902_v47  ;;  %1748 = vmatpush.msrb.mxu2 %v3918_v50 }
 0x508   :  { %1888 = vmatpush.msrb.mxu3 %v3802_v33  ;;  %1828 = vmatpush.msrb.mxu1 %v3918_v50 }
 0x509   :  { %1579 = vmatmul.f32.gmra.mxu3 %v3759_v10  ;;  %1906 = vmatpush.msrb.mxu0 %v3907_v59 }
 0x50a   :  { %1620 = vmatmul.f32.gmra.mxu0 %v3759_v10  ;;  %1889 = vmatpush.msrb.mxu3 %v3808_v1 }
 0x50b   :  { %1907 = vmatpush.msrb.mxu0 %v3909_v9  ;;  %1749 = vmatpush.msrb.mxu2 %v3923_v60 }
 0x50c   :  { %1890 = vmatpush.msrb.mxu3 %v3813_v5  ;;  %1829 = vmatpush.msrb.mxu1 %v3923_v60 }
 0x50d   :  { %1908 = vmatpush.msrb.mxu0 %v3913_v45  ;;  %1750 = vmatpush.msrb.mxu2 %v3928_v4 }
 0x50e   :  { %1891 = vmatpush.msrb.mxu3 %v3818_v14  ;;  %1830 = vmatpush.msrb.mxu1 %v3928_v4 }
 0x50f   :  { %1909 = vmatpush.msrb.mxu0 %v3918_v50  ;;  %1751 = vmatpush.msrb.mxu2 %v3940_v2 }
 0x510   :  { %1892 = vmatpush.msrb.mxu3 %v3823_v16  ;;  %1831 = vmatpush.msrb.mxu1 %v3940_v2 }
 0x511   :  { %1910 = vmatpush.msrb.mxu0 %v3923_v60  ;;  %1752 = vmatpush.msrb.mxu2 %v3944_v23 }
 0x512   :  { %1893 = vmatpush.msrb.mxu3 %v3829_v24  ;;  %1832 = vmatpush.msrb.mxu1 %v3944_v23 }
 0x513   :  { %1911 = vmatpush.msrb.mxu0 %v3928_v4  ;;  %1753 = vmatpush.msrb.mxu2 %v3949_v27 }
 0x514   :  { %1894 = vmatpush.msrb.mxu3 %v3838_v6  ;;  %1833 = vmatpush.msrb.mxu1 %v3949_v27 }
 0x515   :  { %1912 = vmatpush.msrb.mxu0 %v3940_v2  ;;  %1754 = vmatpush.msrb.mxu2 %v3954_v63 }
 0x516   :  { %1895 = vmatpush.msrb.mxu3 %v3846_v30  ;;  %1834 = vmatpush.msrb.mxu1 %v3954_v63 }
 0x517   :  { %1913 = vmatpush.msrb.mxu0 %v3944_v23  ;;  %1860 = vmatpush.msra.mxu2 %v3699_v49 }
 0x518   :  { %1941 = vmatpush.msra.mxu1 %v3699_v49 }
 0x519   :  { %1914 = vmatpush.msrb.mxu0 %v3949_v27  ;;  %1861 = vmatpush.msra.mxu2 %v3702_v54 }
 0x51a   :  { %1942 = vmatpush.msra.mxu1 %v3702_v54 }
 0x51b   :  { %1915 = vmatpush.msrb.mxu0 %v3954_v63  ;;  %1862 = vmatpush.msra.mxu2 %v3705_v62 }
 0x51c   :  { %1943 = vmatpush.msra.mxu1 %v3705_v62 }
 0x51d   :  { %1863 = vmatpush.msra.mxu2 %v3708_v12 }
 0x51e   :  { %1944 = vmatpush.msra.mxu1 %v3708_v12 }
 0x51f   :  { %1864 = vmatpush.msra.mxu2 %v3711_v36 }
 0x520   :  { %1945 = vmatpush.msra.mxu1 %v3711_v36 }
 0x521   :  { %1865 = vmatpush.msra.mxu2 %v3714_v7 }
 0x522   :  { %1946 = vmatpush.msra.mxu1 %v3714_v7 }
 0x523   :  { %1866 = vmatpush.msra.mxu2 %v3717_v32 }
 0x524   :  { %1947 = vmatpush.msra.mxu1 %v3717_v32 }
 0x525   :  { %1867 = vmatpush.msra.mxu2 %v3720_v57 }
 0x526   :  { %1948 = vmatpush.msra.mxu1 %v3720_v57 }
 0x527   :  { %1868 = vmatpush.msra.mxu2 %v3723_v41 }
 0x528   :  { %1949 = vmatpush.msra.mxu1 %v3723_v41 }
 0x529   :  { %1869 = vmatpush.msra.mxu2 %v3726_v43 }
 0x52a   :  { %1950 = vmatpush.msra.mxu1 %v3726_v43 }
 0x52b   :  { %1870 = vmatpush.msra.mxu2 %v3729_v42 }
 0x52c   :  { %1951 = vmatpush.msra.mxu1 %v3729_v42 }
 0x52d   :  { %1871 = vmatpush.msra.mxu2 %v3732_v8 }
 0x52e   :  { %1952 = vmatpush.msra.mxu1 %v3732_v8 }
 0x52f   :  { %1872 = vmatpush.msra.mxu2 %v3735_v0 }
 0x530   :  { %1953 = vmatpush.msra.mxu1 %v3735_v0 }
 0x531   :  { %1873 = vmatpush.msra.mxu2 %v3738_v15 }
 0x532   :  { %1954 = vmatpush.msra.mxu1 %v3738_v15 }
 0x533   :  { %1874 = vmatpush.msra.mxu2 %v3741_v25 }
 0x534   :  { %1955 = vmatpush.msra.mxu1 %v3741_v25 }
 0x535   :  { %1875 = vmatpush.msra.mxu2 %v3746_v17 }
 0x536   :  { %1956 = vmatpush.msra.mxu1 %v3746_v17 }
 0x54e   :  { %v1389_v20 = vpop.f32.mrf.mxu0 }
 0x54f   :  { %v1421_v22 = vadd.f32 %v1389_v20, %v316_v51  ;;  %v1409_v37 = vpop.f32.mrf.mxu1  ;;  %v4447_v51 = vld [vmem:[#allocation27_spill] sm:$0xff] }
 0x550   :  { %v1426_v53 = vadd.f32 %v3753_v52, %v1409_v37 }
 0x551   :  { %v1422_v35 = vmul.f32 0.5, %v1421_v22 }
 0x554   :  { %v1369_v39 = vpop.f32.mrf.mxu3 }
 0x555   :  { %v1416_v28 = vadd.f32 %v1369_v39, %v4444_v19  ;;  %v4448_v39 = vld [vmem:[#allocation34_spill] sm:$0xff] }
 0x556   :  { %v357_v19 = vadd.f32 %v4448_v39, %v4447_v51  ;;  %v1496_v39 = vld [vmem:[%s4387_s7] sm:$0x7] }
 0x557   :  { %v1417_v34 = vmul.f32 0.5, %v1416_v28 }
 0x559   :  { %2509 = vtanh.f32 %v1417_v34 }
 0x55a   :  { %2511 = vtanh.f32 %v1422_v35 }
 0x55f   :  { %v2510_v40 = vpop.eup %2509 }
 0x560   :  { %v1419_v48 = vmul.f32 0.5, %v2510_v40  ;;  %v2512_v31 = vpop.eup %2511 }
 0x561   :  { %v1424_v34 = vmul.f32 0.5, %v2512_v31 }
 0x562   :  { %v1420_v20 = vadd.f32 0.5, %v1419_v48 }
 0x563   :  { %v1425_v52 = vadd.f32 0.5, %v1424_v34 }
 0x564   :  { %v1427_v28 = vmul.f32 %v1426_v53, %v1420_v20 }
 0x565   :  { %v1430_v40 = vsub.f32 1.0, %v1425_v52 }
 0x566   :  { %v1428_v22 = vadd.f32 %v1427_v28, %v357_v19  ;;  %v4025_v19 = vperm.slane %v1496_v39, 0 }
 0x568   :  { %2513 = vtanh.f32 %v1428_v22  ;;  %4453 = vst [vmem:[#allocation37_spill] sm:$0xff] %v4025_v19  ;;  %v1716_v22 = vpop.f32.mrf.mxu1 }
 0x56e   :  { %v2514_v35 = vpop.eup %2513 }
 0x56f   :  { %v1431_v37 = vsub.f32 %v2514_v35, %v3759_v10  ;;  %v4030_v35 = vperm.slane %v1496_v39, 1 }
 0x571   :  { %v1432_v48 = vmul.f32 %v1431_v37, %v1430_v40  ;;  %4455 = vst [vmem:[#allocation39_spill] sm:$0xff] %v4030_v35  ;;  %v1562_v40 = vpop.f32.mrf.mxu3 }
 0x573   :  { %v1433_v53 = vadd.f32 %v1432_v48, %v3759_v10  ;;  %v1521_v10 = vpop.f32.mrf.mxu2 }
 0x574   :  { %v1522_v34 = vadd.f32 %v1521_v10, %v4025_v19  ;;  %v4040_v10 = vld [vmem:[%s4388_s8] ss:$0 sm:$0xff] }
 0x575   :  { %1541 = vmatmul.f32.gmra.mxu2 %v1433_v53  ;;  %1582 = vmatmul.f32.gmra.mxu3 %v1433_v53 }
 0x576   :  { %1623 = vmatmul.f32.gmra.mxu0 %v1433_v53  ;;  %v1762_v52 = vadd.f32 %v1716_v22, %v1522_v34  ;;  %v1736_v53 = vpop.f32.mrf.mxu1  ;;  %v4042_v22 = vperm.slane %v1496_v39, 2  ;;  %v1603_v34 = vpop.f32.mrf.mxu0 }
 0x578   :  { %v1763_v48 = vmul.f32 0.5, %v1762_v52 }
 0x57a   :  { %2515 = vtanh.f32 %v1763_v48 }
 0x57d   :  { %1755 = vmatmul.f32.vlgmr.msrb.gmra.mxu2 %v4439_v56  ;;  %v4014_v56 = vpop.f32.mrf.mxu2 }
 0x57e   :  { %1961 = vmatpush.msrb.mxu2 %v3761_v55  ;;  %4449 = vst [vmem:[#allocation26_spill] sm:$0xff] %v4014_v56  ;;  %v1606_v39 = vpop.f32.mrf.mxu0 }
 0x580   :  { %1962 = vmatpush.msrb.mxu2 %v3767_v44 }
 0x582   :  { %1963 = vmatpush.msrb.mxu2 %v3771_v11 }
 0x584   :  { %1964 = vmatpush.msrb.mxu2 %v3776_v13 }
 0x585   :  { %v4016_v20 = vpop.f32.mrf.mxu2 }
 0x586   :  { %1965 = vmatpush.msrb.mxu2 %v3781_v61  ;;  %4450 = vst [vmem:[#allocation27_spill] sm:$0xff] %v4016_v20 }
 0x588   :  { %1966 = vmatpush.msrb.mxu2 %v3788_v3 }
 0x58a   :  { %1967 = vmatpush.msrb.mxu2 %v3792_v21 }
 0x58c   :  { %1968 = vmatpush.msrb.mxu2 %v3797_v26 }
 0x58d   :  { %v4018_v31 = vpop.f32.mrf.mxu2 }
 0x58e   :  { %1969 = vmatpush.msrb.mxu2 %v3802_v33  ;;  %4451 = vst [vmem:[#allocation34_spill] sm:$0xff] %v4018_v31 }
 0x590   :  { %1970 = vmatpush.msrb.mxu2 %v3808_v1 }
 0x592   :  { %1971 = vmatpush.msrb.mxu2 %v3813_v5 }
 0x594   :  { %1972 = vmatpush.msrb.mxu2 %v3818_v14 }
 0x595   :  { %v4020_v51 = vpop.f32.mrf.mxu2 }
 0x596   :  { %1973 = vmatpush.msrb.mxu2 %v3823_v16  ;;  %4452 = vst [vmem:[#allocation36_spill] sm:$0xff] %v4020_v51  ;;  %v1563_v51 = vadd.f32 %v1562_v40, %v4030_v35 }
 0x598   :  { %1974 = vmatpush.msrb.mxu2 %v3829_v24  ;;  %v1767_v31 = vadd.f32 %v1736_v53, %v1563_v51 }
 0x59a   :  { %1975 = vmatpush.msrb.mxu2 %v3838_v6  ;;  %v1768_v20 = vmul.f32 0.5, %v1767_v31  ;;  %v1604_v31 = vadd.f32 %v1603_v34, %v4042_v22 }
 0x59c   :  { %1976 = vmatpush.msrb.mxu2 %v3846_v30  ;;  %v2516_v30 = vpop.eup %2515  ;;  %2517 = vtanh.f32 %v1768_v20 }
 0x59d   :  { %v4027_v28 = vpop.f32.mrf.mxu2 }
 0x59e   :  { %4454 = vst [vmem:[#allocation38_spill] sm:$0xff] %v4027_v28  ;;  %v1765_v28 = vmul.f32 0.5, %v2516_v30 }
 0x5a0   :  { %v1766_v19 = vadd.f32 0.5, %v1765_v28  ;;  %v4099_v28 = vpop.f32.mrf.mxu0 }
 0x5a1   :  { %4459 = vst [vmem:[#allocation42_spill] sm:$0xff] %v4099_v28 }
 0x5a5   :  { %v4032_v37 = vpop.f32.mrf.mxu2 }
 0x5a6   :  { %4456 = vst [vmem:[#allocation40_spill] sm:$0xff] %v4032_v37  ;;  %v2518_v37 = vpop.eup %2517 }
 0x5a7   :  { %v1770_v48 = vmul.f32 0.5, %v2518_v37 }
 0x5a8   :  { %v4103_v34 = vpop.f32.mrf.mxu0 }
 0x5a9   :  { %v1771_v30 = vadd.f32 0.5, %v1770_v48  ;;  %4461 = vst [vmem:[#allocation44_spill] sm:$0xff] %v4103_v34  ;;  %v4472_v34 = vld [vmem:[#allocation26_spill] sm:$0xff] }
 0x5ab   :  { %v1776_v20 = vsub.f32 1.0, %v1771_v30 }
 0x5f8   :  { %v4035_v56 = vpop.f32.mrf.mxu2 }
 0x5f9   :  { %4457 = vst [vmem:[#allocation41_spill] sm:$0xff] %v4035_v56 }
 0x600   :  { %v1756_v52 = vpop.f32.mrf.mxu2 }
 0x601   :  { %v1772_v51 = vadd.f32 %v4040_v10, %v1756_v52 }
 0x603   :  { %v1773_v40 = vmul.f32 %v1772_v51, %v1766_v19  ;;  %v1565_v19 = vpop.f32.mrf.mxu3  ;;  %v4107_v51 = vpop.f32.mrf.mxu0 }
 0x604   :  { %4463 = vst [vmem:[#allocation46_spill] sm:$0xff] %v4107_v51 }
 0x605   :  { %v1774_v53 = vadd.f32 %v1773_v40, %v1604_v31 }
 0x607   :  { %2519 = vtanh.f32 %v1774_v53 }
 0x60b   :  { %v4101_v37 = vpop.f32.mrf.mxu3  ;;  %v4111_v40 = vpop.f32.mrf.mxu0 }
 0x60c   :  { %4460 = vst [vmem:[#allocation43_spill] sm:$0xff] %v4101_v37  ;;  %v4471_v37 = vld [vmem:[#allocation37_spill] sm:$0xff] }
 0x60d   :  { %v2520_v56 = vpop.eup %2519  ;;  %4465 = vst [vmem:[#allocation48_spill] sm:$0xff] %v4111_v40 }
 0x60e   :  { %v4046_v35 = vmul.f32 %v2520_v56, %v1776_v20  ;;  %v4458_v56 = vld [vmem:[#allocation25_spill] sm:$0xff] }
 0x610   :  { %1795 = vmatmul.f32.vlgmr.msra.gmra.mxu3 %v4046_v35  ;;  %1815 = vmatmul.f32.vlgmr.msra.gmra.mxu0 %v4046_v35 }
 0x611   :  { %1835 = vmatmul.f32.vlgmr.msrb.gmra.mxu1 %v4046_v35  ;;  %1981 = vmatpush.msra.mxu3 %v3831_v38 }
 0x612   :  { %2022 = vmatpush.msra.mxu0 %v3699_v49  ;;  %2042 = vmatpush.msrb.mxu1 %v3761_v55 }
 0x613   :  { %1982 = vmatpush.msra.mxu3 %v3833_v29  ;;  %v4105_v52 = vpop.f32.mrf.mxu3  ;;  %v4115_v53 = vpop.f32.mrf.mxu0 }
 0x614   :  { %2023 = vmatpush.msra.mxu0 %v3702_v54  ;;  %2043 = vmatpush.msrb.mxu1 %v3767_v44  ;;  %4462 = vst [vmem:[#allocation45_spill] sm:$0xff] %v4105_v52 }
 0x615   :  { %1983 = vmatpush.msra.mxu3 %v3840_v46  ;;  %4467 = vst [vmem:[#allocation50_spill] sm:$0xff] %v4115_v53 }
 0x616   :  { %2024 = vmatpush.msra.mxu0 %v3705_v62  ;;  %2044 = vmatpush.msrb.mxu1 %v3771_v11 }
 0x617   :  { %1984 = vmatpush.msra.mxu3 %v3852_v18 }
 0x618   :  { %2025 = vmatpush.msra.mxu0 %v3708_v12  ;;  %2045 = vmatpush.msrb.mxu1 %v3776_v13 }
 0x619   :  { %1985 = vmatpush.msra.mxu3 %v3860_v58 }
 0x61a   :  { %2026 = vmatpush.msra.mxu0 %v3711_v36  ;;  %2046 = vmatpush.msrb.mxu1 %v3781_v61 }
 0x61b   :  { %1986 = vmatpush.msra.mxu3 %v3902_v47  ;;  %v4109_v31 = vpop.f32.mrf.mxu3  ;;  %v4119_v20 = vpop.f32.mrf.mxu0 }
 0x61c   :  { %2027 = vmatpush.msra.mxu0 %v3714_v7  ;;  %2047 = vmatpush.msrb.mxu1 %v3788_v3  ;;  %4464 = vst [vmem:[#allocation47_spill] sm:$0xff] %v4109_v31 }
 0x61d   :  { %1987 = vmatpush.msra.mxu3 %v3907_v59  ;;  %4469 = vst [vmem:[#allocation52_spill] sm:$0xff] %v4119_v20 }
 0x61e   :  { %2028 = vmatpush.msra.mxu0 %v3717_v32  ;;  %2048 = vmatpush.msrb.mxu1 %v3792_v21 }
 0x61f   :  { %1988 = vmatpush.msra.mxu3 %v3909_v9 }
 0x620   :  { %2029 = vmatpush.msra.mxu0 %v3720_v57  ;;  %2049 = vmatpush.msrb.mxu1 %v3797_v26 }
 0x621   :  { %1989 = vmatpush.msra.mxu3 %v3913_v45 }
 0x622   :  { %2030 = vmatpush.msra.mxu0 %v3723_v41  ;;  %2050 = vmatpush.msrb.mxu1 %v3802_v33 }
 0x623   :  { %1990 = vmatpush.msra.mxu3 %v3918_v50  ;;  %v4113_v48 = vpop.f32.mrf.mxu3 }
 0x624   :  { %2031 = vmatpush.msra.mxu0 %v3726_v43  ;;  %2051 = vmatpush.msrb.mxu1 %v3808_v1  ;;  %4466 = vst [vmem:[#allocation49_spill] sm:$0xff] %v4113_v48 }
 0x625   :  { %1991 = vmatpush.msra.mxu3 %v3923_v60 }
 0x626   :  { %2032 = vmatpush.msra.mxu0 %v3729_v42  ;;  %2052 = vmatpush.msrb.mxu1 %v3813_v5 }
 0x627   :  { %1992 = vmatpush.msra.mxu3 %v3928_v4 }
 0x628   :  { %2033 = vmatpush.msra.mxu0 %v3732_v8  ;;  %2053 = vmatpush.msrb.mxu1 %v3818_v14 }
 0x629   :  { %1993 = vmatpush.msra.mxu3 %v3940_v2 }
 0x62a   :  { %2034 = vmatpush.msra.mxu0 %v3735_v0  ;;  %2054 = vmatpush.msrb.mxu1 %v3823_v16 }
 0x62b   :  { %1994 = vmatpush.msra.mxu3 %v3944_v23  ;;  %v4117_v30 = vpop.f32.mrf.mxu3 }
 0x62c   :  { %2035 = vmatpush.msra.mxu0 %v3738_v15  ;;  %2055 = vmatpush.msrb.mxu1 %v3829_v24  ;;  %4468 = vst [vmem:[#allocation51_spill] sm:$0xff] %v4117_v30  ;;  %v1607_v24 = vadd.f32 %v1606_v39, %v4042_v22 }
 0x62d   :  { %1995 = vmatpush.msra.mxu3 %v3949_v27 }
 0x62e   :  { %2036 = vmatpush.msra.mxu0 %v3741_v25  ;;  %2056 = vmatpush.msrb.mxu1 %v3838_v6 }
 0x62f   :  { %1996 = vmatpush.msra.mxu3 %v3954_v63 }
 0x630   :  { %2037 = vmatpush.msra.mxu0 %v3746_v17  ;;  %2057 = vmatpush.msrb.mxu1 %v4458_v56  ;;  %v1525_v56 = vadd.f32 %v4472_v34, %v4471_v37  ;;  %v4473_v17 = vld [vmem:[#allocation39_spill] sm:$0xff] }
 0x631   :  { %v1566_v51 = vadd.f32 %v1565_v19, %v4473_v17 }
 0x633   :  { %v4121_v28 = vpop.f32.mrf.mxu3 }
 0x634   :  { %4470 = vst [vmem:[#allocation53_spill] sm:$0xff] %v4121_v28 }
 0x68d   :  { %v1816_v52 = vpop.f32.mrf.mxu0 }
 0x68e   :  { %v1847_v6 = vadd.f32 %v1816_v52, %v1566_v51  ;;  %v1836_v25 = vpop.f32.mrf.mxu1 }
 0x68f   :  { %v1852_v20 = vadd.f32 %v4040_v10, %v1836_v25 }
 0x690   :  { %v1848_v48 = vmul.f32 0.5, %v1847_v6 }
 0x693   :  { %v1796_v63 = vpop.f32.mrf.mxu3 }
 0x694   :  { %v1842_v31 = vadd.f32 %v1796_v63, %v1525_v56 }
 0x696   :  { %v1843_v40 = vmul.f32 0.5, %v1842_v31 }
 0x698   :  { %2521 = vtanh.f32 %v1843_v40 }
 0x699   :  { %2523 = vtanh.f32 %v1848_v48 }
 0x69e   :  { %v2522_v53 = vpop.eup %2521 }
 0x69f   :  { %v1845_v30 = vmul.f32 0.5, %v2522_v53  ;;  %v2524_v28 = vpop.eup %2523 }
 0x6a0   :  { %v1850_v15 = vmul.f32 0.5, %v2524_v28 }
 0x6a1   :  { %v1846_v27 = vadd.f32 0.5, %v1845_v30  ;;  %v4485_v30 = vld [vmem:[#allocation42_spill] sm:$0xff] }
 0x6a2   :  { %v1851_v19 = vadd.f32 0.5, %v1850_v15 }
 0x6a3   :  { %v1853_v34 = vmul.f32 %v1852_v20, %v1846_v27  ;;  %v1610_v20 = vadd.f32 %v4485_v30, %v4042_v22 }
 0x6a4   :  { %v1856_v56 = vsub.f32 1.0, %v1851_v19 }
 0x6a5   :  { %v1854_v37 = vadd.f32 %v1853_v34, %v1607_v24 }
 0x6a7   :  { %2525 = vtanh.f32 %v1854_v37 }
 0x6ad   :  { %v2526_v63 = vpop.eup %2525 }
 0x6ae   :  { %v1857_v52 = vsub.f32 %v2526_v63, %v4046_v35 }
 0x6b0   :  { %v1858_v6 = vmul.f32 %v1857_v52, %v1856_v56 }
 0x6b2   :  { %v4130_v51 = vadd.f32 %v1858_v6, %v4046_v35 }
 0x6b4   :  { %1876 = vmatmul.f32.vlgmr.msra.gmra.mxu2 %v4130_v51  ;;  %1896 = vmatmul.f32.vlgmr.msrb.gmra.mxu3 %v4130_v51 }
 0x6b5   :  { %1916 = vmatmul.f32.vlgmr.msrb.gmra.mxu0 %v4130_v51  ;;  %2062 = vmatpush.msra.mxu2 %v3831_v38 }
 0x6b6   :  { %2103 = vmatpush.msrb.mxu3 %v3699_v49  ;;  %2123 = vmatpush.msrb.mxu0 %v3761_v55  ;;  %v4474_v49 = vld [vmem:[#allocation31_spill] sm:$0xff] }
 0x6b7   :  { %2063 = vmatpush.msra.mxu2 %v3833_v29 }
 0x6b8   :  { %2104 = vmatpush.msrb.mxu3 %v3702_v54  ;;  %2124 = vmatpush.msrb.mxu0 %v3767_v44  ;;  %v4475_v54 = vld [vmem:[#allocation35_spill] sm:$0xff] }
 0x6b9   :  { %2064 = vmatpush.msra.mxu2 %v3840_v46 }
 0x6ba   :  { %2105 = vmatpush.msrb.mxu3 %v3705_v62  ;;  %2125 = vmatpush.msrb.mxu0 %v3771_v11  ;;  %v4476_v62 = vld [vmem:[#allocation30_spill] sm:$0xff] }
 0x6bb   :  { %2065 = vmatpush.msra.mxu2 %v3852_v18 }
 0x6bc   :  { %2106 = vmatpush.msrb.mxu3 %v3708_v12  ;;  %2126 = vmatpush.msrb.mxu0 %v3776_v13  ;;  %v4477_v12 = vld [vmem:[#allocation29_spill] sm:$0xff] }
 0x6bd   :  { %2066 = vmatpush.msra.mxu2 %v3860_v58 }
 0x6be   :  { %2107 = vmatpush.msrb.mxu3 %v3711_v36  ;;  %2127 = vmatpush.msrb.mxu0 %v3781_v61  ;;  %v4478_v36 = vld [vmem:[#allocation32_spill] sm:$0xff] }
 0x6bf   :  { %2067 = vmatpush.msra.mxu2 %v3902_v47 }
 0x6c0   :  { %2108 = vmatpush.msrb.mxu3 %v3714_v7  ;;  %2128 = vmatpush.msrb.mxu0 %v3788_v3  ;;  %v4479_v7 = vld [vmem:[#allocation33_spill] sm:$0xff] }
 0x6c1   :  { %2068 = vmatpush.msra.mxu2 %v3907_v59 }
 0x6c2   :  { %2109 = vmatpush.msrb.mxu3 %v3717_v32  ;;  %2129 = vmatpush.msrb.mxu0 %v3792_v21  ;;  %v4480_v32 = vld [vmem:[#allocation28_spill] sm:$0xff] }
 0x6c3   :  { %2069 = vmatpush.msra.mxu2 %v3909_v9 }
 0x6c4   :  { %2110 = vmatpush.msrb.mxu3 %v3720_v57  ;;  %2130 = vmatpush.msrb.mxu0 %v3797_v26  ;;  %v4481_v57 = vld [vmem:[#allocation25_spill] sm:$0xff] }
 0x6c5   :  { %2070 = vmatpush.msra.mxu2 %v3913_v45 }
 0x6c6   :  { %2111 = vmatpush.msrb.mxu3 %v3723_v41  ;;  %2131 = vmatpush.msrb.mxu0 %v3802_v33  ;;  %v4482_v41 = vld [vmem:[#allocation37_spill] sm:$0xff] }
 0x6c7   :  { %2071 = vmatpush.msra.mxu2 %v3918_v50 }
 0x6c8   :  { %2112 = vmatpush.msrb.mxu3 %v3726_v43  ;;  %2132 = vmatpush.msrb.mxu0 %v3808_v1  ;;  %v4483_v43 = vld [vmem:[#allocation27_spill] sm:$0xff] }
 0x6c9   :  { %2072 = vmatpush.msra.mxu2 %v3923_v60 }
 0x6ca   :  { %2113 = vmatpush.msrb.mxu3 %v3729_v42  ;;  %2133 = vmatpush.msrb.mxu0 %v3813_v5  ;;  %v1528_v42 = vadd.f32 %v4483_v43, %v4482_v41  ;;  %v4198_v43 = vld [vmem:[#allocation13 + $0x168] sm:$0xff] }
 0x6cb   :  { %2073 = vmatpush.msra.mxu2 %v3928_v4 }
 0x6cc   :  { %2114 = vmatpush.msrb.mxu3 %v3732_v8  ;;  %2134 = vmatpush.msrb.mxu0 %v3818_v14  ;;  %v4484_v8 = vld [vmem:[#allocation43_spill] sm:$0xff] }
 0x6cd   :  { %2074 = vmatpush.msra.mxu2 %v3940_v2 }
 0x6ce   :  { %2115 = vmatpush.msrb.mxu3 %v3735_v0  ;;  %2135 = vmatpush.msrb.mxu0 %v3823_v16  ;;  %v1569_v0 = vadd.f32 %v4484_v8, %v4473_v17  ;;  %v4213_v8 = vld [vmem:[#allocation13 + $0x120] sm:$0xff] }
 0x6cf   :  { %2075 = vmatpush.msra.mxu2 %v3944_v23 }
 0x6d0   :  { %2116 = vmatpush.msrb.mxu3 %v4474_v49  ;;  %2136 = vmatpush.msrb.mxu0 %v4475_v54 }
 0x6d1   :  { %2076 = vmatpush.msra.mxu2 %v4476_v62 }
 0x6d2   :  { %2117 = vmatpush.msrb.mxu3 %v4477_v12  ;;  %2137 = vmatpush.msrb.mxu0 %v4478_v36 }
 0x6d3   :  { %2077 = vmatpush.msra.mxu2 %v4479_v7 }
 0x6d4   :  { %2118 = vmatpush.msrb.mxu3 %v4480_v32  ;;  %2138 = vmatpush.msrb.mxu0 %v4481_v57 }
 0x732   :  { %v1917_v37 = vpop.f32.mrf.mxu0 }
 0x733   :  { %v1933_v40 = vadd.f32 %v4040_v10, %v1917_v37 }
 0x737   :  { %v1877_v15 = vpop.f32.mrf.mxu2  ;;  %v1897_v25 = vpop.f32.mrf.mxu3 }
 0x738   :  { %v1923_v24 = vadd.f32 %v1877_v15, %v1528_v42  ;;  %v1928_v27 = vadd.f32 %v1897_v25, %v1569_v0  ;;  %v4203_v42 = vld [vmem:[#allocation13 + $0x150] sm:$0xff] }
 0x73a   :  { %v1924_v35 = vmul.f32 0.5, %v1923_v24  ;;  %v1929_v39 = vmul.f32 0.5, %v1928_v27  ;;  %v4487_v24 = vld [vmem:[#allocation45_spill] sm:$0xff] }
 0x73b   :  { %v1572_v27 = vadd.f32 %v4487_v24, %v4473_v17 }
 0x73c   :  { %2527 = vtanh.f32 %v1924_v35 }
 0x73d   :  { %2529 = vtanh.f32 %v1929_v39 }
 0x742   :  { %v2528_v28 = vpop.eup %2527 }
 0x743   :  { %v1926_v31 = vmul.f32 0.5, %v2528_v28  ;;  %v2530_v53 = vpop.eup %2529 }
 0x744   :  { %v1931_v63 = vmul.f32 0.5, %v2530_v53 }
 0x745   :  { %v1927_v48 = vadd.f32 0.5, %v1926_v31 }
 0x746   :  { %v1932_v56 = vadd.f32 0.5, %v1931_v63 }
 0x747   :  { %v1934_v34 = vmul.f32 %v1933_v40, %v1927_v48  ;;  %v4488_v48 = vld [vmem:[#allocation44_spill] sm:$0xff] }
 0x748   :  { %v1937_v6 = vsub.f32 1.0, %v1932_v56  ;;  %v1613_v53 = vadd.f32 %v4488_v48, %v4042_v22 }
 0x749   :  { %v1935_v19 = vadd.f32 %v1934_v34, %v1610_v20 }
 0x74b   :  { %2531 = vtanh.f32 %v1935_v19 }
 0x751   :  { %v2532_v52 = vpop.eup %2531 }
 0x752   :  { %v1938_v49 = vsub.f32 %v2532_v52, %v4130_v51 }
 0x754   :  { %v1939_v12 = vmul.f32 %v1938_v49, %v1937_v6 }
 0x756   :  { %v4192_v32 = vadd.f32 %v1939_v12, %v4130_v51  ;;  %v4208_v51 = vld [vmem:[#allocation13 + $0x138] sm:$0xff] }
 0x758   :  { %1957 = vmatmul.f32.vlgmr.msra.gmra.mxu1 %v4192_v32  ;;  %1977 = vmatmul.f32.vlgmr.msrb.gmra.mxu2 %v4192_v32 }
 0x759   :  { %1997 = vmatmul.f32.vlgmr.msra.gmra.mxu3 %v4192_v32  ;;  %2143 = vmatpush.msra.mxu1 %v3831_v38 }
 0x75a   :  { %2184 = vmatpush.msrb.mxu2 %v4198_v43  ;;  %2204 = vmatpush.msra.mxu3 %v3761_v55  ;;  %v4218_v55 = vld [vmem:[#allocation13 + $0x108] sm:$0xff] }
 0x75b   :  { %2144 = vmatpush.msra.mxu1 %v3833_v29 }
 0x75c   :  { %2185 = vmatpush.msrb.mxu2 %v4203_v42  ;;  %2205 = vmatpush.msra.mxu3 %v3767_v44  ;;  %v4223_v44 = vld [vmem:[#allocation13 + $0xf0] sm:$0xff] }
 0x75d   :  { %2145 = vmatpush.msra.mxu1 %v3840_v46 }
 0x75e   :  { %2186 = vmatpush.msrb.mxu2 %v4208_v51  ;;  %2206 = vmatpush.msra.mxu3 %v3771_v11  ;;  %v4228_v11 = vld [vmem:[#allocation13 + $0xd8] sm:$0xff] }
 0x75f   :  { %2146 = vmatpush.msra.mxu1 %v3852_v18 }
 0x760   :  { %2187 = vmatpush.msrb.mxu2 %v4213_v8  ;;  %2207 = vmatpush.msra.mxu3 %v3776_v13  ;;  %v4233_v13 = vld [vmem:[#allocation13 + $0xc0] sm:$0xff] }
 0x761   :  { %2147 = vmatpush.msra.mxu1 %v3860_v58 }
 0x762   :  { %2188 = vmatpush.msrb.mxu2 %v4218_v55  ;;  %2208 = vmatpush.msra.mxu3 %v3781_v61  ;;  %v4238_v61 = vld [vmem:[#allocation13 + $0xa8] sm:$0xff] }
 0x763   :  { %2148 = vmatpush.msra.mxu1 %v3902_v47 }
 0x764   :  { %2189 = vmatpush.msrb.mxu2 %v4223_v44  ;;  %2209 = vmatpush.msra.mxu3 %v3788_v3  ;;  %v4243_v3 = vld [vmem:[#allocation13 + $0x90] sm:$0xff] }
 0x765   :  { %2149 = vmatpush.msra.mxu1 %v3907_v59 }
 0x766   :  { %2190 = vmatpush.msrb.mxu2 %v4228_v11  ;;  %2210 = vmatpush.msra.mxu3 %v3792_v21  ;;  %v4248_v21 = vld [vmem:[#allocation13 + $0x78] sm:$0xff] }
 0x767   :  { %2150 = vmatpush.msra.mxu1 %v3909_v9 }
 0x768   :  { %2191 = vmatpush.msrb.mxu2 %v4233_v13  ;;  %2211 = vmatpush.msra.mxu3 %v3797_v26  ;;  %v4253_v26 = vld [vmem:[#allocation13 + $0x60] sm:$0xff] }
 0x769   :  { %2151 = vmatpush.msra.mxu1 %v3913_v45 }
 0x76a   :  { %2192 = vmatpush.msrb.mxu2 %v4238_v61  ;;  %2212 = vmatpush.msra.mxu3 %v3802_v33  ;;  %v4258_v33 = vld [vmem:[#allocation13 + $0x48] sm:$0xff] }
 0x76b   :  { %2152 = vmatpush.msra.mxu1 %v3918_v50 }
 0x76c   :  { %2193 = vmatpush.msrb.mxu2 %v4243_v3  ;;  %2213 = vmatpush.msra.mxu3 %v3808_v1  ;;  %v4263_v1 = vld [vmem:[#allocation13 + $0x30] sm:$0xff] }
 0x76d   :  { %2153 = vmatpush.msra.mxu1 %v3923_v60 }
 0x76e   :  { %2194 = vmatpush.msrb.mxu2 %v4248_v21  ;;  %2214 = vmatpush.msra.mxu3 %v3813_v5  ;;  %v4268_v5 = vld [vmem:[#allocation13 + $0x18] sm:$0xff] }
 0x76f   :  { %2154 = vmatpush.msra.mxu1 %v3928_v4 }
 0x770   :  { %2195 = vmatpush.msrb.mxu2 %v4253_v26  ;;  %2215 = vmatpush.msra.mxu3 %v3818_v14  ;;  %v4273_v14 = vld [vmem:[#allocation13] sm:$0xff] }
 0x771   :  { %2155 = vmatpush.msra.mxu1 %v3940_v2 }
 0x772   :  { %2196 = vmatpush.msrb.mxu2 %v4258_v33  ;;  %2216 = vmatpush.msra.mxu3 %v3823_v16  ;;  %v4486_v16 = vld [vmem:[#allocation34_spill] sm:$0xff] }
 0x773   :  { %2156 = vmatpush.msra.mxu1 %v3944_v23  ;;  %v1531_v0 = vadd.f32 %v4486_v16, %v4482_v41  ;;  %v2580_v16 = vld [vmem:[#allocation13 + $0x170] sm:$0xff] }
 0x774   :  { %2197 = vmatpush.msrb.mxu2 %v4263_v1  ;;  %2217 = vmatpush.msra.mxu3 %v4475_v54 }
 0x775   :  { %2157 = vmatpush.msra.mxu1 %v4476_v62 }
 0x776   :  { %2198 = vmatpush.msrb.mxu2 %v4268_v5  ;;  %2218 = vmatpush.msra.mxu3 %v4478_v36 }
 0x777   :  { %2158 = vmatpush.msra.mxu1 %v4479_v7 }
 0x778   :  { %2199 = vmatpush.msrb.mxu2 %v4273_v14  ;;  %2219 = vmatpush.msra.mxu3 %v4481_v57 }
 0x7d5   :  { %v1958_v54 = vpop.f32.mrf.mxu1 }
 0x7d6   :  { %v2004_v15 = vadd.f32 %v1958_v54, %v1531_v0  ;;  %v2581_v0 = vld [vmem:[#allocation13 + $0x158] sm:$0xff] }
 0x7d8   :  { %v2005_v25 = vmul.f32 0.5, %v2004_v15 }
 0x7da   :  { %2533 = vtanh.f32 %v2005_v25 }
 0x7db   :  { %v1978_v35 = vpop.f32.mrf.mxu2 }
 0x7dc   :  { %v2009_v36 = vadd.f32 %v1978_v35, %v1572_v27  ;;  %v1998_v37 = vpop.f32.mrf.mxu3 }
 0x7dd   :  { %v2014_v57 = vadd.f32 %v4040_v10, %v1998_v37 }
 0x7de   :  { %v2010_v39 = vmul.f32 0.5, %v2009_v36 }
 0x7e0   :  { %v2534_v28 = vpop.eup %2533  ;;  %2535 = vtanh.f32 %v2010_v39 }
 0x7e1   :  { %v2007_v31 = vmul.f32 0.5, %v2534_v28  ;;  %v4491_v28 = vld [vmem:[#allocation46_spill] sm:$0xff] }
 0x7e2   :  { %v1616_v37 = vadd.f32 %v4491_v28, %v4042_v22 }
 0x7e3   :  { %v2008_v40 = vadd.f32 0.5, %v2007_v31 }
 0x7e5   :  { %v2015_v30 = vmul.f32 %v2014_v57, %v2008_v40 }
 0x7e6   :  { %v2536_v20 = vpop.eup %2535 }
 0x7e7   :  { %v2016_v34 = vadd.f32 %v2015_v30, %v1613_v53  ;;  %v2012_v19 = vmul.f32 0.5, %v2536_v20 }
 0x7e9   :  { %2537 = vtanh.f32 %v2016_v34  ;;  %v2013_v63 = vadd.f32 0.5, %v2012_v19 }
 0x7eb   :  { %v2018_v52 = vsub.f32 1.0, %v2013_v63  ;;  %v2596_v63 = vld [vmem:[#allocation13 + $0x178] sm:$0xff] }
 0x7ef   :  { %v2538_v56 = vpop.eup %2537 }
 0x7f0   :  { %v2019_v6 = vsub.f32 %v2538_v56, %v4192_v32  ;;  %v2597_v56 = vld [vmem:[#allocation13 + $0x160] sm:$0xff] }
 0x7f2   :  { %v2020_v49 = vmul.f32 %v2019_v6, %v2018_v52  ;;  %v2598_v52 = vld [vmem:[#allocation13 + $0x148] sm:$0xff]  ;;  %v2599_v6 = vld [vmem:[#allocation13 + $0x130] sm:$0xff] }
 0x7f4   :  { %v4286_v12 = vadd.f32 %v2020_v49, %v4192_v32  ;;  %v2582_v32 = vld [vmem:[#allocation13 + $0x140] sm:$0xff]  ;;  %v2600_v49 = vld [vmem:[#allocation13 + $0x118] sm:$0xff] }
 0x7f6   :  { %2038 = vmatmul.f32.vlgmr.msra.gmra.mxu0 %v4286_v12  ;;  %2058 = vmatmul.f32.vlgmr.msrb.gmra.mxu1 %v4286_v12 }
 0x7f7   :  { %2078 = vmatmul.f32.vlgmr.msra.gmra.mxu2 %v4286_v12  ;;  %2224 = vmatpush.msra.mxu0 %v3831_v38  ;;  %v2583_v38 = vld [vmem:[#allocation13 + $0x128] sm:$0xff] }
 0x7f8   :  { %2265 = vmatpush.msrb.mxu1 %v4198_v43  ;;  %2285 = vmatpush.msra.mxu2 %v2580_v16  ;;  %v2588_v43 = vld [vmem:[#allocation13 + $0xb0] sm:$0xff] }
 0x7f9   :  { %2225 = vmatpush.msra.mxu0 %v3833_v29  ;;  %v2584_v29 = vld [vmem:[#allocation13 + $0x110] sm:$0xff] }
 0x7fa   :  { %2266 = vmatpush.msrb.mxu1 %v4203_v42  ;;  %2286 = vmatpush.msra.mxu2 %v2581_v0  ;;  %v2589_v42 = vld [vmem:[#allocation13 + $0x98] sm:$0xff] }
 0x7fb   :  { %2226 = vmatpush.msra.mxu0 %v3840_v46  ;;  %v2585_v46 = vld [vmem:[#allocation13 + $0xf8] sm:$0xff] }
 0x7fc   :  { %2267 = vmatpush.msrb.mxu1 %v4208_v51  ;;  %2287 = vmatpush.msra.mxu2 %v2582_v32  ;;  %v2590_v51 = vld [vmem:[#allocation13 + $0x80] sm:$0xff] }
 0x7fd   :  { %2227 = vmatpush.msra.mxu0 %v3852_v18  ;;  %v2586_v18 = vld [vmem:[#allocation13 + $0xe0] sm:$0xff] }
 0x7fe   :  { %2268 = vmatpush.msrb.mxu1 %v4213_v8  ;;  %2288 = vmatpush.msra.mxu2 %v2583_v38  ;;  %v2591_v8 = vld [vmem:[#allocation13 + $0x68] sm:$0xff] }
 0x7ff   :  { %2228 = vmatpush.msra.mxu0 %v3860_v58  ;;  %v2587_v58 = vld [vmem:[#allocation13 + $0xc8] sm:$0xff] }
 0x800   :  { %2269 = vmatpush.msrb.mxu1 %v4218_v55  ;;  %2289 = vmatpush.msra.mxu2 %v2584_v29  ;;  %v2592_v55 = vld [vmem:[#allocation13 + $0x50] sm:$0xff]  ;;  %v4494_v29 = vld [vmem:[#allocation48_spill] sm:$0xff] }
 0x801   :  { %2229 = vmatpush.msra.mxu0 %v3902_v47 }
 0x802   :  { %2270 = vmatpush.msrb.mxu1 %v4223_v44  ;;  %2290 = vmatpush.msra.mxu2 %v2585_v46  ;;  %v2593_v44 = vld [vmem:[#allocation13 + $0x38] sm:$0xff]  ;;  %v1619_v46 = vadd.f32 %v4494_v29, %v4042_v22 }
 0x803   :  { %2230 = vmatpush.msra.mxu0 %v3907_v59 }
 0x804   :  { %2271 = vmatpush.msrb.mxu1 %v4228_v11  ;;  %2291 = vmatpush.msra.mxu2 %v2586_v18  ;;  %v2594_v11 = vld [vmem:[#allocation13 + $0x20] sm:$0xff] }
 0x805   :  { %2231 = vmatpush.msra.mxu0 %v3909_v9 }
 0x806   :  { %2272 = vmatpush.msrb.mxu1 %v4233_v13  ;;  %2292 = vmatpush.msra.mxu2 %v2587_v58  ;;  %v2595_v13 = vld [vmem:[#allocation13 + $0x8] sm:$0xff] }
 0x807   :  { %2232 = vmatpush.msra.mxu0 %v3913_v45 }
 0x808   :  { %2273 = vmatpush.msrb.mxu1 %v4238_v61  ;;  %2293 = vmatpush.msra.mxu2 %v2588_v43  ;;  %v4489_v61 = vld [vmem:[#allocation36_spill] sm:$0xff] }
 0x809   :  { %2233 = vmatpush.msra.mxu0 %v3918_v50 }
 0x80a   :  { %2274 = vmatpush.msrb.mxu1 %v4243_v3  ;;  %2294 = vmatpush.msra.mxu2 %v2589_v42  ;;  %v1534_v3 = vadd.f32 %v4489_v61, %v4482_v41 }
 0x80b   :  { %2234 = vmatpush.msra.mxu0 %v3923_v60 }
 0x80c   :  { %2275 = vmatpush.msrb.mxu1 %v4248_v21  ;;  %2295 = vmatpush.msra.mxu2 %v2590_v51  ;;  %v4490_v21 = vld [vmem:[#allocation47_spill] sm:$0xff] }
 0x80d   :  { %2235 = vmatpush.msra.mxu0 %v3928_v4 }
 0x80e   :  { %2276 = vmatpush.msrb.mxu1 %v4253_v26  ;;  %2296 = vmatpush.msra.mxu2 %v2591_v8  ;;  %v1575_v26 = vadd.f32 %v4490_v21, %v4473_v17 }
 0x80f   :  { %2236 = vmatpush.msra.mxu0 %v3940_v2 }
 0x810   :  { %2277 = vmatpush.msrb.mxu1 %v4258_v33  ;;  %2297 = vmatpush.msra.mxu2 %v2592_v55 }
 0x811   :  { %2237 = vmatpush.msra.mxu0 %v3944_v23 }
 0x812   :  { %2278 = vmatpush.msrb.mxu1 %v4263_v1  ;;  %2298 = vmatpush.msra.mxu2 %v2593_v44 }
 0x813   :  { %2238 = vmatpush.msra.mxu0 %v4476_v62 }
 0x814   :  { %2279 = vmatpush.msrb.mxu1 %v4268_v5  ;;  %2299 = vmatpush.msra.mxu2 %v2594_v11 }
 0x815   :  { %2239 = vmatpush.msra.mxu0 %v4479_v7 }
 0x816   :  { %2280 = vmatpush.msrb.mxu1 %v4273_v14  ;;  %2300 = vmatpush.msra.mxu2 %v2595_v13  ;;  %v4495_v13 = vld [vmem:[#allocation40_spill] sm:$0xff] }
 0x817   :  { %v1540_v61 = vadd.f32 %v4495_v13, %v4482_v41  ;;  %v2396_v13 = vld [vmem:[#allocation16 + $0x48] sm:$0xff] }
 0x873   :  { %v2039_v33 = vpop.f32.mrf.mxu0  ;;  %v2059_v1 = vpop.f32.mrf.mxu1 }
 0x874   :  { %v2085_v54 = vadd.f32 %v2039_v33, %v1534_v3  ;;  %v2090_v15 = vadd.f32 %v2059_v1, %v1575_v26  ;;  %v4496_v3 = vld [vmem:[#allocation51_spill] sm:$0xff] }
 0x875   :  { %v1581_v21 = vadd.f32 %v4496_v3, %v4473_v17  ;;  %v2395_v3 = vld [vmem:[#allocation16 + $0x40] sm:$0xff] }
 0x876   :  { %v2086_v25 = vmul.f32 0.5, %v2085_v54  ;;  %v2091_v5 = vmul.f32 0.5, %v2090_v15 }
 0x878   :  { %2539 = vtanh.f32 %v2086_v25 }
 0x879   :  { %2541 = vtanh.f32 %v2091_v5 }
 0x87a   :  { %v2079_v27 = vpop.f32.mrf.mxu2 }
 0x87b   :  { %v2095_v36 = vadd.f32 %v4040_v10, %v2079_v27 }
 0x87e   :  { %v2540_v24 = vpop.eup %2539 }
 0x87f   :  { %v2088_v35 = vmul.f32 0.5, %v2540_v24  ;;  %v2542_v39 = vpop.eup %2541 }
 0x880   :  { %v2093_v57 = vmul.f32 0.5, %v2542_v39  ;;  %v4497_v39 = vld [vmem:[#allocation50_spill] sm:$0xff] }
 0x881   :  { %v2089_v14 = vadd.f32 0.5, %v2088_v35  ;;  %v1622_v28 = vadd.f32 %v4497_v39, %v4042_v22 }
 0x882   :  { %v2094_v48 = vadd.f32 0.5, %v2093_v57 }
 0x883   :  { %v2096_v31 = vmul.f32 %v2095_v36, %v2089_v14 }
 0x884   :  { %v2099_v30 = vsub.f32 1.0, %v2094_v48 }
 0x885   :  { %v2097_v40 = vadd.f32 %v2096_v31, %v1616_v37 }
 0x887   :  { %2543 = vtanh.f32 %v2097_v40 }
 0x88d   :  { %v2544_v53 = vpop.eup %2543 }
 0x88e   :  { %v2100_v20 = vsub.f32 %v2544_v53, %v4286_v12 }
 0x890   :  { %v2101_v34 = vmul.f32 %v2100_v20, %v2099_v30 }
 0x892   :  { %v2102_v19 = vadd.f32 %v2101_v34, %v4286_v12 }
 0x894   :  { %2119 = vmatmul.f32.vlgmr.msrb.gmra.mxu3 %v2102_v19  ;;  %2139 = vmatmul.f32.vlgmr.msrb.gmra.mxu0 %v2102_v19 }
 0x895   :  { %2159 = vmatmul.f32.vlgmr.msra.gmra.mxu1 %v2102_v19  ;;  %2305 = vmatpush.msrb.mxu3 %v2596_v63  ;;  %v2360_v63 = vld [vmem:[#allocation15 + $0x70] sm:$0xff] }
 0x897   :  { %2306 = vmatpush.msrb.mxu3 %v2597_v56  ;;  %v2359_v56 = vld [vmem:[#allocation15 + $0x68] sm:$0xff] }
 0x899   :  { %2307 = vmatpush.msrb.mxu3 %v2598_v52  ;;  %v2358_v52 = vld [vmem:[#allocation15 + $0x60] sm:$0xff] }
 0x89b   :  { %2308 = vmatpush.msrb.mxu3 %v2599_v6  ;;  %v2357_v6 = vld [vmem:[#allocation15 + $0x58] sm:$0xff] }
 0x89d   :  { %2309 = vmatpush.msrb.mxu3 %v2600_v49  ;;  %v2356_v49 = vld [vmem:[#allocation15 + $0x50] sm:$0xff] }
 0x89f   :  { %2310 = vmatpush.msrb.mxu3 %v3902_v47  ;;  %v4492_v47 = vld [vmem:[#allocation38_spill] sm:$0xff] }
 0x8a1   :  { %2311 = vmatpush.msrb.mxu3 %v3907_v59  ;;  %v1537_v59 = vadd.f32 %v4492_v47, %v4482_v41  ;;  %v2355_v47 = vld [vmem:[#allocation15 + $0x48] sm:$0xff] }
 0x8a3   :  { %2312 = vmatpush.msrb.mxu3 %v3909_v9 }
 0x8a5   :  { %2313 = vmatpush.msrb.mxu3 %v3913_v45  ;;  %v4493_v45 = vld [vmem:[#allocation49_spill] sm:$0xff] }
 0x8a6   :  { %v1578_v12 = vadd.f32 %v4493_v45, %v4473_v17  ;;  %v2352_v45 = vld [vmem:[#allocation15 + $0x30] sm:$0xff] }
 0x8a7   :  { %2314 = vmatpush.msrb.mxu3 %v3918_v50 }
 0x8a9   :  { %2315 = vmatpush.msrb.mxu3 %v3923_v60 }
 0x8ab   :  { %2316 = vmatpush.msrb.mxu3 %v3928_v4 }
 0x8ad   :  { %2317 = vmatpush.msrb.mxu3 %v3940_v2 }
 0x8af   :  { %2318 = vmatpush.msrb.mxu3 %v3944_v23 }
 0x8b1   :  { %2319 = vmatpush.msrb.mxu3 %v4476_v62 }
 0x8b3   :  { %2320 = vmatpush.msrb.mxu3 %v4479_v7 }
 0x911   :  { %v2140_v9 = vpop.f32.mrf.mxu0 }
 0x912   :  { %v2171_v60 = vadd.f32 %v2140_v9, %v1578_v12  ;;  %v2160_v23 = vpop.f32.mrf.mxu1  ;;  %v2353_v9 = vld [vmem:[#allocation15 + $0x38] sm:$0xff]  ;;  %v2351_v12 = vld [vmem:[#allocation15 + $0x28] sm:$0xff] }
 0x913   :  { %v2176_v62 = vadd.f32 %v4040_v10, %v2160_v23  ;;  %v2346_v23 = vld [vmem:[#allocation15] sm:$0xff] }
 0x914   :  { %v2172_v4 = vmul.f32 0.5, %v2171_v60  ;;  %v2348_v60 = vld [vmem:[#allocation15 + $0x10] sm:$0xff] }
 0x917   :  { %v2120_v50 = vpop.f32.mrf.mxu3 }
 0x918   :  { %v2166_v16 = vadd.f32 %v2120_v50, %v1537_v59  ;;  %v2354_v59 = vld [vmem:[#allocation15 + $0x40] sm:$0xff] }
 0x919   :  { %v2350_v50 = vld [vmem:[#allocation15 + $0x20] sm:$0xff] }
 0x91a   :  { %v2167_v0 = vmul.f32 0.5, %v2166_v16  ;;  %v2349_v16 = vld [vmem:[#allocation15 + $0x18] sm:$0xff] }
 0x91c   :  { %2545 = vtanh.f32 %v2167_v0  ;;  %v2347_v0 = vld [vmem:[#allocation15 + $0x8] sm:$0xff] }
 0x91d   :  { %2547 = vtanh.f32 %v2172_v4  ;;  %v4498_v4 = vld [vmem:[#allocation41_spill] sm:$0xff] }
 0x922   :  { %v2546_v2 = vpop.eup %2545 }
 0x923   :  { %v2169_v32 = vmul.f32 0.5, %v2546_v2  ;;  %v2548_v38 = vpop.eup %2547  ;;  %v1543_v2 = vadd.f32 %v4498_v4, %v4482_v41  ;;  %v2398_v41 = vld [vmem:[#allocation16 + $0x58] sm:$0xff] }
 0x924   :  { %v2174_v43 = vmul.f32 0.5, %v2548_v38  ;;  %v2401_v38 = vld [vmem:[#allocation16 + $0x70] sm:$0xff] }
 0x925   :  { %v2170_v7 = vadd.f32 0.5, %v2169_v32 }
 0x926   :  { %v2175_v42 = vadd.f32 0.5, %v2174_v43  ;;  %v2399_v43 = vld [vmem:[#allocation16 + $0x60] sm:$0xff] }
 0x927   :  { %v2177_v18 = vmul.f32 %v2176_v62, %v2170_v7  ;;  %v2402_v7 = vld [vmem:[#allocation16 + $0x78] sm:$0xff] }
 0x928   :  { %v2180_v8 = vsub.f32 1.0, %v2175_v42  ;;  %2407 = vmatpush.msra.mxu1 %v2402_v7 }
 0x929   :  { %v2178_v58 = vadd.f32 %v2177_v18, %v1619_v46  ;;  %v2400_v46 = vld [vmem:[#allocation16 + $0x68] sm:$0xff] }
 0x92a   :  { %2408 = vmatpush.msra.mxu1 %v2401_v38  ;;  %v4499_v18 = vld [vmem:[#allocation53_spill] sm:$0xff] }
 0x92b   :  { %2549 = vtanh.f32 %v2178_v58  ;;  %v1584_v58 = vadd.f32 %v4499_v18, %v4473_v17 }
 0x92c   :  { %2409 = vmatpush.msra.mxu1 %v2400_v46 }
 0x92e   :  { %2410 = vmatpush.msra.mxu1 %v2399_v43 }
 0x930   :  { %2411 = vmatpush.msra.mxu1 %v2398_v41 }
 0x931   :  { %v2550_v51 = vpop.eup %2549 }
 0x932   :  { %v2181_v55 = vsub.f32 %v2550_v51, %v2102_v19 }
 0x934   :  { %v2182_v44 = vmul.f32 %v2181_v55, %v2180_v8  ;;  %v2397_v55 = vld [vmem:[#allocation16 + $0x50] sm:$0xff] }
 0x935   :  { %2412 = vmatpush.msra.mxu1 %v2397_v55 }
 0x936   :  { %v2183_v11 = vadd.f32 %v2182_v44, %v2102_v19  ;;  %v2361_v19 = vld [vmem:[#allocation15 + $0x78] sm:$0xff] }
 0x937   :  { %2366 = vmatpush.msrb.mxu0 %v2361_v19  ;;  %2413 = vmatpush.msra.mxu1 %v2396_v13  ;;  %v2466_v19 = vld [vmem:[%s4392_s12] ss:$0 sm:$0xff] }
 0x938   :  { %2200 = vmatmul.f32.vlgmr.msrb.gmra.mxu2 %v2183_v11  ;;  %2220 = vmatmul.f32.vlgmr.msra.gmra.mxu3 %v2183_v11 }
 0x939   :  { %2240 = vmatmul.f32.vlgmr.msra.gmra.mxu0 %v2183_v11  ;;  %2414 = vmatpush.msra.mxu1 %v2395_v3 }
 0x93a   :  { %2367 = vmatpush.msrb.mxu0 %v2360_v63 }
 0x93c   :  { %2368 = vmatpush.msrb.mxu0 %v2359_v56 }
 0x93e   :  { %2369 = vmatpush.msrb.mxu0 %v2358_v52 }
 0x940   :  { %2370 = vmatpush.msrb.mxu0 %v2357_v6 }
 0x942   :  { %2371 = vmatpush.msrb.mxu0 %v2356_v49 }
 0x944   :  { %2372 = vmatpush.msrb.mxu0 %v2355_v47 }
 0x946   :  { %2373 = vmatpush.msrb.mxu0 %v2354_v59 }
 0x948   :  { %2374 = vmatpush.msrb.mxu0 %v2353_v9 }
 0x94a   :  { %2375 = vmatpush.msrb.mxu0 %v2352_v45 }
 0x94c   :  { %2376 = vmatpush.msrb.mxu0 %v2351_v12 }
 0x94e   :  { %2377 = vmatpush.msrb.mxu0 %v2350_v50 }
 0x950   :  { %2378 = vmatpush.msrb.mxu0 %v2349_v16 }
 0x952   :  { %2379 = vmatpush.msrb.mxu0 %v2348_v60 }
 0x954   :  { %2380 = vmatpush.msrb.mxu0 %v2347_v0 }
 0x956   :  { %2381 = vmatpush.msrb.mxu0 %v2346_v23 }
 0x9b6   :  { %v2241_v24 = vpop.f32.mrf.mxu0 }
 0x9b7   :  { %v2257_v35 = vadd.f32 %v4040_v10, %v2241_v24 }
 0x9bb   :  { %v2201_v26 = vpop.f32.mrf.mxu2  ;;  %v2221_v33 = vpop.f32.mrf.mxu3 }
 0x9bc   :  { %v2247_v1 = vadd.f32 %v2201_v26, %v1540_v61  ;;  %v2252_v54 = vadd.f32 %v2221_v33, %v1581_v21  ;;  %v2394_v26 = vld [vmem:[#allocation16 + $0x38] sm:$0xff]  ;;  %v4500_v33 = vld [vmem:[#allocation52_spill] sm:$0xff] }
 0x9bd   :  { %2415 = vmatpush.msra.mxu1 %v2394_v26 }
 0x9be   :  { %v2248_v15 = vmul.f32 0.5, %v2247_v1  ;;  %v2253_v25 = vmul.f32 0.5, %v2252_v54  ;;  %v1625_v1 = vadd.f32 %v4500_v33, %v4042_v22 }
 0x9c0   :  { %2551 = vtanh.f32 %v2248_v15 }
 0x9c1   :  { %2553 = vtanh.f32 %v2253_v25  ;;  %v2393_v25 = vld [vmem:[#allocation16 + $0x30] sm:$0xff] }
 0x9c2   :  { %2416 = vmatpush.msra.mxu1 %v2393_v25 }
 0x9c6   :  { %v2552_v5 = vpop.eup %2551 }
 0x9c7   :  { %v2250_v27 = vmul.f32 0.5, %v2552_v5  ;;  %v2554_v36 = vpop.eup %2553 }
 0x9c8   :  { %v2255_v40 = vmul.f32 0.5, %v2554_v36  ;;  %v2390_v36 = vld [vmem:[#allocation16 + $0x18] sm:$0xff] }
 0x9c9   :  { %v2251_v14 = vadd.f32 0.5, %v2250_v27  ;;  %v2392_v27 = vld [vmem:[#allocation16 + $0x28] sm:$0xff] }
 0x9ca   :  { %v2256_v57 = vadd.f32 0.5, %v2255_v40  ;;  %2417 = vmatpush.msra.mxu1 %v2392_v27  ;;  %v2388_v40 = vld [vmem:[#allocation16 + $0x8] sm:$0xff] }
 0x9cb   :  { %v2258_v37 = vmul.f32 %v2257_v35, %v2251_v14  ;;  %v2391_v35 = vld [vmem:[#allocation16 + $0x20] sm:$0xff] }
 0x9cc   :  { %v2261_v53 = vsub.f32 1.0, %v2256_v57  ;;  %2418 = vmatpush.msra.mxu1 %v2391_v35  ;;  %v2387_v57 = vld [vmem:[#allocation16] sm:$0xff] }
 0x9cd   :  { %v2259_v31 = vadd.f32 %v2258_v37, %v1622_v28 }
 0x9ce   :  { %2419 = vmatpush.msra.mxu1 %v2390_v36 }
 0x9cf   :  { %2555 = vtanh.f32 %v2259_v31  ;;  %v2389_v31 = vld [vmem:[#allocation16 + $0x10] sm:$0xff] }
 0x9d0   :  { %2420 = vmatpush.msra.mxu1 %v2389_v31 }
 0x9d2   :  { %2421 = vmatpush.msra.mxu1 %v2388_v40 }
 0x9d4   :  { %2422 = vmatpush.msra.mxu1 %v2387_v57 }
 0x9d5   :  { %v2556_v48 = vpop.eup %2555 }
 0x9d6   :  { %v2262_v30 = vsub.f32 %v2556_v48, %v2183_v11  ;;  %v2465_v48 = vld [vmem:[%s4390_s10] ss:$0 sm:$0xff] }
 0x9d8   :  { %v2263_v20 = vmul.f32 %v2262_v30, %v2261_v53 }
 0x9da   :  { %v4357_v34 = vadd.f32 %v2263_v20, %v2183_v11 }
 0x9dc   :  { %2281 = vmatmul.f32.vlgmr.msrb.gmra.mxu1 %v4357_v34  ;;  %2301 = vmatmul.f32.vlgmr.msra.gmra.mxu2 %v4357_v34 }
 0x9dd   :  { %2321 = vmatmul.f32.vlgmr.msrb.gmra.mxu3 %v4357_v34 }
 0xa59   :  { %v2282_v32 = vpop.f32.mrf.mxu1 }
 0xa5a   :  { %v2328_v62 = vadd.f32 %v2282_v32, %v1543_v2 }
 0xa5c   :  { %v2329_v29 = vmul.f32 0.5, %v2328_v62 }
 0xa5e   :  { %2557 = vtanh.f32 %v2329_v29 }
 0xa5f   :  { %v2302_v42 = vpop.f32.mrf.mxu2 }
 0xa60   :  { %v2333_v51 = vadd.f32 %v2302_v42, %v1584_v58  ;;  %v2322_v11 = vpop.f32.mrf.mxu3 }
 0xa61   :  { %v2338_v17 = vadd.f32 %v4040_v10, %v2322_v11 }
 0xa62   :  { %v2334_v8 = vmul.f32 0.5, %v2333_v51 }
 0xa64   :  { %v2558_v44 = vpop.eup %2557  ;;  %2559 = vtanh.f32 %v2334_v8 }
 0xa65   :  { %v2331_v61 = vmul.f32 0.5, %v2558_v44 }
 0xa67   :  { %v2332_v21 = vadd.f32 0.5, %v2331_v61 }
 0xa69   :  { %v2339_v54 = vmul.f32 %v2338_v17, %v2332_v21 }
 0xa6a   :  { %v2560_v15 = vpop.eup %2559 }
 0xa6b   :  { %v2340_v5 = vadd.f32 %v2339_v54, %v1625_v1  ;;  %v2336_v24 = vmul.f32 0.5, %v2560_v15 }
 0xa6d   :  { %2561 = vtanh.f32 %v2340_v5  ;;  %v2337_v14 = vadd.f32 0.5, %v2336_v24 }
 0xa6f   :  { %v2342_v39 = vsub.f32 1.0, %v2337_v14 }
 0xa73   :  { %v2562_v10 = vpop.eup %2561 }
 0xa74   :  { %v2343_v22 = vsub.f32 %v2562_v10, %v4357_v34 }
 0xa76   :  { %v2344_v28 = vmul.f32 %v2343_v22, %v2342_v39 }
 0xa78   :  { %v2345_v37 = vadd.f32 %v2344_v28, %v4357_v34 }
 0xa7a   :  { %2382 = vmatmul.f32.vlgmr.msrb.gmra.mxu0 %v2345_v37 }
 0xaf7   :  { %v2383_v53 = vpop.f32.mrf.mxu0 }
 0xaf8   :  { %v2384_v30 = vadd.f32 %v2465_v48, %v2383_v53 }
 0xafa   :  { %v2386_v20 = vmax.f32 %v2384_v30, 0.0 }
 0xafc   :  { %2423 = vmatmul.f32.vlgmr.msra.gmra.mxu1 %v2386_v20 }
 0xb79   :  { %v2424_v34 = vpop.f32.mrf.mxu1 }
 0xb7a   :  { %v2425_v63 = vadd.f32 %v2466_v19, %v2424_v34 }
 0xb7c   :  { %2427 = vst [vmem:[#allocation18] sm:$0xff] %v2425_v63 }
 0xb7d   :  { %2438 = dma.vmem_to_hbm [thread:$0]  %s2434_s18, 128, %s2436_s1, [#allocation6]  }
 0xb7e   :  { %2827 = dma.done.wait [#allocation6], 128  }
 0xb7f   :  { %2828 = vsyncadd [#allocation6], 4294967168 }
 0xb80   :  { %2443 = vsyncpa [#allocation5], 1 }
 0xb81   :  { %2444 = vsyncpa [#allocation8], 1 }
 0xb82   :  { %2445 = vsyncpa [#allocation11], 1 }
 0xb83   :  { %2446 = vsyncpa [#allocation14], 1 }
 0xb84   :  { %2447 = vsyncpa [#allocation17], 1 }
 0xb85   :  { %2448 = vsyncpa [#allocation6], 1 }

</bundles_post_ra>
